<compile_context>
chip_gen: v7x
topology: tpu7x:2x2x1
jax: 0.10.0
libtpu: 0.0.40
codegen_flags: <defaults>
</compile_context>

<pallas_src>
import math

import numpy as np
import jax
import jax.numpy as jnp
from jax.experimental import pallas as pl
from jax.experimental.pallas import tpu as pltpu

N_QUBITS = 8
N_COORD = 6
N_STATES = 1 << N_QUBITS   # 256
N_CLS = 32                 # n_classifier_params
N_ENC = 64                 # encoding_params_size
HIDDEN = 16                # classical head hidden width
OUT_LANES = 128            # lane-dense output block: q in lane 0, y in lane 1


def _round_up(x, m):
    return ((x + m - 1) // m) * m


# ---------------------------------------------------------------------------
# Host-side constants: transposed RY generators, CNOT permutations and the
# folded encoding-layer CNOT chain.  Wire 0 is the most-significant bit of
# the state index (PennyLane order).
# ---------------------------------------------------------------------------
def _kron_list(mats):
    out = np.array([[1.0]])
    for m in mats:
        out = np.kron(out, m)
    return out


def _single_qubit_op(wire, g):
    mats = [np.eye(2)] * N_QUBITS
    mats[wire] = g
    return _kron_list(mats)


def _cnot(ctrl, tgt):
    p = np.zeros((N_STATES, N_STATES))
    cbit = 1 << (N_QUBITS - 1 - ctrl)
    tbit = 1 << (N_QUBITS - 1 - tgt)
    for i in range(N_STATES):
        j = i ^ tbit if (i & cbit) else i
        p[j, i] = 1.0
    return p


def build_operator_constants():
    # RY(theta) = cos(theta/2) I + sin(theta/2) * G,  G = [[0,-1],[1,0]]
    g = np.array([[0.0, -1.0], [1.0, 0.0]])
    a = np.stack([_single_qubit_op(w, g) for w in range(N_QUBITS)])      # (8,256,256)
    pairs = np.stack([_cnot(i, i + 1) for i in range(N_QUBITS - 1)]
                     + [_cnot(N_QUBITS - 1, 0)])                          # (8,256,256)
    # transpose so operators apply from the right: state_row @ M^T
    a_t = np.ascontiguousarray(np.transpose(a, (0, 2, 1))).astype(np.float32)
    pairs_t = np.ascontiguousarray(np.transpose(pairs, (0, 2, 1))).astype(np.float32)

    # Encoding-layer CNOT chain (0,1),(1,2),...,(6,7) folded into a single
    # exact permutation.  Row-state convention: state_after = state @ chain_t
    # with chain_t = C01^T @ C12^T @ ... @ C67^T (composed in circuit order).
    chain_t = np.eye(N_STATES)
    for i in range(N_QUBITS - 1):
        chain_t = chain_t @ np.transpose(pairs[i])
    assert np.all((chain_t == 0.0) | (chain_t == 1.0))
    return (jnp.asarray(a_t), jnp.asarray(pairs_t),
            jnp.asarray(chain_t.astype(np.float32)))


def build_classifier_operator(classifier_params, a_t, pairs_t, chain_t):
    """Fold the 96-gate, batch-invariant classifier block (plus the preceding
    layer-3 encoding CNOT chain) into one 256x256 operator.  Row-state
    convention: state_after = state_before @ m.  Built once per parameter set
    in plain XLA at HIGHEST precision (off the per-image critical path)."""
    cls = classifier_params.reshape(N_CLS).astype(jnp.float32)
    c = jnp.cos(0.5 * cls)
    s = jnp.sin(0.5 * cls)
    eye = jnp.eye(N_STATES, dtype=jnp.float32)
    hp = jax.lax.Precision.HIGHEST
    mm = lambda x, y: jnp.matmul(x, y, precision=hp)
    ry_t = lambda wire, k: c[k] * eye + s[k] * a_t[wire]   # RY(theta)^T on wire

    m = chain_t          # fold the final encoding CNOT chain (exact 0/1 perm)
    k = 0
    for _depth in range(4):
        for i in range(N_QUBITS - 1):
            m = mm(m, ry_t(i, k))
            m = mm(m, ry_t(i + 1, k))
            m = mm(m, pairs_t[i])
            k += 1
        m = mm(m, ry_t(N_QUBITS - 1, k))
        m = mm(m, ry_t(0, k))
        m = mm(m, pairs_t[N_QUBITS - 1])
        k += 1
    return m


# ---------------------------------------------------------------------------
# Pallas kernel: 8-qubit real statevector simulation + classical head.
# State layout: (batch_tile, 256) -- batch on sublanes, amplitude on lanes.
# ---------------------------------------------------------------------------
def paper_qnn_kernel(cs_ref, pchain_ref, mhi_ref, mlo_ref,
                     w1_ref, b1_ref, w2_ref, b2_ref, out_ref):
    bt = cs_ref.shape[0]
    col = jax.lax.broadcasted_iota(jnp.int32, (bt, N_STATES), 1)

    # |0..0> then Hadamards on the 6 coordinate wires (bits 7..2):
    # amplitude 1/8 on every index whose two low bits (wires 6,7) are zero.
    state = jnp.where((col & 3) == 0, jnp.float32(1.0 / 8.0), jnp.float32(0.0))

    cs = cs_ref[...]   # lane-dense: cos(theta/2) in lanes 0..63, sin in 64..127

    def enc_c(j):
        return cs[:, j:j + 1]

    def enc_s(j):
        return cs[:, N_ENC + j:N_ENC + j + 1]

    # per-wire bit masks, hoisted out of the layer loop (each reused 4x).
    bit_set = [(col & (1 << (N_QUBITS - 1 - w))) != 0 for w in range(N_QUBITS)]

    def apply_ry(st, wire, c, s):
        # RY(theta) = cos(theta/2) I + sin(theta/2) G, with G|0>=|1>, G|1>=-|0>:
        # VPU axpy + XLU lane rotation(s), single fused select.
        bit = 1 << (N_QUBITS - 1 - wire)
        if bit == N_STATES // 2:                       # wire 0: roll(+128)==roll(-128)
            part = pltpu.roll(st, bit, axis=1)
            g_st = jnp.where(bit_set[wire], part, -part)
        else:
            up = pltpu.roll(st, bit, axis=1)              # up[i] = st[i - bit]
            dn = pltpu.roll(st, N_STATES - bit, axis=1)   # dn[i] = st[i + bit]
            g_st = jnp.where(bit_set[wire], up, -dn)
        return c * st + s * g_st

    def bf16_split(st):
        hi = st.astype(jnp.bfloat16)
        lo = (st - hi.astype(jnp.float32)).astype(jnp.bfloat16)
        return hi, lo

    def apply_chain(st):
        # CNOT chain (0,1)..(6,7) as an exact permutation matmul on the
        # otherwise-idle MXU; two bf16 passes keep full f32 state accuracy
        # (the 0/1 permutation is exact in bf16, hi + lo reconstructs st).
        hi, lo = bf16_split(st)
        p = pchain_ref[...]
        return (jnp.dot(hi, p, preferred_element_type=jnp.float32)
                + jnp.dot(lo, p, preferred_element_type=jnp.float32))

    # state-prep "tensor train": 4 layers of 8 per-image RY rotations; the
    # CNOT chains of layers 0-2 go to the MXU, the layer-3 chain is folded
    # into the classifier operator.
    for layer in range(4):
        for i in range(N_QUBITS):
            j = layer * 16 + i
            state = apply_ry(state, i, enc_c(j), enc_s(j))
        if layer < 3:
            state = apply_chain(state)

    # classifier block: 96 batch-invariant gates (+ final chain) pre-folded
    # into one operator; 3 split-bf16 MXU passes give ~f32 accuracy.
    hi, lo = bf16_split(state)
    m_hi = mhi_ref[...]
    m_lo = mlo_ref[...]
    state = (jnp.dot(hi, m_hi, preferred_element_type=jnp.float32)
             + jnp.dot(lo, m_hi, preferred_element_type=jnp.float32)
             + jnp.dot(hi, m_lo, preferred_element_type=jnp.float32))

    # <Z_0>: amplitudes are real, so expval = sum(sign * amp^2)
    sign = jnp.where(bit_set[0], jnp.float32(-1.0), jnp.float32(1.0))
    q = jnp.sum(state * state * sign, axis=-1, keepdims=True)            # (bt, 1)

    # classical head: Linear(1,16) -> ReLU -> Dropout(identity) -> Linear(16,1)
    h = jnp.maximum(q * w1_ref[...] + b1_ref[...], 0.0)                  # (bt, 16)
    y = jnp.sum(h * w2_ref[...], axis=-1, keepdims=True) + b2_ref[...]   # (bt, 1)

    # lane-dense output block: q in lane 0, y in lane 1, zeros elsewhere.
    lane = jax.lax.broadcasted_iota(jnp.int32, (bt, OUT_LANES), 1)
    out_ref[...] = jnp.where(lane == 0, q,
                             jnp.where(lane == 1, y, jnp.float32(0.0)))


# ---------------------------------------------------------------------------
# Wrapper: FRQI angle transform, classifier fold, batch tiling, pallas_call.
# ---------------------------------------------------------------------------
def paper_qnn_forward(x, classifier_params, w1, b1, w2, b2, consts):
    a_t, pairs_t, chain_t = consts
    batch = x.shape[0]

    # batch tiling: multiple of 8 sublanes, up to 256 rows (full MXU M) per
    # grid step; mid-size batches are split into >= 2 steps so both v7x
    # TensorCores get work (the grid axis is marked "parallel").
    b8 = _round_up(batch, 8)
    if b8 <= 8:
        bt = 8
    elif b8 <= 512:
        bt = _round_up(b8 // 2, 8)
    else:
        bt = 256
    b_pad = _round_up(batch, bt)

    # encode_image fixed point: encoding_params == (flat_image + 1) * pi / 4
    angles = (x.reshape(batch, -1).astype(jnp.float32) + 1.0) * (math.pi / 4.0)
    if b_pad != batch:
        angles = jnp.pad(angles, ((0, b_pad - batch), (0, 0)))   # angle 0 -> identity
    # lane-dense packed input: cos(theta/2) in lanes 0..63, sin in 64..127
    cs = jnp.concatenate([jnp.cos(0.5 * angles), jnp.sin(0.5 * angles)], axis=1)

    # batch-invariant classifier operator (one 256x256 matrix), built in XLA
    # off the per-image critical path; split into bf16 hi/lo for the MXU.
    m_cls = build_classifier_operator(classifier_params, a_t, pairs_t, chain_t)
    m_hi = m_cls.astype(jnp.bfloat16)
    m_lo = (m_cls - m_hi.astype(jnp.float32)).astype(jnp.bfloat16)
    p_chain = chain_t.astype(jnp.bfloat16)     # 0/1 permutation, exact in bf16

    w1_row = w1.reshape(1, HIDDEN).astype(jnp.float32)   # Linear(1,16).weight.T
    b1_row = b1.reshape(1, HIDDEN).astype(jnp.float32)
    w2_row = w2.reshape(1, HIDDEN).astype(jnp.float32)   # Linear(16,1).weight
    b2_row = b2.reshape(1, 1).astype(jnp.float32)

    out = pl.pallas_call(
        paper_qnn_kernel,
        out_shape=jax.ShapeDtypeStruct((b_pad, OUT_LANES), jnp.float32),
        grid=(b_pad // bt,),
        in_specs=[
            pl.BlockSpec((bt, 2 * N_ENC), lambda b: (b, 0)),
            # grid-invariant operator blocks (constant index map -> no re-fetch)
            pl.BlockSpec((N_STATES, N_STATES), lambda b: (0, 0)),
            pl.BlockSpec((N_STATES, N_STATES), lambda b: (0, 0)),
            pl.BlockSpec((N_STATES, N_STATES), lambda b: (0, 0)),
            pl.BlockSpec((1, HIDDEN), lambda b: (0, 0)),
            pl.BlockSpec((1, HIDDEN), lambda b: (0, 0)),
            pl.BlockSpec((1, HIDDEN), lambda b: (0, 0)),
            pl.BlockSpec((1, 1), lambda b: (0, 0)),
        ],
        out_specs=pl.BlockSpec((bt, OUT_LANES), lambda b: (b, 0)),
        compiler_params=pltpu.CompilerParams(
            dimension_semantics=("parallel",),           # 2 TCs on v7x
            vmem_limit_bytes=16 * 1024 * 1024),
    )(cs, p_chain, m_hi, m_lo, w1_row, b1_row, w2_row, b2_row)

    q = out[:batch, 0:1]
    y = out[:batch, 1:2]
    return y, q


# ---------------------------------------------------------------------------
# Pure NumPy (float64) reference for verification.
# ---------------------------------------------------------------------------
def reference_forward(x, cls_params, w1, b1, w2, b2):
    def ry(t):
        c, s = math.cos(t / 2.0), math.sin(t / 2.0)
        return np.array([[c, -s], [s, c]])

    h2 = np.array([[1.0, 1.0], [1.0, -1.0]]) / math.sqrt(2.0)

    def apply_1q(psi, g, w):
        t = psi.reshape([2] * N_QUBITS)
        t = np.moveaxis(t, w, 0)
        t = np.tensordot(g, t, axes=([1], [0]))
        t = np.moveaxis(t, 0, w)
        return t.reshape(-1)

    def apply_cnot(psi, c, t):
        idx = np.arange(N_STATES)
        cbit = 1 << (N_QUBITS - 1 - c)
        tbit = 1 << (N_QUBITS - 1 - t)
        src = np.where(idx & cbit, idx ^ tbit, idx)
        return psi[src]

    qs = []
    for bi in range(x.shape[0]):
        angles = (x[bi].reshape(-1) + 1.0) * math.pi / 4.0
        psi = np.zeros(N_STATES)
        psi[0] = 1.0
        for w in range(N_COORD):
            psi = apply_1q(psi, h2, w)
        for layer in range(4):
            for i in range(N_QUBITS):
                psi = apply_1q(psi, ry(angles[layer * 16 + i]), i)
            for i in range(N_QUBITS - 1):
                psi = apply_cnot(psi, i, i + 1)
        k = 0
        for _depth in range(4):
            for i in range(N_QUBITS - 1):
                psi = apply_1q(psi, ry(cls_params[k]), i)
                psi = apply_1q(psi, ry(cls_params[k]), i + 1)
                psi = apply_cnot(psi, i, i + 1)
                k += 1
            psi = apply_1q(psi, ry(cls_params[k]), N_QUBITS - 1)
            psi = apply_1q(psi, ry(cls_params[k]), 0)
            psi = apply_cnot(psi, N_QUBITS - 1, 0)
            k += 1
        sign = np.where(np.arange(N_STATES) < N_STATES // 2, 1.0, -1.0)
        qs.append(float(np.sum(sign * psi * psi)))

    q = np.array(qs).reshape(-1, 1)
    h = np.maximum(q @ w1.T + b1, 0.0)
    y = h @ w2.T + b2
    return y, q


if __name__ == "__main__":
    key = jax.random.PRNGKey(0)
    k_x, k_cls, k_w1, k_b1, k_w2, k_b2 = jax.random.split(key, 6)

    B = 2
    # 8x8 single-channel images in [-1, 1], NCHW as in the PyTorch module
    x = jax.random.uniform(k_x, (B, 1, 8, 8), jnp.float32, minval=-1.0, maxval=1.0)

    # classifier_params = randn(32) * 0.1
    classifier_params = 0.1 * jax.random.normal(k_cls, (N_CLS,), jnp.float32)

    # classical head: Linear(1,16) -> ReLU -> Dropout -> Linear(16,1)
    w1 = 0.5 * jax.random.normal(k_w1, (HIDDEN, 1), jnp.float32)
    b1 = 0.1 * jax.random.normal(k_b1, (HIDDEN,), jnp.float32)
    w2 = 0.25 * jax.random.normal(k_w2, (1, HIDDEN), jnp.float32)
    b2 = 0.1 * jax.random.normal(k_b2, (1,), jnp.float32)

    consts = build_operator_constants()

    fwd = jax.jit(paper_qnn_forward)
    y, q = fwd(x, classifier_params, w1, b1, w2, b2, consts)
    y = jax.block_until_ready(y)
    q = jax.block_until_ready(q)

    y_ref, q_ref = reference_forward(
        np.asarray(x, np.float64), np.asarray(classifier_params, np.float64),
        np.asarray(w1, np.float64), np.asarray(b1, np.float64),
        np.asarray(w2, np.float64), np.asarray(b2, np.float64))

    # tolerance: everything is f32; the MXU matmuls use split-bf16 passes
    # (exact permutations, ~f32-accurate classifier), so error is dominated by
    # the f32 HIGHEST-precision fold of the classifier operator (~1e-4).
    assert np.allclose(np.asarray(q), q_ref, atol=2e-3), (np.asarray(q), q_ref)
    assert np.allclose(np.asarray(y), y_ref, atol=2e-3), (np.asarray(y), y_ref)

    print("KERNEL_OK")
</pallas_src>

<mosaic_0001>
module attributes {stable_mosaic.version = 11 : i64} {
  func.func @paper_qnn_kernel(%arg0: i32, %arg1: memref<8x128xf32, #tpu.memory_space<vmem>>, %arg2: memref<256x256xbf16, #tpu.memory_space<vmem>>, %arg3: memref<256x256xbf16, #tpu.memory_space<vmem>>, %arg4: memref<256x256xbf16, #tpu.memory_space<vmem>>, %arg5: memref<1x16xf32, #tpu.memory_space<vmem>>, %arg6: memref<1x16xf32, #tpu.memory_space<vmem>>, %arg7: memref<1x16xf32, #tpu.memory_space<vmem>>, %arg8: memref<1x1xf32, #tpu.memory_space<vmem>>, %arg9: memref<8x128xf32, #tpu.memory_space<vmem>>) attributes {dimension_semantics = [#tpu.dimension_semantics<parallel>], iteration_bounds = array<i64: 1>, scalar_prefetch = 0 : i64, scratch_operands = 0 : i64, tpu.core_type = #tpu.core_type<tc>, window_params = [{transform_indices = @transform_0, window_bounds = array<i64: 8, 128>}, {pipeline_mode = #tpu.pipeline_mode<synchronous>, transform_indices = @transform_1, window_bounds = array<i64: 256, 256>}, {pipeline_mode = #tpu.pipeline_mode<synchronous>, transform_indices = @transform_2, window_bounds = array<i64: 256, 256>}, {pipeline_mode = #tpu.pipeline_mode<synchronous>, transform_indices = @transform_3, window_bounds = array<i64: 256, 256>}, {pipeline_mode = #tpu.pipeline_mode<synchronous>, transform_indices = @transform_4, window_bounds = array<i64: 1, 16>}, {pipeline_mode = #tpu.pipeline_mode<synchronous>, transform_indices = @transform_5, window_bounds = array<i64: 1, 16>}, {pipeline_mode = #tpu.pipeline_mode<synchronous>, transform_indices = @transform_6, window_bounds = array<i64: 1, 16>}, {pipeline_mode = #tpu.pipeline_mode<synchronous>, transform_indices = @transform_7, window_bounds = array<i64: 1, 1>}, {transform_indices = @transform_8, window_bounds = array<i64: 8, 128>}]} {
    %0 = tpu.iota {dimensions = array<i32: 1>} : vector<8x256xi32>
    %c3_i32 = arith.constant 3 : i32
    %1 = vector.broadcast %c3_i32 : i32 to vector<8x256xi32>
    %2 = arith.andi %0, %1 : vector<8x256xi32>
    %c0_i32 = arith.constant 0 : i32
    %3 = vector.broadcast %c0_i32 : i32 to vector<8x256xi32>
    %4 = arith.cmpi eq, %2, %3 : vector<8x256xi32>
    %cst = arith.constant 1.250000e-01 : f32
    %cst_0 = arith.constant 0.000000e+00 : f32
    %5 = vector.broadcast %cst : f32 to vector<8x256xf32>
    %6 = vector.broadcast %cst_0 : f32 to vector<8x256xf32>
    %7 = arith.select %4, %5, %6 : vector<8x256xi1>, vector<8x256xf32>
    %c0 = arith.constant 0 : index
    %c0_1 = arith.constant 0 : index
    %8 = vector.load %arg1[%c0, %c0_1] : memref<8x128xf32, #tpu.memory_space<vmem>>, vector<8x128xf32>
    %c128_i32 = arith.constant 128 : i32
    %9 = vector.broadcast %c128_i32 : i32 to vector<8x256xi32>
    %10 = arith.andi %0, %9 : vector<8x256xi32>
    %c0_i32_2 = arith.constant 0 : i32
    %11 = vector.broadcast %c0_i32_2 : i32 to vector<8x256xi32>
    %12 = arith.cmpi ne, %10, %11 : vector<8x256xi32>
    %c64_i32 = arith.constant 64 : i32
    %13 = vector.broadcast %c64_i32 : i32 to vector<8x256xi32>
    %14 = arith.andi %0, %13 : vector<8x256xi32>
    %c0_i32_3 = arith.constant 0 : i32
    %15 = vector.broadcast %c0_i32_3 : i32 to vector<8x256xi32>
    %16 = arith.cmpi ne, %14, %15 : vector<8x256xi32>
    %c32_i32 = arith.constant 32 : i32
    %17 = vector.broadcast %c32_i32 : i32 to vector<8x256xi32>
    %18 = arith.andi %0, %17 : vector<8x256xi32>
    %c0_i32_4 = arith.constant 0 : i32
    %19 = vector.broadcast %c0_i32_4 : i32 to vector<8x256xi32>
    %20 = arith.cmpi ne, %18, %19 : vector<8x256xi32>
    %c16_i32 = arith.constant 16 : i32
    %21 = vector.broadcast %c16_i32 : i32 to vector<8x256xi32>
    %22 = arith.andi %0, %21 : vector<8x256xi32>
    %c0_i32_5 = arith.constant 0 : i32
    %23 = vector.broadcast %c0_i32_5 : i32 to vector<8x256xi32>
    %24 = arith.cmpi ne, %22, %23 : vector<8x256xi32>
    %c8_i32 = arith.constant 8 : i32
    %25 = vector.broadcast %c8_i32 : i32 to vector<8x256xi32>
    %26 = arith.andi %0, %25 : vector<8x256xi32>
    %c0_i32_6 = arith.constant 0 : i32
    %27 = vector.broadcast %c0_i32_6 : i32 to vector<8x256xi32>
    %28 = arith.cmpi ne, %26, %27 : vector<8x256xi32>
    %c4_i32 = arith.constant 4 : i32
    %29 = vector.broadcast %c4_i32 : i32 to vector<8x256xi32>
    %30 = arith.andi %0, %29 : vector<8x256xi32>
    %c0_i32_7 = arith.constant 0 : i32
    %31 = vector.broadcast %c0_i32_7 : i32 to vector<8x256xi32>
    %32 = arith.cmpi ne, %30, %31 : vector<8x256xi32>
    %c2_i32 = arith.constant 2 : i32
    %33 = vector.broadcast %c2_i32 : i32 to vector<8x256xi32>
    %34 = arith.andi %0, %33 : vector<8x256xi32>
    %c0_i32_8 = arith.constant 0 : i32
    %35 = vector.broadcast %c0_i32_8 : i32 to vector<8x256xi32>
    %36 = arith.cmpi ne, %34, %35 : vector<8x256xi32>
    %c1_i32 = arith.constant 1 : i32
    %37 = vector.broadcast %c1_i32 : i32 to vector<8x256xi32>
    %38 = arith.andi %0, %37 : vector<8x256xi32>
    %c0_i32_9 = arith.constant 0 : i32
    %39 = vector.broadcast %c0_i32_9 : i32 to vector<8x256xi32>
    %40 = arith.cmpi ne, %38, %39 : vector<8x256xi32>
    %41 = vector.extract_strided_slice %8 {offsets = [0, 0], sizes = [8, 1], strides = [1, 1]} : vector<8x128xf32> to vector<8x1xf32>
    %42 = vector.extract_strided_slice %8 {offsets = [0, 64], sizes = [8, 1], strides = [1, 1]} : vector<8x128xf32> to vector<8x1xf32>
    %c128_i32_10 = arith.constant 128 : i32
    %43 = tpu.dynamic_rotate %7 by %c128_i32_10 dim 1 : vector<8x256xf32>, i32 -> vector<8x256xf32>
    %cst_11 = arith.constant 0.000000e+00 : f32
    %44 = vector.broadcast %cst_11 : f32 to vector<8x256xf32>
    %45 = arith.subf %44, %43 : vector<8x256xf32>
    %46 = arith.select %12, %43, %45 : vector<8x256xi1>, vector<8x256xf32>
    %47 = vector.broadcast %41 : vector<8x1xf32> to vector<8x256xf32>
    %48 = arith.mulf %47, %7 : vector<8x256xf32>
    %49 = vector.broadcast %42 : vector<8x1xf32> to vector<8x256xf32>
    %50 = arith.mulf %49, %46 : vector<8x256xf32>
    %51 = arith.addf %48, %50 : vector<8x256xf32>
    %52 = vector.extract_strided_slice %8 {offsets = [0, 1], sizes = [8, 1], strides = [1, 1]} : vector<8x128xf32> to vector<8x1xf32>
    %53 = vector.extract_strided_slice %8 {offsets = [0, 65], sizes = [8, 1], strides = [1, 1]} : vector<8x128xf32> to vector<8x1xf32>
    %c64_i32_12 = arith.constant 64 : i32
    %54 = tpu.dynamic_rotate %51 by %c64_i32_12 dim 1 : vector<8x256xf32>, i32 -> vector<8x256xf32>
    %c192_i32 = arith.constant 192 : i32
    %55 = tpu.dynamic_rotate %51 by %c192_i32 dim 1 : vector<8x256xf32>, i32 -> vector<8x256xf32>
    %cst_13 = arith.constant 0.000000e+00 : f32
    %56 = vector.broadcast %cst_13 : f32 to vector<8x256xf32>
    %57 = arith.subf %56, %55 : vector<8x256xf32>
    %58 = arith.select %16, %54, %57 : vector<8x256xi1>, vector<8x256xf32>
    %59 = vector.broadcast %52 : vector<8x1xf32> to vector<8x256xf32>
    %60 = arith.mulf %59, %51 : vector<8x256xf32>
    %61 = vector.broadcast %53 : vector<8x1xf32> to vector<8x256xf32>
    %62 = arith.mulf %61, %58 : vector<8x256xf32>
    %63 = arith.addf %60, %62 : vector<8x256xf32>
    %64 = vector.extract_strided_slice %8 {offsets = [0, 2], sizes = [8, 1], strides = [1, 1]} : vector<8x128xf32> to vector<8x1xf32>
    %65 = vector.extract_strided_slice %8 {offsets = [0, 66], sizes = [8, 1], strides = [1, 1]} : vector<8x128xf32> to vector<8x1xf32>
    %c32_i32_14 = arith.constant 32 : i32
    %66 = tpu.dynamic_rotate %63 by %c32_i32_14 dim 1 : vector<8x256xf32>, i32 -> vector<8x256xf32>
    %c224_i32 = arith.constant 224 : i32
    %67 = tpu.dynamic_rotate %63 by %c224_i32 dim 1 : vector<8x256xf32>, i32 -> vector<8x256xf32>
    %cst_15 = arith.constant 0.000000e+00 : f32
    %68 = vector.broadcast %cst_15 : f32 to vector<8x256xf32>
    %69 = arith.subf %68, %67 : vector<8x256xf32>
    %70 = arith.select %20, %66, %69 : vector<8x256xi1>, vector<8x256xf32>
    %71 = vector.broadcast %64 : vector<8x1xf32> to vector<8x256xf32>
    %72 = arith.mulf %71, %63 : vector<8x256xf32>
    %73 = vector.broadcast %65 : vector<8x1xf32> to vector<8x256xf32>
    %74 = arith.mulf %73, %70 : vector<8x256xf32>
    %75 = arith.addf %72, %74 : vector<8x256xf32>
    %76 = vector.extract_strided_slice %8 {offsets = [0, 3], sizes = [8, 1], strides = [1, 1]} : vector<8x128xf32> to vector<8x1xf32>
    %77 = vector.extract_strided_slice %8 {offsets = [0, 67], sizes = [8, 1], strides = [1, 1]} : vector<8x128xf32> to vector<8x1xf32>
    %c16_i32_16 = arith.constant 16 : i32
    %78 = tpu.dynamic_rotate %75 by %c16_i32_16 dim 1 : vector<8x256xf32>, i32 -> vector<8x256xf32>
    %c240_i32 = arith.constant 240 : i32
    %79 = tpu.dynamic_rotate %75 by %c240_i32 dim 1 : vector<8x256xf32>, i32 -> vector<8x256xf32>
    %cst_17 = arith.constant 0.000000e+00 : f32
    %80 = vector.broadcast %cst_17 : f32 to vector<8x256xf32>
    %81 = arith.subf %80, %79 : vector<8x256xf32>
    %82 = arith.select %24, %78, %81 : vector<8x256xi1>, vector<8x256xf32>
    %83 = vector.broadcast %76 : vector<8x1xf32> to vector<8x256xf32>
    %84 = arith.mulf %83, %75 : vector<8x256xf32>
    %85 = vector.broadcast %77 : vector<8x1xf32> to vector<8x256xf32>
    %86 = arith.mulf %85, %82 : vector<8x256xf32>
    %87 = arith.addf %84, %86 : vector<8x256xf32>
    %88 = vector.extract_strided_slice %8 {offsets = [0, 4], sizes = [8, 1], strides = [1, 1]} : vector<8x128xf32> to vector<8x1xf32>
    %89 = vector.extract_strided_slice %8 {offsets = [0, 68], sizes = [8, 1], strides = [1, 1]} : vector<8x128xf32> to vector<8x1xf32>
    %c8_i32_18 = arith.constant 8 : i32
    %90 = tpu.dynamic_rotate %87 by %c8_i32_18 dim 1 : vector<8x256xf32>, i32 -> vector<8x256xf32>
    %c248_i32 = arith.constant 248 : i32
    %91 = tpu.dynamic_rotate %87 by %c248_i32 dim 1 : vector<8x256xf32>, i32 -> vector<8x256xf32>
    %cst_19 = arith.constant 0.000000e+00 : f32
    %92 = vector.broadcast %cst_19 : f32 to vector<8x256xf32>
    %93 = arith.subf %92, %91 : vector<8x256xf32>
    %94 = arith.select %28, %90, %93 : vector<8x256xi1>, vector<8x256xf32>
    %95 = vector.broadcast %88 : vector<8x1xf32> to vector<8x256xf32>
    %96 = arith.mulf %95, %87 : vector<8x256xf32>
    %97 = vector.broadcast %89 : vector<8x1xf32> to vector<8x256xf32>
    %98 = arith.mulf %97, %94 : vector<8x256xf32>
    %99 = arith.addf %96, %98 : vector<8x256xf32>
    %100 = vector.extract_strided_slice %8 {offsets = [0, 5], sizes = [8, 1], strides = [1, 1]} : vector<8x128xf32> to vector<8x1xf32>
    %101 = vector.extract_strided_slice %8 {offsets = [0, 69], sizes = [8, 1], strides = [1, 1]} : vector<8x128xf32> to vector<8x1xf32>
    %c4_i32_20 = arith.constant 4 : i32
    %102 = tpu.dynamic_rotate %99 by %c4_i32_20 dim 1 : vector<8x256xf32>, i32 -> vector<8x256xf32>
    %c252_i32 = arith.constant 252 : i32
    %103 = tpu.dynamic_rotate %99 by %c252_i32 dim 1 : vector<8x256xf32>, i32 -> vector<8x256xf32>
    %cst_21 = arith.constant 0.000000e+00 : f32
    %104 = vector.broadcast %cst_21 : f32 to vector<8x256xf32>
    %105 = arith.subf %104, %103 : vector<8x256xf32>
    %106 = arith.select %32, %102, %105 : vector<8x256xi1>, vector<8x256xf32>
    %107 = vector.broadcast %100 : vector<8x1xf32> to vector<8x256xf32>
    %108 = arith.mulf %107, %99 : vector<8x256xf32>
    %109 = vector.broadcast %101 : vector<8x1xf32> to vector<8x256xf32>
    %110 = arith.mulf %109, %106 : vector<8x256xf32>
    %111 = arith.addf %108, %110 : vector<8x256xf32>
    %112 = vector.extract_strided_slice %8 {offsets = [0, 6], sizes = [8, 1], strides = [1, 1]} : vector<8x128xf32> to vector<8x1xf32>
    %113 = vector.extract_strided_slice %8 {offsets = [0, 70], sizes = [8, 1], strides = [1, 1]} : vector<8x128xf32> to vector<8x1xf32>
    %c2_i32_22 = arith.constant 2 : i32
    %114 = tpu.dynamic_rotate %111 by %c2_i32_22 dim 1 : vector<8x256xf32>, i32 -> vector<8x256xf32>
    %c254_i32 = arith.constant 254 : i32
    %115 = tpu.dynamic_rotate %111 by %c254_i32 dim 1 : vector<8x256xf32>, i32 -> vector<8x256xf32>
    %cst_23 = arith.constant 0.000000e+00 : f32
    %116 = vector.broadcast %cst_23 : f32 to vector<8x256xf32>
    %117 = arith.subf %116, %115 : vector<8x256xf32>
    %118 = arith.select %36, %114, %117 : vector<8x256xi1>, vector<8x256xf32>
    %119 = vector.broadcast %112 : vector<8x1xf32> to vector<8x256xf32>
    %120 = arith.mulf %119, %111 : vector<8x256xf32>
    %121 = vector.broadcast %113 : vector<8x1xf32> to vector<8x256xf32>
    %122 = arith.mulf %121, %118 : vector<8x256xf32>
    %123 = arith.addf %120, %122 : vector<8x256xf32>
    %124 = vector.extract_strided_slice %8 {offsets = [0, 7], sizes = [8, 1], strides = [1, 1]} : vector<8x128xf32> to vector<8x1xf32>
    %125 = vector.extract_strided_slice %8 {offsets = [0, 71], sizes = [8, 1], strides = [1, 1]} : vector<8x128xf32> to vector<8x1xf32>
    %c1_i32_24 = arith.constant 1 : i32
    %126 = tpu.dynamic_rotate %123 by %c1_i32_24 dim 1 : vector<8x256xf32>, i32 -> vector<8x256xf32>
    %c255_i32 = arith.constant 255 : i32
    %127 = tpu.dynamic_rotate %123 by %c255_i32 dim 1 : vector<8x256xf32>, i32 -> vector<8x256xf32>
    %cst_25 = arith.constant 0.000000e+00 : f32
    %128 = vector.broadcast %cst_25 : f32 to vector<8x256xf32>
    %129 = arith.subf %128, %127 : vector<8x256xf32>
    %130 = arith.select %40, %126, %129 : vector<8x256xi1>, vector<8x256xf32>
    %131 = vector.broadcast %124 : vector<8x1xf32> to vector<8x256xf32>
    %132 = arith.mulf %131, %123 : vector<8x256xf32>
    %133 = vector.broadcast %125 : vector<8x1xf32> to vector<8x256xf32>
    %134 = arith.mulf %133, %130 : vector<8x256xf32>
    %135 = arith.addf %132, %134 : vector<8x256xf32>
    %136 = arith.truncf %135 : vector<8x256xf32> to vector<8x256xbf16>
    %137 = arith.extf %136 : vector<8x256xbf16> to vector<8x256xf32>
    %138 = arith.subf %135, %137 : vector<8x256xf32>
    %139 = arith.truncf %138 : vector<8x256xf32> to vector<8x256xbf16>
    %c0_26 = arith.constant 0 : index
    %c0_27 = arith.constant 0 : index
    %140 = vector.load %arg2[%c0_26, %c0_27] : memref<256x256xbf16, #tpu.memory_space<vmem>>, vector<256x256xbf16>
    %cst_28 = arith.constant dense<0.000000e+00> : vector<8x256xf32>
    %141 = tpu.matmul %136, %140, %cst_28 {dimension_numbers = #tpu.dot_dimension_numbers<[1], [0], [0], [1], [0, 0, 1, 1], [], []>} : vector<8x256xbf16>, vector<256x256xbf16>, vector<8x256xf32> -> vector<8x256xf32>
    %cst_29 = arith.constant dense<0.000000e+00> : vector<8x256xf32>
    %142 = tpu.matmul %139, %140, %cst_29 {dimension_numbers = #tpu.dot_dimension_numbers<[1], [0], [0], [1], [0, 0, 1, 1], [], []>} : vector<8x256xbf16>, vector<256x256xbf16>, vector<8x256xf32> -> vector<8x256xf32>
    %143 = arith.addf %141, %142 : vector<8x256xf32>
    %144 = vector.extract_strided_slice %8 {offsets = [0, 16], sizes = [8, 1], strides = [1, 1]} : vector<8x128xf32> to vector<8x1xf32>
    %145 = vector.extract_strided_slice %8 {offsets = [0, 80], sizes = [8, 1], strides = [1, 1]} : vector<8x128xf32> to vector<8x1xf32>
    %c128_i32_30 = arith.constant 128 : i32
    %146 = tpu.dynamic_rotate %143 by %c128_i32_30 dim 1 : vector<8x256xf32>, i32 -> vector<8x256xf32>
    %cst_31 = arith.constant 0.000000e+00 : f32
    %147 = vector.broadcast %cst_31 : f32 to vector<8x256xf32>
    %148 = arith.subf %147, %146 : vector<8x256xf32>
    %149 = arith.select %12, %146, %148 : vector<8x256xi1>, vector<8x256xf32>
    %150 = vector.broadcast %144 : vector<8x1xf32> to vector<8x256xf32>
    %151 = arith.mulf %150, %143 : vector<8x256xf32>
    %152 = vector.broadcast %145 : vector<8x1xf32> to vector<8x256xf32>
    %153 = arith.mulf %152, %149 : vector<8x256xf32>
    %154 = arith.addf %151, %153 : vector<8x256xf32>
    %155 = vector.extract_strided_slice %8 {offsets = [0, 17], sizes = [8, 1], strides = [1, 1]} : vector<8x128xf32> to vector<8x1xf32>
    %156 = vector.extract_strided_slice %8 {offsets = [0, 81], sizes = [8, 1], strides = [1, 1]} : vector<8x128xf32> to vector<8x1xf32>
    %c64_i32_32 = arith.constant 64 : i32
    %157 = tpu.dynamic_rotate %154 by %c64_i32_32 dim 1 : vector<8x256xf32>, i32 -> vector<8x256xf32>
    %c192_i32_33 = arith.constant 192 : i32
    %158 = tpu.dynamic_rotate %154 by %c192_i32_33 dim 1 : vector<8x256xf32>, i32 -> vector<8x256xf32>
    %cst_34 = arith.constant 0.000000e+00 : f32
    %159 = vector.broadcast %cst_34 : f32 to vector<8x256xf32>
    %160 = arith.subf %159, %158 : vector<8x256xf32>
    %161 = arith.select %16, %157, %160 : vector<8x256xi1>, vector<8x256xf32>
    %162 = vector.broadcast %155 : vector<8x1xf32> to vector<8x256xf32>
    %163 = arith.mulf %162, %154 : vector<8x256xf32>
    %164 = vector.broadcast %156 : vector<8x1xf32> to vector<8x256xf32>
    %165 = arith.mulf %164, %161 : vector<8x256xf32>
    %166 = arith.addf %163, %165 : vector<8x256xf32>
    %167 = vector.extract_strided_slice %8 {offsets = [0, 18], sizes = [8, 1], strides = [1, 1]} : vector<8x128xf32> to vector<8x1xf32>
    %168 = vector.extract_strided_slice %8 {offsets = [0, 82], sizes = [8, 1], strides = [1, 1]} : vector<8x128xf32> to vector<8x1xf32>
    %c32_i32_35 = arith.constant 32 : i32
    %169 = tpu.dynamic_rotate %166 by %c32_i32_35 dim 1 : vector<8x256xf32>, i32 -> vector<8x256xf32>
    %c224_i32_36 = arith.constant 224 : i32
    %170 = tpu.dynamic_rotate %166 by %c224_i32_36 dim 1 : vector<8x256xf32>, i32 -> vector<8x256xf32>
    %cst_37 = arith.constant 0.000000e+00 : f32
    %171 = vector.broadcast %cst_37 : f32 to vector<8x256xf32>
    %172 = arith.subf %171, %170 : vector<8x256xf32>
    %173 = arith.select %20, %169, %172 : vector<8x256xi1>, vector<8x256xf32>
    %174 = vector.broadcast %167 : vector<8x1xf32> to vector<8x256xf32>
    %175 = arith.mulf %174, %166 : vector<8x256xf32>
    %176 = vector.broadcast %168 : vector<8x1xf32> to vector<8x256xf32>
    %177 = arith.mulf %176, %173 : vector<8x256xf32>
    %178 = arith.addf %175, %177 : vector<8x256xf32>
    %179 = vector.extract_strided_slice %8 {offsets = [0, 19], sizes = [8, 1], strides = [1, 1]} : vector<8x128xf32> to vector<8x1xf32>
    %180 = vector.extract_strided_slice %8 {offsets = [0, 83], sizes = [8, 1], strides = [1, 1]} : vector<8x128xf32> to vector<8x1xf32>
    %c16_i32_38 = arith.constant 16 : i32
    %181 = tpu.dynamic_rotate %178 by %c16_i32_38 dim 1 : vector<8x256xf32>, i32 -> vector<8x256xf32>
    %c240_i32_39 = arith.constant 240 : i32
    %182 = tpu.dynamic_rotate %178 by %c240_i32_39 dim 1 : vector<8x256xf32>, i32 -> vector<8x256xf32>
    %cst_40 = arith.constant 0.000000e+00 : f32
    %183 = vector.broadcast %cst_40 : f32 to vector<8x256xf32>
    %184 = arith.subf %183, %182 : vector<8x256xf32>
    %185 = arith.select %24, %181, %184 : vector<8x256xi1>, vector<8x256xf32>
    %186 = vector.broadcast %179 : vector<8x1xf32> to vector<8x256xf32>
    %187 = arith.mulf %186, %178 : vector<8x256xf32>
    %188 = vector.broadcast %180 : vector<8x1xf32> to vector<8x256xf32>
    %189 = arith.mulf %188, %185 : vector<8x256xf32>
    %190 = arith.addf %187, %189 : vector<8x256xf32>
    %191 = vector.extract_strided_slice %8 {offsets = [0, 20], sizes = [8, 1], strides = [1, 1]} : vector<8x128xf32> to vector<8x1xf32>
    %192 = vector.extract_strided_slice %8 {offsets = [0, 84], sizes = [8, 1], strides = [1, 1]} : vector<8x128xf32> to vector<8x1xf32>
    %c8_i32_41 = arith.constant 8 : i32
    %193 = tpu.dynamic_rotate %190 by %c8_i32_41 dim 1 : vector<8x256xf32>, i32 -> vector<8x256xf32>
    %c248_i32_42 = arith.constant 248 : i32
    %194 = tpu.dynamic_rotate %190 by %c248_i32_42 dim 1 : vector<8x256xf32>, i32 -> vector<8x256xf32>
    %cst_43 = arith.constant 0.000000e+00 : f32
    %195 = vector.broadcast %cst_43 : f32 to vector<8x256xf32>
    %196 = arith.subf %195, %194 : vector<8x256xf32>
    %197 = arith.select %28, %193, %196 : vector<8x256xi1>, vector<8x256xf32>
    %198 = vector.broadcast %191 : vector<8x1xf32> to vector<8x256xf32>
    %199 = arith.mulf %198, %190 : vector<8x256xf32>
    %200 = vector.broadcast %192 : vector<8x1xf32> to vector<8x256xf32>
    %201 = arith.mulf %200, %197 : vector<8x256xf32>
    %202 = arith.addf %199, %201 : vector<8x256xf32>
    %203 = vector.extract_strided_slice %8 {offsets = [0, 21], sizes = [8, 1], strides = [1, 1]} : vector<8x128xf32> to vector<8x1xf32>
    %204 = vector.extract_strided_slice %8 {offsets = [0, 85], sizes = [8, 1], strides = [1, 1]} : vector<8x128xf32> to vector<8x1xf32>
    %c4_i32_44 = arith.constant 4 : i32
    %205 = tpu.dynamic_rotate %202 by %c4_i32_44 dim 1 : vector<8x256xf32>, i32 -> vector<8x256xf32>
    %c252_i32_45 = arith.constant 252 : i32
    %206 = tpu.dynamic_rotate %202 by %c252_i32_45 dim 1 : vector<8x256xf32>, i32 -> vector<8x256xf32>
    %cst_46 = arith.constant 0.000000e+00 : f32
    %207 = vector.broadcast %cst_46 : f32 to vector<8x256xf32>
    %208 = arith.subf %207, %206 : vector<8x256xf32>
    %209 = arith.select %32, %205, %208 : vector<8x256xi1>, vector<8x256xf32>
    %210 = vector.broadcast %203 : vector<8x1xf32> to vector<8x256xf32>
    %211 = arith.mulf %210, %202 : vector<8x256xf32>
    %212 = vector.broadcast %204 : vector<8x1xf32> to vector<8x256xf32>
    %213 = arith.mulf %212, %209 : vector<8x256xf32>
    %214 = arith.addf %211, %213 : vector<8x256xf32>
    %215 = vector.extract_strided_slice %8 {offsets = [0, 22], sizes = [8, 1], strides = [1, 1]} : vector<8x128xf32> to vector<8x1xf32>
    %216 = vector.extract_strided_slice %8 {offsets = [0, 86], sizes = [8, 1], strides = [1, 1]} : vector<8x128xf32> to vector<8x1xf32>
    %c2_i32_47 = arith.constant 2 : i32
    %217 = tpu.dynamic_rotate %214 by %c2_i32_47 dim 1 : vector<8x256xf32>, i32 -> vector<8x256xf32>
    %c254_i32_48 = arith.constant 254 : i32
    %218 = tpu.dynamic_rotate %214 by %c254_i32_48 dim 1 : vector<8x256xf32>, i32 -> vector<8x256xf32>
    %cst_49 = arith.constant 0.000000e+00 : f32
    %219 = vector.broadcast %cst_49 : f32 to vector<8x256xf32>
    %220 = arith.subf %219, %218 : vector<8x256xf32>
    %221 = arith.select %36, %217, %220 : vector<8x256xi1>, vector<8x256xf32>
    %222 = vector.broadcast %215 : vector<8x1xf32> to vector<8x256xf32>
    %223 = arith.mulf %222, %214 : vector<8x256xf32>
    %224 = vector.broadcast %216 : vector<8x1xf32> to vector<8x256xf32>
    %225 = arith.mulf %224, %221 : vector<8x256xf32>
    %226 = arith.addf %223, %225 : vector<8x256xf32>
    %227 = vector.extract_strided_slice %8 {offsets = [0, 23], sizes = [8, 1], strides = [1, 1]} : vector<8x128xf32> to vector<8x1xf32>
    %228 = vector.extract_strided_slice %8 {offsets = [0, 87], sizes = [8, 1], strides = [1, 1]} : vector<8x128xf32> to vector<8x1xf32>
    %c1_i32_50 = arith.constant 1 : i32
    %229 = tpu.dynamic_rotate %226 by %c1_i32_50 dim 1 : vector<8x256xf32>, i32 -> vector<8x256xf32>
    %c255_i32_51 = arith.constant 255 : i32
    %230 = tpu.dynamic_rotate %226 by %c255_i32_51 dim 1 : vector<8x256xf32>, i32 -> vector<8x256xf32>
    %cst_52 = arith.constant 0.000000e+00 : f32
    %231 = vector.broadcast %cst_52 : f32 to vector<8x256xf32>
    %232 = arith.subf %231, %230 : vector<8x256xf32>
    %233 = arith.select %40, %229, %232 : vector<8x256xi1>, vector<8x256xf32>
    %234 = vector.broadcast %227 : vector<8x1xf32> to vector<8x256xf32>
    %235 = arith.mulf %234, %226 : vector<8x256xf32>
    %236 = vector.broadcast %228 : vector<8x1xf32> to vector<8x256xf32>
    %237 = arith.mulf %236, %233 : vector<8x256xf32>
    %238 = arith.addf %235, %237 : vector<8x256xf32>
    %239 = arith.truncf %238 : vector<8x256xf32> to vector<8x256xbf16>
    %240 = arith.extf %239 : vector<8x256xbf16> to vector<8x256xf32>
    %241 = arith.subf %238, %240 : vector<8x256xf32>
    %242 = arith.truncf %241 : vector<8x256xf32> to vector<8x256xbf16>
    %c0_53 = arith.constant 0 : index
    %c0_54 = arith.constant 0 : index
    %243 = vector.load %arg2[%c0_53, %c0_54] : memref<256x256xbf16, #tpu.memory_space<vmem>>, vector<256x256xbf16>
    %cst_55 = arith.constant dense<0.000000e+00> : vector<8x256xf32>
    %244 = tpu.matmul %239, %243, %cst_55 {dimension_numbers = #tpu.dot_dimension_numbers<[1], [0], [0], [1], [0, 0, 1, 1], [], []>} : vector<8x256xbf16>, vector<256x256xbf16>, vector<8x256xf32> -> vector<8x256xf32>
    %cst_56 = arith.constant dense<0.000000e+00> : vector<8x256xf32>
    %245 = tpu.matmul %242, %243, %cst_56 {dimension_numbers = #tpu.dot_dimension_numbers<[1], [0], [0], [1], [0, 0, 1, 1], [], []>} : vector<8x256xbf16>, vector<256x256xbf16>, vector<8x256xf32> -> vector<8x256xf32>
    %246 = arith.addf %244, %245 : vector<8x256xf32>
    %247 = vector.extract_strided_slice %8 {offsets = [0, 32], sizes = [8, 1], strides = [1, 1]} : vector<8x128xf32> to vector<8x1xf32>
    %248 = vector.extract_strided_slice %8 {offsets = [0, 96], sizes = [8, 1], strides = [1, 1]} : vector<8x128xf32> to vector<8x1xf32>
    %c128_i32_57 = arith.constant 128 : i32
    %249 = tpu.dynamic_rotate %246 by %c128_i32_57 dim 1 : vector<8x256xf32>, i32 -> vector<8x256xf32>
    %cst_58 = arith.constant 0.000000e+00 : f32
    %250 = vector.broadcast %cst_58 : f32 to vector<8x256xf32>
    %251 = arith.subf %250, %249 : vector<8x256xf32>
    %252 = arith.select %12, %249, %251 : vector<8x256xi1>, vector<8x256xf32>
    %253 = vector.broadcast %247 : vector<8x1xf32> to vector<8x256xf32>
    %254 = arith.mulf %253, %246 : vector<8x256xf32>
    %255 = vector.broadcast %248 : vector<8x1xf32> to vector<8x256xf32>
    %256 = arith.mulf %255, %252 : vector<8x256xf32>
    %257 = arith.addf %254, %256 : vector<8x256xf32>
    %258 = vector.extract_strided_slice %8 {offsets = [0, 33], sizes = [8, 1], strides = [1, 1]} : vector<8x128xf32> to vector<8x1xf32>
    %259 = vector.extract_strided_slice %8 {offsets = [0, 97], sizes = [8, 1], strides = [1, 1]} : vector<8x128xf32> to vector<8x1xf32>
    %c64_i32_59 = arith.constant 64 : i32
    %260 = tpu.dynamic_rotate %257 by %c64_i32_59 dim 1 : vector<8x256xf32>, i32 -> vector<8x256xf32>
    %c192_i32_60 = arith.constant 192 : i32
    %261 = tpu.dynamic_rotate %257 by %c192_i32_60 dim 1 : vector<8x256xf32>, i32 -> vector<8x256xf32>
    %cst_61 = arith.constant 0.000000e+00 : f32
    %262 = vector.broadcast %cst_61 : f32 to vector<8x256xf32>
    %263 = arith.subf %262, %261 : vector<8x256xf32>
    %264 = arith.select %16, %260, %263 : vector<8x256xi1>, vector<8x256xf32>
    %265 = vector.broadcast %258 : vector<8x1xf32> to vector<8x256xf32>
    %266 = arith.mulf %265, %257 : vector<8x256xf32>
    %267 = vector.broadcast %259 : vector<8x1xf32> to vector<8x256xf32>
    %268 = arith.mulf %267, %264 : vector<8x256xf32>
    %269 = arith.addf %266, %268 : vector<8x256xf32>
    %270 = vector.extract_strided_slice %8 {offsets = [0, 34], sizes = [8, 1], strides = [1, 1]} : vector<8x128xf32> to vector<8x1xf32>
    %271 = vector.extract_strided_slice %8 {offsets = [0, 98], sizes = [8, 1], strides = [1, 1]} : vector<8x128xf32> to vector<8x1xf32>
    %c32_i32_62 = arith.constant 32 : i32
    %272 = tpu.dynamic_rotate %269 by %c32_i32_62 dim 1 : vector<8x256xf32>, i32 -> vector<8x256xf32>
    %c224_i32_63 = arith.constant 224 : i32
    %273 = tpu.dynamic_rotate %269 by %c224_i32_63 dim 1 : vector<8x256xf32>, i32 -> vector<8x256xf32>
    %cst_64 = arith.constant 0.000000e+00 : f32
    %274 = vector.broadcast %cst_64 : f32 to vector<8x256xf32>
    %275 = arith.subf %274, %273 : vector<8x256xf32>
    %276 = arith.select %20, %272, %275 : vector<8x256xi1>, vector<8x256xf32>
    %277 = vector.broadcast %270 : vector<8x1xf32> to vector<8x256xf32>
    %278 = arith.mulf %277, %269 : vector<8x256xf32>
    %279 = vector.broadcast %271 : vector<8x1xf32> to vector<8x256xf32>
    %280 = arith.mulf %279, %276 : vector<8x256xf32>
    %281 = arith.addf %278, %280 : vector<8x256xf32>
    %282 = vector.extract_strided_slice %8 {offsets = [0, 35], sizes = [8, 1], strides = [1, 1]} : vector<8x128xf32> to vector<8x1xf32>
    %283 = vector.extract_strided_slice %8 {offsets = [0, 99], sizes = [8, 1], strides = [1, 1]} : vector<8x128xf32> to vector<8x1xf32>
    %c16_i32_65 = arith.constant 16 : i32
    %284 = tpu.dynamic_rotate %281 by %c16_i32_65 dim 1 : vector<8x256xf32>, i32 -> vector<8x256xf32>
    %c240_i32_66 = arith.constant 240 : i32
    %285 = tpu.dynamic_rotate %281 by %c240_i32_66 dim 1 : vector<8x256xf32>, i32 -> vector<8x256xf32>
    %cst_67 = arith.constant 0.000000e+00 : f32
    %286 = vector.broadcast %cst_67 : f32 to vector<8x256xf32>
    %287 = arith.subf %286, %285 : vector<8x256xf32>
    %288 = arith.select %24, %284, %287 : vector<8x256xi1>, vector<8x256xf32>
    %289 = vector.broadcast %282 : vector<8x1xf32> to vector<8x256xf32>
    %290 = arith.mulf %289, %281 : vector<8x256xf32>
    %291 = vector.broadcast %283 : vector<8x1xf32> to vector<8x256xf32>
    %292 = arith.mulf %291, %288 : vector<8x256xf32>
    %293 = arith.addf %290, %292 : vector<8x256xf32>
    %294 = vector.extract_strided_slice %8 {offsets = [0, 36], sizes = [8, 1], strides = [1, 1]} : vector<8x128xf32> to vector<8x1xf32>
    %295 = vector.extract_strided_slice %8 {offsets = [0, 100], sizes = [8, 1], strides = [1, 1]} : vector<8x128xf32> to vector<8x1xf32>
    %c8_i32_68 = arith.constant 8 : i32
    %296 = tpu.dynamic_rotate %293 by %c8_i32_68 dim 1 : vector<8x256xf32>, i32 -> vector<8x256xf32>
    %c248_i32_69 = arith.constant 248 : i32
    %297 = tpu.dynamic_rotate %293 by %c248_i32_69 dim 1 : vector<8x256xf32>, i32 -> vector<8x256xf32>
    %cst_70 = arith.constant 0.000000e+00 : f32
    %298 = vector.broadcast %cst_70 : f32 to vector<8x256xf32>
    %299 = arith.subf %298, %297 : vector<8x256xf32>
    %300 = arith.select %28, %296, %299 : vector<8x256xi1>, vector<8x256xf32>
    %301 = vector.broadcast %294 : vector<8x1xf32> to vector<8x256xf32>
    %302 = arith.mulf %301, %293 : vector<8x256xf32>
    %303 = vector.broadcast %295 : vector<8x1xf32> to vector<8x256xf32>
    %304 = arith.mulf %303, %300 : vector<8x256xf32>
    %305 = arith.addf %302, %304 : vector<8x256xf32>
    %306 = vector.extract_strided_slice %8 {offsets = [0, 37], sizes = [8, 1], strides = [1, 1]} : vector<8x128xf32> to vector<8x1xf32>
    %307 = vector.extract_strided_slice %8 {offsets = [0, 101], sizes = [8, 1], strides = [1, 1]} : vector<8x128xf32> to vector<8x1xf32>
    %c4_i32_71 = arith.constant 4 : i32
    %308 = tpu.dynamic_rotate %305 by %c4_i32_71 dim 1 : vector<8x256xf32>, i32 -> vector<8x256xf32>
    %c252_i32_72 = arith.constant 252 : i32
    %309 = tpu.dynamic_rotate %305 by %c252_i32_72 dim 1 : vector<8x256xf32>, i32 -> vector<8x256xf32>
    %cst_73 = arith.constant 0.000000e+00 : f32
    %310 = vector.broadcast %cst_73 : f32 to vector<8x256xf32>
    %311 = arith.subf %310, %309 : vector<8x256xf32>
    %312 = arith.select %32, %308, %311 : vector<8x256xi1>, vector<8x256xf32>
    %313 = vector.broadcast %306 : vector<8x1xf32> to vector<8x256xf32>
    %314 = arith.mulf %313, %305 : vector<8x256xf32>
    %315 = vector.broadcast %307 : vector<8x1xf32> to vector<8x256xf32>
    %316 = arith.mulf %315, %312 : vector<8x256xf32>
    %317 = arith.addf %314, %316 : vector<8x256xf32>
    %318 = vector.extract_strided_slice %8 {offsets = [0, 38], sizes = [8, 1], strides = [1, 1]} : vector<8x128xf32> to vector<8x1xf32>
    %319 = vector.extract_strided_slice %8 {offsets = [0, 102], sizes = [8, 1], strides = [1, 1]} : vector<8x128xf32> to vector<8x1xf32>
    %c2_i32_74 = arith.constant 2 : i32
    %320 = tpu.dynamic_rotate %317 by %c2_i32_74 dim 1 : vector<8x256xf32>, i32 -> vector<8x256xf32>
    %c254_i32_75 = arith.constant 254 : i32
    %321 = tpu.dynamic_rotate %317 by %c254_i32_75 dim 1 : vector<8x256xf32>, i32 -> vector<8x256xf32>
    %cst_76 = arith.constant 0.000000e+00 : f32
    %322 = vector.broadcast %cst_76 : f32 to vector<8x256xf32>
    %323 = arith.subf %322, %321 : vector<8x256xf32>
    %324 = arith.select %36, %320, %323 : vector<8x256xi1>, vector<8x256xf32>
    %325 = vector.broadcast %318 : vector<8x1xf32> to vector<8x256xf32>
    %326 = arith.mulf %325, %317 : vector<8x256xf32>
    %327 = vector.broadcast %319 : vector<8x1xf32> to vector<8x256xf32>
    %328 = arith.mulf %327, %324 : vector<8x256xf32>
    %329 = arith.addf %326, %328 : vector<8x256xf32>
    %330 = vector.extract_strided_slice %8 {offsets = [0, 39], sizes = [8, 1], strides = [1, 1]} : vector<8x128xf32> to vector<8x1xf32>
    %331 = vector.extract_strided_slice %8 {offsets = [0, 103], sizes = [8, 1], strides = [1, 1]} : vector<8x128xf32> to vector<8x1xf32>
    %c1_i32_77 = arith.constant 1 : i32
    %332 = tpu.dynamic_rotate %329 by %c1_i32_77 dim 1 : vector<8x256xf32>, i32 -> vector<8x256xf32>
    %c255_i32_78 = arith.constant 255 : i32
    %333 = tpu.dynamic_rotate %329 by %c255_i32_78 dim 1 : vector<8x256xf32>, i32 -> vector<8x256xf32>
    %cst_79 = arith.constant 0.000000e+00 : f32
    %334 = vector.broadcast %cst_79 : f32 to vector<8x256xf32>
    %335 = arith.subf %334, %333 : vector<8x256xf32>
    %336 = arith.select %40, %332, %335 : vector<8x256xi1>, vector<8x256xf32>
    %337 = vector.broadcast %330 : vector<8x1xf32> to vector<8x256xf32>
    %338 = arith.mulf %337, %329 : vector<8x256xf32>
    %339 = vector.broadcast %331 : vector<8x1xf32> to vector<8x256xf32>
    %340 = arith.mulf %339, %336 : vector<8x256xf32>
    %341 = arith.addf %338, %340 : vector<8x256xf32>
    %342 = arith.truncf %341 : vector<8x256xf32> to vector<8x256xbf16>
    %343 = arith.extf %342 : vector<8x256xbf16> to vector<8x256xf32>
    %344 = arith.subf %341, %343 : vector<8x256xf32>
    %345 = arith.truncf %344 : vector<8x256xf32> to vector<8x256xbf16>
    %c0_80 = arith.constant 0 : index
    %c0_81 = arith.constant 0 : index
    %346 = vector.load %arg2[%c0_80, %c0_81] : memref<256x256xbf16, #tpu.memory_space<vmem>>, vector<256x256xbf16>
    %cst_82 = arith.constant dense<0.000000e+00> : vector<8x256xf32>
    %347 = tpu.matmul %342, %346, %cst_82 {dimension_numbers = #tpu.dot_dimension_numbers<[1], [0], [0], [1], [0, 0, 1, 1], [], []>} : vector<8x256xbf16>, vector<256x256xbf16>, vector<8x256xf32> -> vector<8x256xf32>
    %cst_83 = arith.constant dense<0.000000e+00> : vector<8x256xf32>
    %348 = tpu.matmul %345, %346, %cst_83 {dimension_numbers = #tpu.dot_dimension_numbers<[1], [0], [0], [1], [0, 0, 1, 1], [], []>} : vector<8x256xbf16>, vector<256x256xbf16>, vector<8x256xf32> -> vector<8x256xf32>
    %349 = arith.addf %347, %348 : vector<8x256xf32>
    %350 = vector.extract_strided_slice %8 {offsets = [0, 48], sizes = [8, 1], strides = [1, 1]} : vector<8x128xf32> to vector<8x1xf32>
    %351 = vector.extract_strided_slice %8 {offsets = [0, 112], sizes = [8, 1], strides = [1, 1]} : vector<8x128xf32> to vector<8x1xf32>
    %c128_i32_84 = arith.constant 128 : i32
    %352 = tpu.dynamic_rotate %349 by %c128_i32_84 dim 1 : vector<8x256xf32>, i32 -> vector<8x256xf32>
    %cst_85 = arith.constant 0.000000e+00 : f32
    %353 = vector.broadcast %cst_85 : f32 to vector<8x256xf32>
    %354 = arith.subf %353, %352 : vector<8x256xf32>
    %355 = arith.select %12, %352, %354 : vector<8x256xi1>, vector<8x256xf32>
    %356 = vector.broadcast %350 : vector<8x1xf32> to vector<8x256xf32>
    %357 = arith.mulf %356, %349 : vector<8x256xf32>
    %358 = vector.broadcast %351 : vector<8x1xf32> to vector<8x256xf32>
    %359 = arith.mulf %358, %355 : vector<8x256xf32>
    %360 = arith.addf %357, %359 : vector<8x256xf32>
    %361 = vector.extract_strided_slice %8 {offsets = [0, 49], sizes = [8, 1], strides = [1, 1]} : vector<8x128xf32> to vector<8x1xf32>
    %362 = vector.extract_strided_slice %8 {offsets = [0, 113], sizes = [8, 1], strides = [1, 1]} : vector<8x128xf32> to vector<8x1xf32>
    %c64_i32_86 = arith.constant 64 : i32
    %363 = tpu.dynamic_rotate %360 by %c64_i32_86 dim 1 : vector<8x256xf32>, i32 -> vector<8x256xf32>
    %c192_i32_87 = arith.constant 192 : i32
    %364 = tpu.dynamic_rotate %360 by %c192_i32_87 dim 1 : vector<8x256xf32>, i32 -> vector<8x256xf32>
    %cst_88 = arith.constant 0.000000e+00 : f32
    %365 = vector.broadcast %cst_88 : f32 to vector<8x256xf32>
    %366 = arith.subf %365, %364 : vector<8x256xf32>
    %367 = arith.select %16, %363, %366 : vector<8x256xi1>, vector<8x256xf32>
    %368 = vector.broadcast %361 : vector<8x1xf32> to vector<8x256xf32>
    %369 = arith.mulf %368, %360 : vector<8x256xf32>
    %370 = vector.broadcast %362 : vector<8x1xf32> to vector<8x256xf32>
    %371 = arith.mulf %370, %367 : vector<8x256xf32>
    %372 = arith.addf %369, %371 : vector<8x256xf32>
    %373 = vector.extract_strided_slice %8 {offsets = [0, 50], sizes = [8, 1], strides = [1, 1]} : vector<8x128xf32> to vector<8x1xf32>
    %374 = vector.extract_strided_slice %8 {offsets = [0, 114], sizes = [8, 1], strides = [1, 1]} : vector<8x128xf32> to vector<8x1xf32>
    %c32_i32_89 = arith.constant 32 : i32
    %375 = tpu.dynamic_rotate %372 by %c32_i32_89 dim 1 : vector<8x256xf32>, i32 -> vector<8x256xf32>
    %c224_i32_90 = arith.constant 224 : i32
    %376 = tpu.dynamic_rotate %372 by %c224_i32_90 dim 1 : vector<8x256xf32>, i32 -> vector<8x256xf32>
    %cst_91 = arith.constant 0.000000e+00 : f32
    %377 = vector.broadcast %cst_91 : f32 to vector<8x256xf32>
    %378 = arith.subf %377, %376 : vector<8x256xf32>
    %379 = arith.select %20, %375, %378 : vector<8x256xi1>, vector<8x256xf32>
    %380 = vector.broadcast %373 : vector<8x1xf32> to vector<8x256xf32>
    %381 = arith.mulf %380, %372 : vector<8x256xf32>
    %382 = vector.broadcast %374 : vector<8x1xf32> to vector<8x256xf32>
    %383 = arith.mulf %382, %379 : vector<8x256xf32>
    %384 = arith.addf %381, %383 : vector<8x256xf32>
    %385 = vector.extract_strided_slice %8 {offsets = [0, 51], sizes = [8, 1], strides = [1, 1]} : vector<8x128xf32> to vector<8x1xf32>
    %386 = vector.extract_strided_slice %8 {offsets = [0, 115], sizes = [8, 1], strides = [1, 1]} : vector<8x128xf32> to vector<8x1xf32>
    %c16_i32_92 = arith.constant 16 : i32
    %387 = tpu.dynamic_rotate %384 by %c16_i32_92 dim 1 : vector<8x256xf32>, i32 -> vector<8x256xf32>
    %c240_i32_93 = arith.constant 240 : i32
    %388 = tpu.dynamic_rotate %384 by %c240_i32_93 dim 1 : vector<8x256xf32>, i32 -> vector<8x256xf32>
    %cst_94 = arith.constant 0.000000e+00 : f32
    %389 = vector.broadcast %cst_94 : f32 to vector<8x256xf32>
    %390 = arith.subf %389, %388 : vector<8x256xf32>
    %391 = arith.select %24, %387, %390 : vector<8x256xi1>, vector<8x256xf32>
    %392 = vector.broadcast %385 : vector<8x1xf32> to vector<8x256xf32>
    %393 = arith.mulf %392, %384 : vector<8x256xf32>
    %394 = vector.broadcast %386 : vector<8x1xf32> to vector<8x256xf32>
    %395 = arith.mulf %394, %391 : vector<8x256xf32>
    %396 = arith.addf %393, %395 : vector<8x256xf32>
    %397 = vector.extract_strided_slice %8 {offsets = [0, 52], sizes = [8, 1], strides = [1, 1]} : vector<8x128xf32> to vector<8x1xf32>
    %398 = vector.extract_strided_slice %8 {offsets = [0, 116], sizes = [8, 1], strides = [1, 1]} : vector<8x128xf32> to vector<8x1xf32>
    %c8_i32_95 = arith.constant 8 : i32
    %399 = tpu.dynamic_rotate %396 by %c8_i32_95 dim 1 : vector<8x256xf32>, i32 -> vector<8x256xf32>
    %c248_i32_96 = arith.constant 248 : i32
    %400 = tpu.dynamic_rotate %396 by %c248_i32_96 dim 1 : vector<8x256xf32>, i32 -> vector<8x256xf32>
    %cst_97 = arith.constant 0.000000e+00 : f32
    %401 = vector.broadcast %cst_97 : f32 to vector<8x256xf32>
    %402 = arith.subf %401, %400 : vector<8x256xf32>
    %403 = arith.select %28, %399, %402 : vector<8x256xi1>, vector<8x256xf32>
    %404 = vector.broadcast %397 : vector<8x1xf32> to vector<8x256xf32>
    %405 = arith.mulf %404, %396 : vector<8x256xf32>
    %406 = vector.broadcast %398 : vector<8x1xf32> to vector<8x256xf32>
    %407 = arith.mulf %406, %403 : vector<8x256xf32>
    %408 = arith.addf %405, %407 : vector<8x256xf32>
    %409 = vector.extract_strided_slice %8 {offsets = [0, 53], sizes = [8, 1], strides = [1, 1]} : vector<8x128xf32> to vector<8x1xf32>
    %410 = vector.extract_strided_slice %8 {offsets = [0, 117], sizes = [8, 1], strides = [1, 1]} : vector<8x128xf32> to vector<8x1xf32>
    %c4_i32_98 = arith.constant 4 : i32
    %411 = tpu.dynamic_rotate %408 by %c4_i32_98 dim 1 : vector<8x256xf32>, i32 -> vector<8x256xf32>
    %c252_i32_99 = arith.constant 252 : i32
    %412 = tpu.dynamic_rotate %408 by %c252_i32_99 dim 1 : vector<8x256xf32>, i32 -> vector<8x256xf32>
    %cst_100 = arith.constant 0.000000e+00 : f32
    %413 = vector.broadcast %cst_100 : f32 to vector<8x256xf32>
    %414 = arith.subf %413, %412 : vector<8x256xf32>
    %415 = arith.select %32, %411, %414 : vector<8x256xi1>, vector<8x256xf32>
    %416 = vector.broadcast %409 : vector<8x1xf32> to vector<8x256xf32>
    %417 = arith.mulf %416, %408 : vector<8x256xf32>
    %418 = vector.broadcast %410 : vector<8x1xf32> to vector<8x256xf32>
    %419 = arith.mulf %418, %415 : vector<8x256xf32>
    %420 = arith.addf %417, %419 : vector<8x256xf32>
    %421 = vector.extract_strided_slice %8 {offsets = [0, 54], sizes = [8, 1], strides = [1, 1]} : vector<8x128xf32> to vector<8x1xf32>
    %422 = vector.extract_strided_slice %8 {offsets = [0, 118], sizes = [8, 1], strides = [1, 1]} : vector<8x128xf32> to vector<8x1xf32>
    %c2_i32_101 = arith.constant 2 : i32
    %423 = tpu.dynamic_rotate %420 by %c2_i32_101 dim 1 : vector<8x256xf32>, i32 -> vector<8x256xf32>
    %c254_i32_102 = arith.constant 254 : i32
    %424 = tpu.dynamic_rotate %420 by %c254_i32_102 dim 1 : vector<8x256xf32>, i32 -> vector<8x256xf32>
    %cst_103 = arith.constant 0.000000e+00 : f32
    %425 = vector.broadcast %cst_103 : f32 to vector<8x256xf32>
    %426 = arith.subf %425, %424 : vector<8x256xf32>
    %427 = arith.select %36, %423, %426 : vector<8x256xi1>, vector<8x256xf32>
    %428 = vector.broadcast %421 : vector<8x1xf32> to vector<8x256xf32>
    %429 = arith.mulf %428, %420 : vector<8x256xf32>
    %430 = vector.broadcast %422 : vector<8x1xf32> to vector<8x256xf32>
    %431 = arith.mulf %430, %427 : vector<8x256xf32>
    %432 = arith.addf %429, %431 : vector<8x256xf32>
    %433 = vector.extract_strided_slice %8 {offsets = [0, 55], sizes = [8, 1], strides = [1, 1]} : vector<8x128xf32> to vector<8x1xf32>
    %434 = vector.extract_strided_slice %8 {offsets = [0, 119], sizes = [8, 1], strides = [1, 1]} : vector<8x128xf32> to vector<8x1xf32>
    %c1_i32_104 = arith.constant 1 : i32
    %435 = tpu.dynamic_rotate %432 by %c1_i32_104 dim 1 : vector<8x256xf32>, i32 -> vector<8x256xf32>
    %c255_i32_105 = arith.constant 255 : i32
    %436 = tpu.dynamic_rotate %432 by %c255_i32_105 dim 1 : vector<8x256xf32>, i32 -> vector<8x256xf32>
    %cst_106 = arith.constant 0.000000e+00 : f32
    %437 = vector.broadcast %cst_106 : f32 to vector<8x256xf32>
    %438 = arith.subf %437, %436 : vector<8x256xf32>
    %439 = arith.select %40, %435, %438 : vector<8x256xi1>, vector<8x256xf32>
    %440 = vector.broadcast %433 : vector<8x1xf32> to vector<8x256xf32>
    %441 = arith.mulf %440, %432 : vector<8x256xf32>
    %442 = vector.broadcast %434 : vector<8x1xf32> to vector<8x256xf32>
    %443 = arith.mulf %442, %439 : vector<8x256xf32>
    %444 = arith.addf %441, %443 : vector<8x256xf32>
    %445 = arith.truncf %444 : vector<8x256xf32> to vector<8x256xbf16>
    %446 = arith.extf %445 : vector<8x256xbf16> to vector<8x256xf32>
    %447 = arith.subf %444, %446 : vector<8x256xf32>
    %448 = arith.truncf %447 : vector<8x256xf32> to vector<8x256xbf16>
    %c0_107 = arith.constant 0 : index
    %c0_108 = arith.constant 0 : index
    %449 = vector.load %arg3[%c0_107, %c0_108] : memref<256x256xbf16, #tpu.memory_space<vmem>>, vector<256x256xbf16>
    %c0_109 = arith.constant 0 : index
    %c0_110 = arith.constant 0 : index
    %450 = vector.load %arg4[%c0_109, %c0_110] : memref<256x256xbf16, #tpu.memory_space<vmem>>, vector<256x256xbf16>
    %cst_111 = arith.constant dense<0.000000e+00> : vector<8x256xf32>
    %451 = tpu.matmul %445, %449, %cst_111 {dimension_numbers = #tpu.dot_dimension_numbers<[1], [0], [0], [1], [0, 0, 1, 1], [], []>} : vector<8x256xbf16>, vector<256x256xbf16>, vector<8x256xf32> -> vector<8x256xf32>
    %cst_112 = arith.constant dense<0.000000e+00> : vector<8x256xf32>
    %452 = tpu.matmul %448, %449, %cst_112 {dimension_numbers = #tpu.dot_dimension_numbers<[1], [0], [0], [1], [0, 0, 1, 1], [], []>} : vector<8x256xbf16>, vector<256x256xbf16>, vector<8x256xf32> -> vector<8x256xf32>
    %453 = arith.addf %451, %452 : vector<8x256xf32>
    %cst_113 = arith.constant dense<0.000000e+00> : vector<8x256xf32>
    %454 = tpu.matmul %445, %450, %cst_113 {dimension_numbers = #tpu.dot_dimension_numbers<[1], [0], [0], [1], [0, 0, 1, 1], [], []>} : vector<8x256xbf16>, vector<256x256xbf16>, vector<8x256xf32> -> vector<8x256xf32>
    %455 = arith.addf %453, %454 : vector<8x256xf32>
    %cst_114 = arith.constant -1.000000e+00 : f32
    %cst_115 = arith.constant 1.000000e+00 : f32
    %456 = vector.broadcast %cst_114 : f32 to vector<8x256xf32>
    %457 = vector.broadcast %cst_115 : f32 to vector<8x256xf32>
    %458 = arith.select %12, %456, %457 : vector<8x256xi1>, vector<8x256xf32>
    %459 = arith.mulf %455, %455 : vector<8x256xf32>
    %460 = arith.mulf %459, %458 : vector<8x256xf32>
    %cst_116 = arith.constant dense<0.000000e+00> : vector<8xf32>
    %461 = vector.multi_reduction <add>, %460, %cst_116 [1] : vector<8x256xf32> to vector<8xf32>
    %462 = vector.shape_cast %461 : vector<8xf32> to vector<8x1xf32>
    %c0_117 = arith.constant 0 : index
    %c0_118 = arith.constant 0 : index
    %463 = vector.load %arg5[%c0_117, %c0_118] : memref<1x16xf32, #tpu.memory_space<vmem>>, vector<1x16xf32>
    %464 = vector.broadcast %462 : vector<8x1xf32> to vector<8x16xf32>
    %465 = vector.broadcast %463 : vector<1x16xf32> to vector<8x16xf32>
    %466 = arith.mulf %464, %465 : vector<8x16xf32>
    %c0_119 = arith.constant 0 : index
    %c0_120 = arith.constant 0 : index
    %467 = vector.load %arg6[%c0_119, %c0_120] : memref<1x16xf32, #tpu.memory_space<vmem>>, vector<1x16xf32>
    %468 = vector.broadcast %467 : vector<1x16xf32> to vector<8x16xf32>
    %469 = arith.addf %466, %468 : vector<8x16xf32>
    %cst_121 = arith.constant 0.000000e+00 : f32
    %470 = vector.broadcast %cst_121 : f32 to vector<8x16xf32>
    %471 = arith.maximumf %469, %470 : vector<8x16xf32>
    %c0_122 = arith.constant 0 : index
    %c0_123 = arith.constant 0 : index
    %472 = vector.load %arg7[%c0_122, %c0_123] : memref<1x16xf32, #tpu.memory_space<vmem>>, vector<1x16xf32>
    %473 = vector.broadcast %472 : vector<1x16xf32> to vector<8x16xf32>
    %474 = arith.mulf %471, %473 : vector<8x16xf32>
    %cst_124 = arith.constant dense<0.000000e+00> : vector<8xf32>
    %475 = vector.multi_reduction <add>, %474, %cst_124 [1] : vector<8x16xf32> to vector<8xf32>
    %476 = vector.shape_cast %475 : vector<8xf32> to vector<8x1xf32>
    %c0_125 = arith.constant 0 : index
    %c0_126 = arith.constant 0 : index
    %477 = vector.load %arg8[%c0_125, %c0_126] : memref<1x1xf32, #tpu.memory_space<vmem>>, vector<1x1xf32>
    %478 = vector.broadcast %477 : vector<1x1xf32> to vector<8x1xf32>
    %479 = arith.addf %476, %478 : vector<8x1xf32>
    %480 = tpu.iota {dimensions = array<i32: 1>} : vector<8x128xi32>
    %c0_i32_127 = arith.constant 0 : i32
    %481 = vector.broadcast %c0_i32_127 : i32 to vector<8x128xi32>
    %482 = arith.cmpi eq, %480, %481 : vector<8x128xi32>
    %c1_i32_128 = arith.constant 1 : i32
    %483 = vector.broadcast %c1_i32_128 : i32 to vector<8x128xi32>
    %484 = arith.cmpi eq, %480, %483 : vector<8x128xi32>
    %cst_129 = arith.constant 0.000000e+00 : f32
    %485 = vector.shape_cast %479 : vector<8x1xf32> to vector<8x1xf32>
    %486 = vector.broadcast %485 : vector<8x1xf32> to vector<8x128xf32>
    %487 = vector.broadcast %cst_129 : f32 to vector<8x128xf32>
    %488 = arith.select %484, %486, %487 : vector<8x128xi1>, vector<8x128xf32>
    %489 = vector.shape_cast %462 : vector<8x1xf32> to vector<8x1xf32>
    %490 = vector.broadcast %489 : vector<8x1xf32> to vector<8x128xf32>
    %491 = arith.select %482, %490, %488 : vector<8x128xi1>, vector<8x128xf32>
    %c0_130 = arith.constant 0 : index
    %c0_131 = arith.constant 0 : index
    %492 = vector.load %arg9[%c0_130, %c0_131] : memref<8x128xf32, #tpu.memory_space<vmem>>, vector<8x128xf32>
    tpu.vector_store %arg9[%c0_130, %c0_131], %491 {strides = array<i32>} : memref<8x128xf32, #tpu.memory_space<vmem>>, vector<8x128xf32>,
    return
  }
  func.func @transform_0(%arg0: i32) -> (i32, i32) {
    %c0_i32 = arith.constant 0 : i32
    %c0_i32_0 = arith.constant 0 : i32
    return %arg0, %c0_i32 : i32, i32
  }
  func.func @transform_1(%arg0: i32) -> (i32, i32) {
    %c0_i32 = arith.constant 0 : i32
    %c0_i32_0 = arith.constant 0 : i32
    %c0_i32_1 = arith.constant 0 : i32
    return %c0_i32, %c0_i32_0 : i32, i32
  }
  func.func @transform_2(%arg0: i32) -> (i32, i32) {
    %c0_i32 = arith.constant 0 : i32
    %c0_i32_0 = arith.constant 0 : i32
    %c0_i32_1 = arith.constant 0 : i32
    return %c0_i32, %c0_i32_0 : i32, i32
  }
  func.func @transform_3(%arg0: i32) -> (i32, i32) {
    %c0_i32 = arith.constant 0 : i32
    %c0_i32_0 = arith.constant 0 : i32
    %c0_i32_1 = arith.constant 0 : i32
    return %c0_i32, %c0_i32_0 : i32, i32
  }
  func.func @transform_4(%arg0: i32) -> (i32, i32) {
    %c0_i32 = arith.constant 0 : i32
    %c0_i32_0 = arith.constant 0 : i32
    %c0_i32_1 = arith.constant 0 : i32
    return %c0_i32, %c0_i32_0 : i32, i32
  }
  func.func @transform_5(%arg0: i32) -> (i32, i32) {
    %c0_i32 = arith.constant 0 : i32
    %c0_i32_0 = arith.constant 0 : i32
    %c0_i32_1 = arith.constant 0 : i32
    return %c0_i32, %c0_i32_0 : i32, i32
  }
  func.func @transform_6(%arg0: i32) -> (i32, i32) {
    %c0_i32 = arith.constant 0 : i32
    %c0_i32_0 = arith.constant 0 : i32
    %c0_i32_1 = arith.constant 0 : i32
    return %c0_i32, %c0_i32_0 : i32, i32
  }
  func.func @transform_7(%arg0: i32) -> (i32, i32) {
    %c0_i32 = arith.constant 0 : i32
    %c0_i32_0 = arith.constant 0 : i32
    %c0_i32_1 = arith.constant 0 : i32
    return %c0_i32, %c0_i32_0 : i32, i32
  }
  func.func @transform_8(%arg0: i32) -> (i32, i32) {
    %c0_i32 = arith.constant 0 : i32
    %c0_i32_0 = arith.constant 0 : i32
    return %arg0, %c0_i32 : i32, i32
  }
}

</mosaic_0001>

<bundles_post_ra>
// kernel: paper_qnn_forward.1
= control target key start
LH: loop header
LB: loop body
LE: loop exit
PB: predicated region body
PF: predicated region fallthrough
CT: control target
= control target key end

     0   :  { %v3972_v0 = vmov 0   ;;  %v2455_v2 = vmov 1   ;;  %v2456_v3 = vmov 64   ;;  %v2457_v4 = vmov 65   ;;  %s2461_s29 = smov 64   ;;  %s2464_s30 = smov 32   ;;  %s3952_s0 = inlined_call_operand.vmem [shape: f32[8,128], index: 0, kind: input, shape index: {}]   ;;  %s3953_s1 = inlined_call_operand.vmem [shape: bf16[256,256], index: 1, kind: input, shape index: {}]   ;;  %s3954_s2 = inlined_call_operand.vmem [shape: bf16[256,256], index: 2, kind: input, shape index: {}]   ;;  %s3955_s3 = inlined_call_operand.vmem [shape: bf16[256,256], index: 3, kind: input, shape index: {}]   ;;  %s3956_s7 = inlined_call_operand.<no memory space> [shape: f32[1,1], index: 7, kind: input, shape index: {}]   ;;  %s3957_s4 = inlined_call_operand.vmem [shape: f32[1,16], index: 4, kind: input, shape index: {}]   ;;  %s3958_s5 = inlined_call_operand.vmem [shape: f32[1,16], index: 5, kind: input, shape index: {}]   ;;  %s3959_s6 = inlined_call_operand.vmem [shape: f32[1,16], index: 6, kind: input, shape index: {}]   ;;  %s3960_s8 = inlined_call_operand.vmem [shape: f32[8,128], index: 8, kind: output, shape index: {}]  }
   0x1   :  { %2212 = vset.pattern.permute.xlu0 %v3972_v0  ;;  %v2581_v1 = vld [vmem:[%s3952_s0] sm:$0xff]  ;;  %2214 = vset.pattern.permute.xlu1 %v2455_v2  ;;  %v2458_v5 = vmov 2   ;;  %v2459_v6 = vmov 66   ;;  %v31_v7 = vlaneseq  ;;  %v2460_v13 = vmov 0.0   ;;  %s2465_s9 = smov 96   ;;  %s2468_s10 = smov 112  }
   0x2   :  { %79 = vperm.xlu0 %2212, %v2581_v1   ;;  %104 = vperm.xlu1 %2214, %v2581_v1   ;;  %v2462_v24 = vmov 3   ;;  %v2463_v25 = vmov 67   ;;  %v3997_v32 = vmov 0  ;;  %v3999_v33 = vmov 0  ;;  %s2469_s11 = smov 16   ;;  %s2472_s12 = smov 8  }
   0x3   :  { %v2587_v8 = vand.u32 127, %v31_v7  ;;  %v2466_v46 = vmov 68   ;;  %v2467_v47 = vmov 4   ;;  %s2473_s13 = smov 120   ;;  %s2476_s14 = smov 124   ;;  %v2526_v56 = vmov 117  }
   0x4   :  { %s2477_s15 = smov 4   ;;  %s2480_s16 = smov 2   ;;  %v2527_v57 = vmov 53  }
   0x5   :  { %v2590_v9 = vadd.s32 128, %v2587_v8  ;;  %v34_v11 = vand.u32 3, %v2587_v8  ;;  %v45_v28 = vand.u32 64, %v2587_v8  ;;  %vm3971_vm2 = vcmp.lt.s32.totalorder %v2587_v8, 64  ;;  %s2481_s17 = smov 126   ;;  %s3995_s27 = smov 127  }
   0x6   :  { %2213 = vset.pattern.permute.xlu0 %v2456_v3  ;;  %2215 = vset.pattern.permute.xlu1 %v2457_v4  ;;  %vm3970_vm5 = vcmp.lt.s32.totalorder %v2587_v8, 96  ;;  %v49_v51 = vand.u32 32, %v2587_v8  ;;  %vm3967_vm6 = vcmp.lt.s32.totalorder %v2587_v8, 32  ;;  %vm3966_vm9 = vcmp.lt.s32.totalorder %v2587_v8, 112  ;;  %s2483_s28 = smov 1  }
   0x7   :  { %85 = vperm.xlu0 %2213, %v2581_v1   ;;  %110 = vperm.xlu1 %2215, %v2581_v1   ;;  %v35_v10 = vand.u32 3, %v2590_v9  ;;  %vm36_vm1 = vcmp.eq.s32.totalorder %v34_v11, 0  ;;  %v46_v29 = vand.u32 64, %v2590_v9  ;;  %vm2601_vm3 = vcmp.ne.s32.totalorder %v45_v28, 0 }
   0x8   :  { %v38_v16 = vsel %vm36_vm1, 0.125, %v2460_v13  ;;  %v3998_v32 = vsel %vm2601_vm3, 4294967295, %v3997_v32  ;;  %v50_v52 = vand.u32 32, %v2590_v9  ;;  %vm2631_vm7 = vcmp.ne.s32.totalorder %v49_v51, 0 }
   0x9   :  { %vm37_vm0 = vcmp.eq.s32.totalorder %v35_v10, 0  ;;  %vm2605_vm4 = vcmp.ne.s32.totalorder %v46_v29, 0  ;;  %vm3963_vm10 = vcmp.lt.s32.totalorder %v2587_v8, 16  ;;  %vm3962_vm13 = vcmp.lt.s32.totalorder %v2587_v8, 120 }
   0xa   :  { %v39_v14 = vsel %vm37_vm0, 0.125, %v2460_v13  ;;  %v4000_v33 = vsel %vm2605_vm4, 4294967295, %v3999_v33  ;;  %vm2635_vm8 = vcmp.ne.s32.totalorder %v50_v52, 0  ;;  %v2471_v13 = vmov 69  }
   0xb   :  { %2216 = vset.pattern.permute.xlu1 %v2458_v5  ;;  %2217 = vset.pattern.permute.xlu0 %v2459_v6  ;;  %v73_v15 = vsub.f32 0.0, %v39_v14  ;;  %vm3961_vm14 = vcmp.lt.s32.totalorder %v2587_v8, 8  ;;  %v4014_v51 = vmov 0  ;;  %vm3965_vm1 = vcmp.lt.s32.totalorder %v2587_v8, 124 }
  0x81   :  { %v80_v12 = vpop.permute.xlu0 %79  ;;  %v105_v26 = vpop.permute.xlu1 %104 }
  0x82   :  { %v82_v18 = vmul.f32 %v80_v12, %v38_v16  ;;  %v83_v19 = vmul.f32 %v80_v12, %v39_v14  ;;  %v2470_v12 = vmov 5  }
  0x86   :  { %v86_v17 = vpop.permute.xlu0 %85  ;;  %v111_v27 = vpop.permute.xlu1 %110 }
  0x87   :  { %v88_v20 = vmul.f32 %v86_v17, %v73_v15  ;;  %v89_v21 = vmul.f32 %v86_v17, %v38_v16  ;;  %v53_v16 = vand.u32 16, %v2587_v8  ;;  %v54_v17 = vand.u32 16, %v2590_v9 }
  0x89   :  { %v90_v22 = vadd.f32 %v88_v20, %v82_v18  ;;  %v91_v23 = vadd.f32 %v89_v21, %v83_v19  ;;  %vm2661_vm11 = vcmp.ne.s32.totalorder %v53_v16, 0  ;;  %vm2665_vm12 = vcmp.ne.s32.totalorder %v54_v17, 0 }
  0x8b   :  { %94 = vrot.lane.b32.xlu0 %v91_v23, %s2461_s29  ;;  %92 = vrot.lane.b32.xlu1 %v90_v22, %s2461_s29  ;;  %v107_v40 = vmul.f32 %v105_v26, %v90_v22  ;;  %v108_v44 = vmul.f32 %v105_v26, %v91_v23  ;;  %v4005_v22 = vmov 0  ;;  %v4008_v23 = vmov 0 }
  0x8c   :  { %v4006_v22 = vsel %vm2661_vm11, 4294967295, %v4005_v22  ;;  %v4009_v23 = vsel %vm2665_vm12, 4294967295, %v4008_v23 }
  0x8d   :  { %4007 = vst [vmem:[#allocation3_spill] sm:$0xff] %v4006_v22  ;;  %4010 = vst [vmem:[#allocation4_spill] sm:$0xff] %v4009_v23 }
  0x8f   :  { %136 = vperm.xlu1 %2216, %v2581_v1   ;;  %142 = vperm.xlu0 %2217, %v2581_v1  }
  0x93   :  { %2218 = vset.pattern.permute.xlu0 %v2462_v24  ;;  %2219 = vset.pattern.permute.xlu1 %v2463_v25 }
  0xfd   :  { %v95_v30 = vpop.permute.xlu0 %94  ;;  %v93_v31 = vpop.permute.xlu1 %92 }
  0xfe   :  { %v97_v34 = vsel %vm3971_vm2, %v93_v31, %v95_v30  ;;  %v98_v35 = vsel %vm3971_vm2, %v95_v30, %v93_v31 }
  0xff   :  { %v99_v36 = vsub.f32 0.0, %v97_v34  ;;  %v100_v37 = vsub.f32 0.0, %v98_v35 }
 0x101   :  { %v101_v38 = vsel %vm2601_vm3, %v98_v35, %v99_v36  ;;  %v102_v39 = vsel %vm2605_vm4, %v97_v34, %v100_v37 }
 0x102   :  { %v113_v41 = vmul.f32 %v111_v27, %v101_v38  ;;  %v114_v43 = vmul.f32 %v111_v27, %v102_v39 }
 0x104   :  { %v115_v42 = vadd.f32 %v113_v41, %v107_v40  ;;  %v116_v45 = vadd.f32 %v114_v43, %v108_v44  ;;  %v2474_v40 = vmov 70   ;;  %v2475_v41 = vmov 6  }
 0x106   :  { %117 = vrot.lane.b32.xlu0 %v115_v42, %s2464_s30  ;;  %124 = vrot.lane.b32.xlu1 %v115_v42, %s2465_s9 }
 0x10a   :  { %168 = vperm.xlu0 %2218, %v2581_v1   ;;  %126 = vrot.lane.b32.xlu1 %v116_v45, %s2465_s9 }
 0x10e   :  { %119 = vrot.lane.b32.xlu1 %v116_v45, %s2464_s30  ;;  %2221 = vset.pattern.permute.xlu0 %v2466_v46  ;;  %v137_v48 = vpop.permute.xlu1 %136  ;;  %v143_v50 = vpop.permute.xlu0 %142  ;;  %v58_v46 = vand.u32 8, %v2590_v9 }
 0x10f   :  { %v139_v4 = vmul.f32 %v137_v48, %v115_v42  ;;  %v140_v5 = vmul.f32 %v137_v48, %v116_v45  ;;  %v57_v45 = vand.u32 8, %v2587_v8 }
 0x110   :  { %vm2695_vm0 = vcmp.ne.s32.totalorder %v58_v46, 0  ;;  %v2806_v46 = vld [vmem:[%s3953_s1 + $0x44] ss:$8 sps:$4 sm:$0xff]  }
 0x111   :  { %vm2691_vm15 = vcmp.ne.s32.totalorder %v57_v45, 0  ;;  %v4015_v51 = vsel %vm2695_vm0, 4294967295, %v4014_v51  ;;  %v2800_v45 = vld [vmem:[%s3953_s1 + $0x30] ss:$8 sps:$4 sm:$0xff]  }
 0x112   :  { %174 = vperm.xlu1 %2219, %v2581_v1   ;;  %4016 = vst [vmem:[#allocation6_spill] sm:$0xff] %v4015_v51 }
 0x116   :  { %2220 = vset.pattern.permute.xlu1 %v2467_v47 }
 0x178   :  { %v125_v49 = vpop.permute.xlu1 %124  ;;  %v118_v58 = vpop.permute.xlu0 %117 }
 0x17c   :  { %v127_v53 = vpop.permute.xlu1 %126 }
 0x17d   :  { %v129_v54 = vsel %vm3970_vm5, %v125_v49, %v127_v53  ;;  %v130_v55 = vsel %vm3970_vm5, %v127_v53, %v125_v49 }
 0x17e   :  { %v131_v59 = vsub.f32 0.0, %v129_v54  ;;  %v132_v60 = vsub.f32 0.0, %v130_v55 }
 0x180   :  { %v120_v61 = vpop.permute.xlu1 %119 }
 0x181   :  { %v122_v62 = vsel %vm3967_vm6, %v118_v58, %v120_v61  ;;  %v123_v63 = vsel %vm3967_vm6, %v120_v61, %v118_v58 }
 0x182   :  { %v133_v2 = vsel %vm2631_vm7, %v123_v63, %v131_v59  ;;  %v134_v3 = vsel %vm2635_vm8, %v122_v62, %v132_v60 }
 0x183   :  { %v146_v6 = vmul.f32 %v143_v50, %v134_v3  ;;  %v145_v7 = vmul.f32 %v143_v50, %v133_v2  ;;  %v4011_v50 = vmov 0 }
 0x184   :  { %v4012_v50 = vsel %vm2691_vm15, 4294967295, %v4011_v50 }
 0x185   :  { %v148_v10 = vadd.f32 %v146_v6, %v140_v5  ;;  %v147_v11 = vadd.f32 %v145_v7, %v139_v4  ;;  %4013 = vst [vmem:[#allocation5_spill] sm:$0xff] %v4012_v50  ;;  %v2478_v6 = vmov 7   ;;  %v2479_v7 = vmov 71  }
 0x187   :  { %158 = vrot.lane.b32.xlu0 %v148_v10, %s2468_s10  ;;  %156 = vrot.lane.b32.xlu1 %v147_v11, %s2468_s10 }
 0x189   :  { %v169_v15 = vpop.permute.xlu0 %168 }
 0x18a   :  { %v171_v34 = vmul.f32 %v169_v15, %v147_v11  ;;  %v172_v38 = vmul.f32 %v169_v15, %v148_v10 }
 0x18b   :  { %151 = vrot.lane.b32.xlu0 %v148_v10, %s2469_s11  ;;  %149 = vrot.lane.b32.xlu1 %v147_v11, %s2469_s11 }
 0x18f   :  { %200 = vperm.xlu1 %2220, %v2581_v1   ;;  %206 = vperm.xlu0 %2221, %v2581_v1  }
 0x191   :  { %v175_v14 = vpop.permute.xlu1 %174 }
 0x193   :  { %2222 = vset.pattern.permute.xlu0 %v2470_v12  ;;  %2223 = vset.pattern.permute.xlu1 %v2471_v13  ;;  %v61_v12 = vand.u32 4, %v2587_v8  ;;  %v62_v13 = vand.u32 4, %v2590_v9 }
 0x1f9   :  { %v159_v18 = vpop.permute.xlu0 %158  ;;  %v157_v19 = vpop.permute.xlu1 %156 }
 0x1fa   :  { %v161_v20 = vsel %vm3966_vm9, %v157_v19, %v159_v18  ;;  %v162_v21 = vsel %vm3966_vm9, %v159_v18, %v157_v19  ;;  %v4017_v18 = vmov 0  ;;  %v4020_v19 = vmov 0 }
 0x1fb   :  { %v163_v24 = vsub.f32 0.0, %v161_v20  ;;  %v164_v25 = vsub.f32 0.0, %v162_v21 }
 0x1fd   :  { %v152_v26 = vpop.permute.xlu0 %151  ;;  %v150_v27 = vpop.permute.xlu1 %149 }
 0x1fe   :  { %v154_v28 = vsel %vm3963_vm10, %v150_v27, %v152_v26  ;;  %v155_v29 = vsel %vm3963_vm10, %v152_v26, %v150_v27  ;;  %vm2725_vm10 = vcmp.ne.s32.totalorder %v62_v13, 0 }
 0x1ff   :  { %v165_v30 = vsel %vm2661_vm11, %v155_v29, %v163_v24  ;;  %v166_v31 = vsel %vm2665_vm12, %v154_v28, %v164_v25  ;;  %v4021_v19 = vsel %vm2725_vm10, 4294967295, %v4020_v19 }
 0x200   :  { %v177_v35 = vmul.f32 %v175_v14, %v165_v30  ;;  %v178_v37 = vmul.f32 %v175_v14, %v166_v31  ;;  %4022 = vst [vmem:[#allocation8_spill] sm:$0xff] %v4021_v19 }
 0x202   :  { %v179_v36 = vadd.f32 %v177_v35, %v171_v34  ;;  %v180_v39 = vadd.f32 %v178_v37, %v172_v38  ;;  %v2751_v38 = vld [vmem:[%s3953_s1 + $0x4] ss:$8 sps:$4 sm:$0xff]  }
 0x203   :  { %509 = vmatprep.subr.bf16.mxu0 %v2751_v38  ;;  %821 = vmatprep.subr.bf16.mxu1 %v2751_v38 }
 0x204   :  { %181 = vrot.lane.b32.xlu0 %v179_v36, %s2472_s12  ;;  %188 = vrot.lane.b32.xlu1 %v179_v36, %s2473_s13 }
 0x208   :  { %232 = vperm.xlu0 %2222, %v2581_v1   ;;  %190 = vrot.lane.b32.xlu1 %v180_v39, %s2473_s13 }
 0x20c   :  { %183 = vrot.lane.b32.xlu1 %v180_v39, %s2472_s12  ;;  %2225 = vset.pattern.permute.xlu0 %v2474_v40  ;;  %v2764_v40 = vld [vmem:[%s3953_s1 + $0x14] ss:$8 sps:$4 sm:$0xff]  }
 0x20e   :  { %v201_v42 = vpop.permute.xlu1 %200  ;;  %v207_v44 = vpop.permute.xlu0 %206 }
 0x20f   :  { %v203_v62 = vmul.f32 %v201_v42, %v179_v36  ;;  %v204_v63 = vmul.f32 %v201_v42, %v180_v39  ;;  %v2756_v39 = vld [vmem:[%s3953_s1] ss:$8 sps:$4 sm:$0xff]   ;;  %v2777_v42 = vld [vmem:[%s3953_s1 + $0x24] ss:$8 sps:$4 sm:$0xff]  }
 0x210   :  { %238 = vperm.xlu1 %2223, %v2581_v1   ;;  %510 = vmatpush1.bf16.msra.mxu0 %v2756_v39 }
 0x211   :  { %511 = vmatprep.subr.bf16.mxu0 %v2764_v40  ;;  %822 = vmatpush1.bf16.msra.mxu1 %v2756_v39 }
 0x212   :  { %823 = vmatprep.subr.bf16.mxu1 %v2764_v40 }
 0x214   :  { %2224 = vset.pattern.permute.xlu1 %v2475_v41  ;;  %v2770_v41 = vld [vmem:[%s3953_s1 + $0x10] ss:$8 sps:$4 sm:$0xff]  }
 0x215   :  { %512 = vmatpush1.bf16.msra.mxu0 %v2770_v41  ;;  %824 = vmatpush1.bf16.msra.mxu1 %v2770_v41 }
 0x216   :  { %513 = vmatprep.subr.bf16.mxu0 %v2777_v42  ;;  %825 = vmatprep.subr.bf16.mxu1 %v2777_v42 }
 0x276   :  { %v189_v43 = vpop.permute.xlu1 %188  ;;  %v182_v52 = vpop.permute.xlu0 %181 }
 0x27a   :  { %v191_v47 = vpop.permute.xlu1 %190 }
 0x27b   :  { %v193_v48 = vsel %vm3962_vm13, %v189_v43, %v191_v47  ;;  %v194_v49 = vsel %vm3962_vm13, %v191_v47, %v189_v43  ;;  %vm2721_vm13 = vcmp.ne.s32.totalorder %v61_v12, 0  ;;  %v2786_v43 = vld [vmem:[%s3953_s1 + $0x20] ss:$8 sps:$4 sm:$0xff]  }
 0x27c   :  { %v195_v53 = vsub.f32 0.0, %v193_v48  ;;  %v196_v54 = vsub.f32 0.0, %v194_v49  ;;  %v4018_v18 = vsel %vm2721_vm13, 4294967295, %v4017_v18  ;;  %514 = vmatpush1.bf16.msra.mxu0 %v2786_v43  ;;  %826 = vmatpush1.bf16.msra.mxu1 %v2786_v43  ;;  %v2814_v47 = vld [vmem:[%s3953_s1 + $0x40] ss:$8 sps:$4 sm:$0xff]  }
 0x27d   :  { %4019 = vst [vmem:[#allocation7_spill] sm:$0xff] %v4018_v18  ;;  %v2819_v48 = vld [vmem:[%s3953_s1 + $0x54] ss:$8 sps:$4 sm:$0xff]   ;;  %v2828_v49 = vld [vmem:[%s3953_s1 + $0x50] ss:$8 sps:$4 sm:$0xff]  }
 0x27e   :  { %v184_v55 = vpop.permute.xlu1 %183  ;;  %v2930_v12 = vld [vmem:[%s3953_s1 + $0xc0] ss:$8 sps:$4 sm:$0xff]  }
 0x27f   :  { %v186_v58 = vsel %vm3961_vm14, %v182_v52, %v184_v55  ;;  %v187_v59 = vsel %vm3961_vm14, %v184_v55, %v182_v52  ;;  %vm3964_vm14 = vcmp.lt.s32.totalorder %v2587_v8, 4  ;;  %v2834_v52 = vld [vmem:[%s3953_s1 + $0x64] ss:$8 sps:$4 sm:$0xff]   ;;  %v2856_v55 = vld [vmem:[%s3953_s1 + $0x70] ss:$8 sps:$4 sm:$0xff]  }
 0x280   :  { %v197_v60 = vsel %vm2691_vm15, %v187_v59, %v195_v53  ;;  %v198_v61 = vsel %vm2695_vm0, %v186_v58, %v196_v54  ;;  %v2842_v53 = vld [vmem:[%s3953_s1 + $0x60] ss:$8 sps:$4 sm:$0xff]   ;;  %v2848_v54 = vld [vmem:[%s3953_s1 + $0x74] ss:$8 sps:$4 sm:$0xff]   ;;  %v2862_v58 = vld [vmem:[%s3953_s1 + $0x84] ss:$8 sps:$4 sm:$0xff]  }
 0x281   :  { %v210_v2 = vmul.f32 %v207_v44, %v198_v61  ;;  %v209_v3 = vmul.f32 %v207_v44, %v197_v60  ;;  %v2792_v44 = vld [vmem:[%s3953_s1 + $0x34] ss:$8 sps:$4 sm:$0xff]   ;;  %v2870_v59 = vld [vmem:[%s3953_s1 + $0x80] ss:$8 sps:$4 sm:$0xff]   ;;  %v2884_v61 = vld [vmem:[%s3953_s1 + $0x90] ss:$8 sps:$4 sm:$0xff]  }
 0x282   :  { %515 = vmatprep.subr.bf16.mxu0 %v2792_v44  ;;  %827 = vmatprep.subr.bf16.mxu1 %v2792_v44  ;;  %v2876_v60 = vld [vmem:[%s3953_s1 + $0x94] ss:$8 sps:$4 sm:$0xff]  }
 0x283   :  { %v212_v4 = vadd.f32 %v210_v2, %v204_v63  ;;  %v211_v5 = vadd.f32 %v209_v3, %v203_v62  ;;  %516 = vmatpush1.bf16.msra.mxu0 %v2800_v45  ;;  %828 = vmatpush1.bf16.msra.mxu1 %v2800_v45  ;;  %v2890_v62 = vld [vmem:[%s3953_s1 + $0xa4] ss:$8 sps:$4 sm:$0xff]   ;;  %v2898_v63 = vld [vmem:[%s3953_s1 + $0xa0] ss:$8 sps:$4 sm:$0xff]   ;;  %v2904_v2 = vld [vmem:[%s3953_s1 + $0xb4] ss:$8 sps:$4 sm:$0xff]  }
 0x284   :  { %517 = vmatprep.subr.bf16.mxu0 %v2806_v46  ;;  %829 = vmatprep.subr.bf16.mxu1 %v2806_v46  ;;  %v2912_v3 = vld [vmem:[%s3953_s1 + $0xb0] ss:$8 sps:$4 sm:$0xff]  }
 0x285   :  { %222 = vrot.lane.b32.xlu0 %v212_v4, %s2476_s14  ;;  %220 = vrot.lane.b32.xlu1 %v211_v5, %s2476_s14 }
 0x287   :  { %v233_v11 = vpop.permute.xlu0 %232  ;;  %518 = vmatpush1.bf16.msra.mxu0 %v2814_v47  ;;  %830 = vmatpush1.bf16.msra.mxu1 %v2814_v47 }
 0x288   :  { %v235_v30 = vmul.f32 %v233_v11, %v211_v5  ;;  %v236_v36 = vmul.f32 %v233_v11, %v212_v4  ;;  %519 = vmatprep.subr.bf16.mxu0 %v2819_v48  ;;  %831 = vmatprep.subr.bf16.mxu1 %v2819_v48  ;;  %v66_v11 = vand.u32 2, %v2590_v9 }
 0x289   :  { %215 = vrot.lane.b32.xlu0 %v212_v4, %s2477_s15  ;;  %213 = vrot.lane.b32.xlu1 %v211_v5, %s2477_s15 }
 0x28a   :  { %vm2950_vm6 = vcmp.ne.s32.totalorder %v66_v11, 0 }
 0x28b   :  { %520 = vmatpush1.bf16.msra.mxu0 %v2828_v49  ;;  %832 = vmatpush1.bf16.msra.mxu1 %v2828_v49 }
 0x28c   :  { %521 = vmatprep.subr.bf16.mxu0 %v2834_v52  ;;  %833 = vmatprep.subr.bf16.mxu1 %v2834_v52 }
 0x28d   :  { %264 = vperm.xlu1 %2224, %v2581_v1   ;;  %270 = vperm.xlu0 %2225, %v2581_v1  }
 0x28f   :  { %v239_v10 = vpop.permute.xlu1 %238  ;;  %522 = vmatpush1.bf16.msra.mxu0 %v2842_v53  ;;  %834 = vmatpush1.bf16.msra.mxu1 %v2842_v53 }
 0x290   :  { %523 = vmatprep.subr.bf16.mxu0 %v2848_v54  ;;  %835 = vmatprep.subr.bf16.mxu1 %v2848_v54 }
 0x291   :  { %2226 = vset.pattern.permute.xlu0 %v2478_v6  ;;  %2227 = vset.pattern.permute.xlu1 %v2479_v7  ;;  %v2923_v7 = vld [vmem:[%s3953_s1 + $0xc4] ss:$8 sps:$4 sm:$0xff]  }
 0x293   :  { %524 = vmatpush1.bf16.msra.mxu0 %v2856_v55  ;;  %836 = vmatpush1.bf16.msra.mxu1 %v2856_v55 }
 0x294   :  { %525 = vmatprep.subr.bf16.mxu0 %v2862_v58  ;;  %837 = vmatprep.subr.bf16.mxu1 %v2862_v58 }
 0x297   :  { %526 = vmatpush1.bf16.msra.mxu0 %v2870_v59  ;;  %838 = vmatpush1.bf16.msra.mxu1 %v2870_v59 }
 0x298   :  { %527 = vmatprep.subr.bf16.mxu0 %v2876_v60  ;;  %839 = vmatprep.subr.bf16.mxu1 %v2876_v60 }
 0x29b   :  { %528 = vmatpush1.bf16.msra.mxu0 %v2884_v61  ;;  %840 = vmatpush1.bf16.msra.mxu1 %v2884_v61 }
 0x29c   :  { %529 = vmatprep.subr.bf16.mxu0 %v2890_v62  ;;  %841 = vmatprep.subr.bf16.mxu1 %v2890_v62 }
 0x29f   :  { %530 = vmatpush1.bf16.msra.mxu0 %v2898_v63  ;;  %842 = vmatpush1.bf16.msra.mxu1 %v2898_v63 }
 0x2a0   :  { %531 = vmatprep.subr.bf16.mxu0 %v2904_v2  ;;  %843 = vmatprep.subr.bf16.mxu1 %v2904_v2 }
 0x2a3   :  { %532 = vmatpush1.bf16.msra.mxu0 %v2912_v3  ;;  %844 = vmatpush1.bf16.msra.mxu1 %v2912_v3 }
 0x2a4   :  { %533 = vmatprep.subr.bf16.mxu0 %v2923_v7  ;;  %845 = vmatprep.subr.bf16.mxu1 %v2923_v7 }
 0x2a7   :  { %534 = vmatpush1.bf16.msra.mxu0 %v2930_v12  ;;  %846 = vmatpush1.bf16.msra.mxu1 %v2930_v12 }
 0x2f7   :  { %v223_v14 = vpop.permute.xlu0 %222  ;;  %v221_v15 = vpop.permute.xlu1 %220 }
 0x2f8   :  { %v225_v16 = vsel %vm3965_vm1, %v221_v15, %v223_v14  ;;  %v226_v17 = vsel %vm3965_vm1, %v223_v14, %v221_v15  ;;  %vm3968_vm1 = vcmp.lt.s32.totalorder %v2587_v8, 2 }
 0x2f9   :  { %v227_v20 = vsub.f32 0.0, %v225_v16  ;;  %v228_v21 = vsub.f32 0.0, %v226_v17  ;;  %v2944_v16 = vld [vmem:[%s3953_s1 + $0xd4] ss:$8 sps:$4 sm:$0xff]   ;;  %v4023_v17 = vmov 0 }
 0x2fa   :  { %535 = vmatprep.subr.bf16.mxu0 %v2944_v16  ;;  %847 = vmatprep.subr.bf16.mxu1 %v2944_v16 }
 0x2fb   :  { %v216_v24 = vpop.permute.xlu0 %215  ;;  %v214_v25 = vpop.permute.xlu1 %213 }
 0x2fc   :  { %v218_v26 = vsel %vm3964_vm14, %v214_v25, %v216_v24  ;;  %v219_v27 = vsel %vm3964_vm14, %v216_v24, %v214_v25  ;;  %vm3969_vm14 = vcmp.lt.s32.totalorder %v2587_v8, 126 }
 0x2fd   :  { %v229_v28 = vsel %vm2721_vm13, %v219_v27, %v227_v20  ;;  %v230_v29 = vsel %vm2725_vm10, %v218_v26, %v228_v21  ;;  %v4026_v20 = vmov 0  ;;  %v2957_v21 = vld [vmem:[%s3953_s1 + $0xd0] ss:$8 sps:$4 sm:$0xff]  }
 0x2fe   :  { %v241_v31 = vmul.f32 %v239_v10, %v229_v28  ;;  %v242_v35 = vmul.f32 %v239_v10, %v230_v29  ;;  %v65_v10 = vand.u32 2, %v2587_v8  ;;  %v4027_v20 = vsel %vm2950_vm6, 4294967295, %v4026_v20  ;;  %v2963_v28 = vld [vmem:[%s3953_s1 + $0xe4] ss:$8 sps:$4 sm:$0xff]   ;;  %536 = vmatpush1.bf16.msra.mxu0 %v2957_v21  ;;  %848 = vmatpush1.bf16.msra.mxu1 %v2957_v21 }
 0x2ff   :  { %4028 = vst [vmem:[#allocation10_spill] sm:$0xff] %v4027_v20  ;;  %537 = vmatprep.subr.bf16.mxu0 %v2963_v28  ;;  %849 = vmatprep.subr.bf16.mxu1 %v2963_v28 }
 0x300   :  { %v2737_v34 = vadd.f32 %v241_v31, %v235_v30  ;;  %v2743_v37 = vadd.f32 %v242_v35, %v236_v36  ;;  %vm2946_vm9 = vcmp.ne.s32.totalorder %v65_v10, 0  ;;  %v2974_v31 = vld [vmem:[%s3953_s1 + $0xe0] ss:$8 sps:$4 sm:$0xff]  }
 0x301   :  { %v4024_v17 = vsel %vm2946_vm9, 4294967295, %v4023_v17 }
 0x302   :  { %245 = vrot.lane.b32.xlu0 %v2737_v34, %s2480_s16  ;;  %252 = vrot.lane.b32.xlu1 %v2737_v34, %s2481_s17  ;;  %4025 = vst [vmem:[#allocation9_spill] sm:$0xff] %v4024_v17 }
 0x303   :  { %538 = vmatpush1.bf16.msra.mxu0 %v2974_v31  ;;  %850 = vmatpush1.bf16.msra.mxu1 %v2974_v31 }
 0x306   :  { %296 = vperm.xlu0 %2226, %v2581_v1   ;;  %254 = vrot.lane.b32.xlu1 %v2743_v37, %s2481_s17 }
 0x30a   :  { %247 = vrot.lane.b32.xlu1 %v2743_v37, %s2480_s16 }
 0x30c   :  { %v265_v4 = vpop.permute.xlu1 %264  ;;  %v271_v6 = vpop.permute.xlu0 %270 }
 0x30d   :  { %v267_v10 = vmul.f32 %v265_v4, %v2737_v34  ;;  %v268_v11 = vmul.f32 %v265_v4, %v2743_v37  ;;  %v2484_v34 = vmov 80   ;;  %v2485_v37 = vmov 16  }
 0x30e   :  { %302 = vperm.xlu1 %2227, %v2581_v1   ;;  %2229 = vset.pattern.permute.xlu0 %v2484_v34  ;;  %v2486_v4 = vmov 17  }
 0x312   :  { %2228 = vset.pattern.permute.xlu1 %v2485_v37 }
 0x374   :  { %v253_v5 = vpop.permute.xlu1 %252  ;;  %v246_v24 = vpop.permute.xlu0 %245 }
 0x378   :  { %v255_v13 = vpop.permute.xlu1 %254 }
 0x379   :  { %v257_v14 = vsel %vm3969_vm14, %v253_v5, %v255_v13  ;;  %v258_v15 = vsel %vm3969_vm14, %v255_v13, %v253_v5  ;;  %v2985_v5 = vld [vmem:[%s3953_s1 + $0xf4] ss:$8 sps:$4 sm:$0xff]   ;;  %vm3989_vm14 = vcmp.lt.s32.totalorder %v2587_v8, 1 }
 0x37a   :  { %v259_v25 = vsub.f32 0.0, %v257_v14  ;;  %v260_v26 = vsub.f32 0.0, %v258_v15  ;;  %539 = vmatprep.subr.bf16.mxu0 %v2985_v5  ;;  %851 = vmatprep.subr.bf16.mxu1 %v2985_v5 }
 0x37c   :  { %v248_v27 = vpop.permute.xlu1 %247 }
 0x37d   :  { %v250_v29 = vsel %vm3968_vm1, %v246_v24, %v248_v27  ;;  %v251_v30 = vsel %vm3968_vm1, %v248_v27, %v246_v24  ;;  %vm3990_vm1 = vcmp.lt.s32.totalorder %v2587_v8, 127 }
 0x37e   :  { %v261_v35 = vsel %vm2946_vm9, %v251_v30, %v259_v25  ;;  %v262_v36 = vsel %vm2950_vm6, %v250_v29, %v260_v26  ;;  %v2994_v25 = vld [vmem:[%s3953_s1 + $0xf0] ss:$8 sps:$4 sm:$0xff]   ;;  %v69_v29 = vand.u32 1, %v2587_v8  ;;  %v70_v30 = vand.u32 1, %v2590_v9 }
 0x37f   :  { %v274_v13 = vmul.f32 %v271_v6, %v262_v36  ;;  %v273_v14 = vmul.f32 %v271_v6, %v261_v35  ;;  %540 = vmatpush1.bf16.msra.mxu0 %v2994_v25  ;;  %852 = vmatpush1.bf16.msra.mxu1 %v2994_v25  ;;  %v2487_v6 = vmov 81  }
 0x380   :  { %550 = vmatprep.subr.bf16.mxu0 %v2751_v38  ;;  %862 = vmatprep.subr.bf16.mxu1 %v2751_v38  ;;  %vm3019_vm5 = vcmp.ne.s32.totalorder %v69_v29, 0  ;;  %vm3023_vm2 = vcmp.ne.s32.totalorder %v70_v30, 0 }
 0x381   :  { %v276_v15 = vadd.f32 %v274_v13, %v268_v11  ;;  %v275_v24 = vadd.f32 %v273_v14, %v267_v10  ;;  %v2375_v13 = vld [vmem:[%s3955_s3 + $0x4] ss:$8 sps:$4 sm:$0xff]  }
 0x383   :  { %286 = vrot.lane.b32.xlu0 %v276_v15, %s3995_s27  ;;  %284 = vrot.lane.b32.xlu1 %v275_v24, %s3995_s27 }
 0x385   :  { %v297_v27 = vpop.permute.xlu0 %296 }
 0x386   :  { %v299_v30 = vmul.f32 %v297_v27, %v275_v24 }
 0x387   :  { %279 = vrot.lane.b32.xlu0 %v276_v15, %s2483_s28  ;;  %277 = vrot.lane.b32.xlu1 %v275_v24, %s2483_s28 }
 0x38b   :  { %602 = vperm.xlu0 %2229, %v2581_v1   ;;  %596 = vperm.xlu1 %2228, %v2581_v1  }
 0x38d   :  { %v303_v26 = vpop.permute.xlu1 %302 }
 0x38f   :  { %2230 = vset.pattern.permute.xlu1 %v2486_v4 }
 0x390   :  { %620 = vperm.xlu1 %2230, %v2581_v1  }
 0x394   :  { %2231 = vset.pattern.permute.xlu1 %v2487_v6 }
 0x395   :  { %626 = vperm.xlu1 %2231, %v2581_v1  }
 0x3f5   :  { %v287_v35 = vpop.permute.xlu0 %286  ;;  %v285_v36 = vpop.permute.xlu1 %284 }
 0x3f6   :  { %v289_v10 = vsel %vm3990_vm1, %v285_v36, %v287_v35  ;;  %v290_v11 = vsel %vm3990_vm1, %v287_v35, %v285_v36  ;;  %v300_v36 = vmul.f32 %v297_v27, %v276_v15 }
 0x3f7   :  { %v291_v14 = vsub.f32 0.0, %v289_v10  ;;  %v292_v9 = vsub.f32 0.0, %v290_v11 }
 0x3f9   :  { %v280_v34 = vpop.permute.xlu0 %279  ;;  %v278_v37 = vpop.permute.xlu1 %277 }
 0x3fa   :  { %v282_v4 = vsel %vm3989_vm14, %v278_v37, %v280_v34  ;;  %v283_v6 = vsel %vm3989_vm14, %v280_v34, %v278_v37  ;;  %v2490_v37 = vmov 19   ;;  %vm4033_vm14 = vcmp.lt.s32.totalorder %v2587_v8, 64 }
 0x3fb   :  { %v293_v29 = vsel %vm3019_vm5, %v283_v6, %v291_v14  ;;  %v294_v35 = vsel %vm3023_vm2, %v282_v4, %v292_v9  ;;  %v2491_v4 = vmov 83   ;;  %vm4034_vm1 = vmmov %vm4033_vm14 }
 0x3fc   :  { %v305_v0 = vmul.f32 %v303_v26, %v293_v29  ;;  %v306_v20 = vmul.f32 %v303_v26, %v294_v35 }
 0x3fe   :  { %v308_v10 = vadd.f32 %v306_v20, %v300_v36  ;;  %v307_v11 = vadd.f32 %v305_v0, %v299_v30  ;;  %v2488_v0 = vmov 18  }
 0x3ff   :  { %2232 = vset.pattern.permute.xlu0 %v2488_v0 }
 0x400   :  { %v310_v17 = vpack.c.bf16 %v308_v10, %v308_v10  ;;  %v309_v19 = vpack.c.bf16 %v307_v11, %v307_v11 }
 0x402   :  { %v312_v18 = vunpack.c.l.bf16 %v310_v17  ;;  %v311_v51 = vunpack.c.l.bf16 %v309_v19 }
 0x404   :  { %v314_v50 = vsub.f32 %v308_v10, %v312_v18  ;;  %v313_v23 = vsub.f32 %v307_v11, %v311_v51 }
 0x406   :  { %v316_v22 = vpack.c.bf16 %v314_v50, %v314_v50  ;;  %v315_v34 = vpack.c.bf16 %v313_v23, %v313_v23 }
 0x408   :  { %541 = vmatprep.mubr.bf16.mxu0 %v316_v22  ;;  %v2489_v22 = vmov 82  }
 0x409   :  { %542 = vmatmul.mubr.bf16.vlgmr.msra.gmra.mrb[0].mxu0 %v315_v34  ;;  %2233 = vset.pattern.permute.xlu1 %v2489_v22 }
 0x40a   :  { %551 = vmatpush1.bf16.msra.mxu0 %v2756_v39  ;;  %582 = vmatprep.mubr.bf16.mxu0 %v310_v17  ;;  %v603_v23 = vpop.permute.xlu0 %602  ;;  %v597_v50 = vpop.permute.xlu1 %596 }
 0x40b   :  { %552 = vmatprep.subr.bf16.mxu0 %v2764_v40 }
 0x40e   :  { %553 = vmatpush1.bf16.msra.mxu0 %v2770_v41 }
 0x40f   :  { %554 = vmatprep.subr.bf16.mxu0 %v2777_v42  ;;  %v621_v6 = vpop.permute.xlu1 %620 }
 0x412   :  { %555 = vmatpush1.bf16.msra.mxu0 %v2786_v43 }
 0x413   :  { %556 = vmatprep.subr.bf16.mxu0 %v2792_v44 }
 0x414   :  { %v627_v29 = vpop.permute.xlu1 %626 }
 0x416   :  { %557 = vmatpush1.bf16.msra.mxu0 %v2800_v45 }
 0x417   :  { %558 = vmatprep.subr.bf16.mxu0 %v2806_v46 }
 0x41a   :  { %559 = vmatpush1.bf16.msra.mxu0 %v2814_v47 }
 0x41b   :  { %560 = vmatprep.subr.bf16.mxu0 %v2819_v48 }
 0x41e   :  { %561 = vmatpush1.bf16.msra.mxu0 %v2828_v49 }
 0x41f   :  { %562 = vmatprep.subr.bf16.mxu0 %v2834_v52 }
 0x422   :  { %563 = vmatpush1.bf16.msra.mxu0 %v2842_v53 }
 0x423   :  { %564 = vmatprep.subr.bf16.mxu0 %v2848_v54 }
 0x426   :  { %565 = vmatpush1.bf16.msra.mxu0 %v2856_v55 }
 0x427   :  { %566 = vmatprep.subr.bf16.mxu0 %v2862_v58 }
 0x42a   :  { %567 = vmatpush1.bf16.msra.mxu0 %v2870_v59 }
 0x42b   :  { %568 = vmatprep.subr.bf16.mxu0 %v2876_v60 }
 0x42e   :  { %569 = vmatpush1.bf16.msra.mxu0 %v2884_v61 }
 0x42f   :  { %570 = vmatprep.subr.bf16.mxu0 %v2890_v62 }
 0x432   :  { %571 = vmatpush1.bf16.msra.mxu0 %v2898_v63 }
 0x433   :  { %572 = vmatprep.subr.bf16.mxu0 %v2904_v2 }
 0x436   :  { %573 = vmatpush1.bf16.msra.mxu0 %v2912_v3 }
 0x437   :  { %574 = vmatprep.subr.bf16.mxu0 %v2923_v7 }
 0x43a   :  { %575 = vmatpush1.bf16.msra.mxu0 %v2930_v12 }
 0x43b   :  { %576 = vmatprep.subr.bf16.mxu0 %v2944_v16 }
 0x43e   :  { %577 = vmatpush1.bf16.msra.mxu0 %v2957_v21 }
 0x43f   :  { %578 = vmatprep.subr.bf16.mxu0 %v2963_v28 }
 0x442   :  { %579 = vmatpush1.bf16.msra.mxu0 %v2974_v31 }
 0x443   :  { %580 = vmatprep.subr.bf16.mxu0 %v2985_v5 }
 0x446   :  { %581 = vmatpush1.bf16.msra.mxu0 %v2994_v25 }
 0x447   :  { %1133 = vmatprep.subr.bf16.mxu0 %v2751_v38 }
 0x449   :  { %583 = vmatmul.mubr.bf16.vlgmr.msra.gmra.mrb[0].mxu0 %v309_v19 }
 0x44a   :  { %1134 = vmatpush1.bf16.msra.mxu0 %v2756_v39 }
 0x44b   :  { %1135 = vmatprep.subr.bf16.mxu0 %v2764_v40 }
 0x44e   :  { %1136 = vmatpush1.bf16.msra.mxu0 %v2770_v41 }
 0x44f   :  { %1137 = vmatprep.subr.bf16.mxu0 %v2777_v42 }
 0x452   :  { %1138 = vmatpush1.bf16.msra.mxu0 %v2786_v43 }
 0x453   :  { %1139 = vmatprep.subr.bf16.mxu0 %v2792_v44 }
 0x456   :  { %1140 = vmatpush1.bf16.msra.mxu0 %v2800_v45 }
 0x457   :  { %1141 = vmatprep.subr.bf16.mxu0 %v2806_v46 }
 0x45a   :  { %1142 = vmatpush1.bf16.msra.mxu0 %v2814_v47 }
 0x45b   :  { %1143 = vmatprep.subr.bf16.mxu0 %v2819_v48 }
 0x45e   :  { %1144 = vmatpush1.bf16.msra.mxu0 %v2828_v49 }
 0x45f   :  { %1145 = vmatprep.subr.bf16.mxu0 %v2834_v52 }
 0x462   :  { %1146 = vmatpush1.bf16.msra.mxu0 %v2842_v53 }
 0x463   :  { %1147 = vmatprep.subr.bf16.mxu0 %v2848_v54 }
 0x466   :  { %1148 = vmatpush1.bf16.msra.mxu0 %v2856_v55 }
 0x467   :  { %1149 = vmatprep.subr.bf16.mxu0 %v2862_v58 }
 0x46a   :  { %1150 = vmatpush1.bf16.msra.mxu0 %v2870_v59 }
 0x46b   :  { %1151 = vmatprep.subr.bf16.mxu0 %v2876_v60 }
 0x46e   :  { %1152 = vmatpush1.bf16.msra.mxu0 %v2884_v61 }
 0x46f   :  { %1153 = vmatprep.subr.bf16.mxu0 %v2890_v62 }
 0x472   :  { %1154 = vmatpush1.bf16.msra.mxu0 %v2898_v63 }
 0x473   :  { %1155 = vmatprep.subr.bf16.mxu0 %v2904_v2 }
 0x476   :  { %1156 = vmatpush1.bf16.msra.mxu0 %v2912_v3 }
 0x477   :  { %1157 = vmatprep.subr.bf16.mxu0 %v2923_v7 }
 0x47a   :  { %1158 = vmatpush1.bf16.msra.mxu0 %v2930_v12 }
 0x47b   :  { %1159 = vmatprep.subr.bf16.mxu0 %v2944_v16 }
 0x47e   :  { %1160 = vmatpush1.bf16.msra.mxu0 %v2957_v21 }
 0x47f   :  { %1161 = vmatprep.subr.bf16.mxu0 %v2963_v28 }
 0x482   :  { %1162 = vmatpush1.bf16.msra.mxu0 %v2974_v31 }
 0x483   :  { %1163 = vmatprep.subr.bf16.mxu0 %v2985_v5 }
 0x486   :  { %1164 = vmatpush1.bf16.msra.mxu0 %v2994_v25 }
 0x487   :  { %1174 = vmatprep.subr.bf16.mxu0 %v2751_v38  ;;  %v3104_v38 = vld [vmem:[%s3952_s0] sm:$0xff] }
 0x51c   :  { %v584_v51 = vpop.f32.mrb[0].mxu0 }
 0x51d   :  { %v606_v18 = vmul.f32 %v603_v23, %v584_v51  ;;  %v586_v19 = vpop.f32.mrb[1].mxu0  ;;  %v599_v26 = vmul.f32 %v597_v50, %v584_v51 }
 0x51e   :  { %v591_v17 = vsub.f32 0.0, %v586_v19  ;;  %v600_v20 = vmul.f32 %v597_v50, %v586_v19  ;;  %v588_v15 = vpop.f32.mrb[2].mxu0 }
 0x51f   :  { %v589_v24 = vpop.f32.mrb[3].mxu0  ;;  %v2493_v15 = vmov 84  }
 0x520   :  { %v605_v27 = vmul.f32 %v603_v23, %v591_v17  ;;  %v608_v14 = vadd.f32 %v606_v18, %v600_v20  ;;  %v2492_v20 = vmov 20  }
 0x522   :  { %v607_v9 = vadd.f32 %v605_v27, %v599_v26  ;;  %611 = vrot.lane.b32.xlu1 %v608_v14, %s2461_s29  ;;  %v624_v50 = vmul.f32 %v621_v6, %v608_v14 }
 0x524   :  { %609 = vrot.lane.b32.xlu0 %v607_v9, %s2461_s29  ;;  %v623_v23 = vmul.f32 %v621_v6, %v607_v9 }
 0x526   :  { %656 = vperm.xlu1 %2233, %v3104_v38  }
 0x528   :  { %650 = vperm.xlu0 %2232, %v3104_v38  }
 0x52a   :  { %2234 = vset.pattern.permute.xlu1 %v2490_v37 }
 0x52c   :  { %2235 = vset.pattern.permute.xlu0 %v2491_v4 }
 0x594   :  { %v612_v35 = vpop.permute.xlu1 %611 }
 0x596   :  { %v610_v30 = vpop.permute.xlu0 %609 }
 0x597   :  { %v613_v36 = vsel %vm4033_vm14, %v610_v30, %v612_v35  ;;  %v614_v10 = vsel %vm4034_vm1, %v612_v35, %v610_v30  ;;  %vm4035_vm14 = vcmp.lt.s32.totalorder %v2587_v8, 96 }
 0x598   :  { %v615_v11 = vsub.f32 0.0, %v613_v36  ;;  %v616_v34 = vsub.f32 0.0, %v614_v10  ;;  %vm4036_vm1 = vmmov %vm4035_vm14 }
 0x59a   :  { %v617_v0 = vsel %vm2601_vm3, %v614_v10, %v615_v11  ;;  %v618_v22 = vsel %vm2605_vm4, %v613_v36, %v616_v34  ;;  %vm4037_vm4 = vcmp.lt.s32.totalorder %v2587_v8, 32 }
 0x59b   :  { %v630_v51 = vmul.f32 %v627_v29, %v618_v22  ;;  %v629_v18 = vmul.f32 %v627_v29, %v617_v0  ;;  %vm4038_vm3 = vmmov %vm4037_vm4 }
 0x59d   :  { %v632_v19 = vadd.f32 %v630_v51, %v624_v50  ;;  %v631_v17 = vadd.f32 %v629_v18, %v623_v23  ;;  %v2494_v18 = vmov 85  }
 0x59f   :  { %641 = vrot.lane.b32.xlu0 %v632_v19, %s2465_s9  ;;  %639 = vrot.lane.b32.xlu1 %v631_v17, %s2465_s9 }
 0x5a3   :  { %635 = vrot.lane.b32.xlu0 %v632_v19, %s2464_s30  ;;  %633 = vrot.lane.b32.xlu1 %v631_v17, %s2464_s30 }
 0x5a5   :  { %v657_v24 = vpop.permute.xlu1 %656 }
 0x5a7   :  { %680 = vperm.xlu1 %2234, %v3104_v38   ;;  %686 = vperm.xlu0 %2235, %v3104_v38   ;;  %v651_v26 = vpop.permute.xlu0 %650 }
 0x5a8   :  { %v653_v34 = vmul.f32 %v651_v26, %v631_v17  ;;  %v654_v50 = vmul.f32 %v651_v26, %v632_v19  ;;  %v2495_v17 = vmov 21  }
 0x5ab   :  { %2236 = vset.pattern.permute.xlu0 %v2492_v20  ;;  %2237 = vset.pattern.permute.xlu1 %v2493_v15 }
 0x611   :  { %v642_v27 = vpop.permute.xlu0 %641  ;;  %v640_v14 = vpop.permute.xlu1 %639 }
 0x612   :  { %v643_v9 = vsel %vm4035_vm14, %v640_v14, %v642_v27  ;;  %v644_v37 = vsel %vm4036_vm1, %v642_v27, %v640_v14  ;;  %vm4041_vm14 = vcmp.lt.s32.totalorder %v2587_v8, 16 }
 0x613   :  { %v645_v4 = vsub.f32 0.0, %v643_v9  ;;  %v646_v6 = vsub.f32 0.0, %v644_v37  ;;  %vm4042_vm1 = vmmov %vm4041_vm14 }
 0x615   :  { %v636_v29 = vpop.permute.xlu0 %635  ;;  %v634_v35 = vpop.permute.xlu1 %633 }
 0x616   :  { %v637_v30 = vsel %vm4037_vm4, %v634_v35, %v636_v29  ;;  %v638_v36 = vsel %vm4038_vm3, %v636_v29, %v634_v35  ;;  %vm4039_vm3 = vcmp.lt.s32.totalorder %v2587_v8, 112 }
 0x617   :  { %v647_v10 = vsel %vm2631_vm7, %v638_v36, %v645_v4  ;;  %v648_v11 = vsel %vm2635_vm8, %v637_v30, %v646_v6  ;;  %vm4040_vm4 = vmmov %vm4039_vm3 }
 0x618   :  { %v659_v0 = vmul.f32 %v657_v24, %v647_v10  ;;  %v660_v23 = vmul.f32 %v657_v24, %v648_v11 }
 0x61a   :  { %v661_v22 = vadd.f32 %v659_v0, %v653_v34  ;;  %v662_v51 = vadd.f32 %v660_v23, %v654_v50 }
 0x61c   :  { %663 = vrot.lane.b32.xlu0 %v661_v22, %s2469_s11  ;;  %669 = vrot.lane.b32.xlu1 %v661_v22, %s2468_s10 }
 0x620   :  { %710 = vperm.xlu0 %2236, %v3104_v38   ;;  %671 = vrot.lane.b32.xlu1 %v662_v51, %s2468_s10 }
 0x624   :  { %665 = vrot.lane.b32.xlu1 %v662_v51, %s2469_s11  ;;  %2239 = vset.pattern.permute.xlu0 %v2494_v18 }
 0x626   :  { %v681_v20 = vpop.permute.xlu1 %680  ;;  %v687_v19 = vpop.permute.xlu0 %686 }
 0x627   :  { %v683_v11 = vmul.f32 %v681_v20, %v661_v22  ;;  %v684_v34 = vmul.f32 %v681_v20, %v662_v51  ;;  %v2497_v22 = vmov 86  }
 0x628   :  { %716 = vperm.xlu1 %2237, %v3104_v38  }
 0x62c   :  { %2238 = vset.pattern.permute.xlu1 %v2495_v17  ;;  %v2496_v17 = vmov 22  }
 0x68e   :  { %v670_v15 = vpop.permute.xlu1 %669  ;;  %v664_v14 = vpop.permute.xlu0 %663 }
 0x692   :  { %v672_v24 = vpop.permute.xlu1 %671 }
 0x693   :  { %v673_v26 = vsel %vm4039_vm3, %v670_v15, %v672_v24  ;;  %v674_v27 = vsel %vm4040_vm4, %v672_v24, %v670_v15  ;;  %vm4045_vm3 = vcmp.lt.s32.totalorder %v2587_v8, 120 }
 0x694   :  { %v675_v9 = vsub.f32 0.0, %v673_v26  ;;  %v676_v37 = vsub.f32 0.0, %v674_v27  ;;  %vm4046_vm4 = vmmov %vm4045_vm3 }
 0x696   :  { %v666_v4 = vpop.permute.xlu1 %665 }
 0x697   :  { %v667_v6 = vsel %vm4041_vm14, %v664_v14, %v666_v4  ;;  %v668_v29 = vsel %vm4042_vm1, %v666_v4, %v664_v14  ;;  %vm4047_vm14 = vcmp.lt.s32.totalorder %v2587_v8, 8 }
 0x698   :  { %v677_v30 = vsel %vm2661_vm11, %v668_v29, %v675_v9  ;;  %v678_v10 = vsel %vm2665_vm12, %v667_v6, %v676_v37  ;;  %vm4048_vm1 = vmmov %vm4047_vm14 }
 0x699   :  { %v690_v0 = vmul.f32 %v687_v19, %v678_v10  ;;  %v689_v23 = vmul.f32 %v687_v19, %v677_v30 }
 0x69b   :  { %v692_v50 = vadd.f32 %v690_v0, %v684_v34  ;;  %v691_v18 = vadd.f32 %v689_v23, %v683_v11 }
 0x69d   :  { %701 = vrot.lane.b32.xlu0 %v692_v50, %s2473_s13  ;;  %699 = vrot.lane.b32.xlu1 %v691_v18, %s2473_s13 }
 0x69f   :  { %v711_v20 = vpop.permute.xlu0 %710 }
 0x6a0   :  { %v713_v34 = vmul.f32 %v711_v20, %v691_v18 }
 0x6a1   :  { %695 = vrot.lane.b32.xlu0 %v692_v50, %s2472_s12  ;;  %693 = vrot.lane.b32.xlu1 %v691_v18, %s2472_s12  ;;  %v2499_v18 = vmov 23  }
 0x6a5   :  { %740 = vperm.xlu1 %2238, %v3104_v38   ;;  %746 = vperm.xlu0 %2239, %v3104_v38  }
 0x6a7   :  { %v717_v51 = vpop.permute.xlu1 %716 }
 0x6a9   :  { %2240 = vset.pattern.permute.xlu0 %v2496_v17  ;;  %2241 = vset.pattern.permute.xlu1 %v2497_v22  ;;  %v714_v22 = vmul.f32 %v711_v20, %v692_v50 }
 0x70f   :  { %v702_v15 = vpop.permute.xlu0 %701  ;;  %v700_v19 = vpop.permute.xlu1 %699 }
 0x710   :  { %v703_v24 = vsel %vm4045_vm3, %v700_v19, %v702_v15  ;;  %v704_v26 = vsel %vm4046_vm4, %v702_v15, %v700_v19  ;;  %v2498_v19 = vmov 87   ;;  %vm4051_vm3 = vcmp.lt.s32.totalorder %v2587_v8, 124 }
 0x711   :  { %v705_v27 = vsub.f32 0.0, %v703_v24  ;;  %v706_v14 = vsub.f32 0.0, %v704_v26  ;;  %vm4052_vm4 = vmmov %vm4051_vm3 }
 0x713   :  { %v696_v9 = vpop.permute.xlu0 %695  ;;  %v694_v37 = vpop.permute.xlu1 %693 }
 0x714   :  { %v697_v4 = vsel %vm4047_vm14, %v694_v37, %v696_v9  ;;  %v698_v6 = vsel %vm4048_vm1, %v696_v9, %v694_v37  ;;  %vm4053_vm14 = vcmp.lt.s32.totalorder %v2587_v8, 4 }
 0x715   :  { %v707_v30 = vsel %vm2691_vm15, %v698_v6, %v705_v27  ;;  %v708_v11 = vsel %vm2695_vm0, %v697_v4, %v706_v14  ;;  %vm4054_vm1 = vmmov %vm4053_vm14 }
 0x716   :  { %v719_v0 = vmul.f32 %v717_v51, %v707_v30  ;;  %v720_v17 = vmul.f32 %v717_v51, %v708_v11 }
 0x718   :  { %v721_v23 = vadd.f32 %v719_v0, %v713_v34  ;;  %v722_v15 = vadd.f32 %v720_v17, %v714_v22 }
 0x71a   :  { %723 = vrot.lane.b32.xlu0 %v721_v23, %s2477_s15  ;;  %729 = vrot.lane.b32.xlu1 %v721_v23, %s2476_s14 }
 0x71e   :  { %770 = vperm.xlu0 %2240, %v3104_v38   ;;  %731 = vrot.lane.b32.xlu1 %v722_v15, %s2476_s14 }
 0x722   :  { %725 = vrot.lane.b32.xlu1 %v722_v15, %s2477_s15  ;;  %2243 = vset.pattern.permute.xlu0 %v2498_v19 }
 0x724   :  { %v741_v24 = vpop.permute.xlu1 %740  ;;  %v747_v50 = vpop.permute.xlu0 %746 }
 0x725   :  { %v743_v22 = vmul.f32 %v741_v24, %v721_v23  ;;  %v744_v19 = vmul.f32 %v741_v24, %v722_v15 }
 0x726   :  { %776 = vperm.xlu1 %2241, %v3104_v38  }
 0x72a   :  { %2242 = vset.pattern.permute.xlu1 %v2499_v18 }
 0x78c   :  { %v730_v51 = vpop.permute.xlu1 %729  ;;  %v724_v14 = vpop.permute.xlu0 %723 }
 0x790   :  { %v732_v20 = vpop.permute.xlu1 %731 }
 0x791   :  { %v733_v26 = vsel %vm4051_vm3, %v730_v51, %v732_v20  ;;  %v734_v27 = vsel %vm4052_vm4, %v732_v20, %v730_v51  ;;  %vm4057_vm3 = vcmp.lt.s32.totalorder %v2587_v8, 126 }
 0x792   :  { %v735_v9 = vsub.f32 0.0, %v733_v26  ;;  %v736_v37 = vsub.f32 0.0, %v734_v27  ;;  %vm4058_vm4 = vmmov %vm4057_vm3 }
 0x794   :  { %v726_v4 = vpop.permute.xlu1 %725 }
 0x795   :  { %v727_v6 = vsel %vm4053_vm14, %v724_v14, %v726_v4  ;;  %v728_v30 = vsel %vm4054_vm1, %v726_v4, %v724_v14  ;;  %vm4059_vm14 = vcmp.lt.s32.totalorder %v2587_v8, 2 }
 0x796   :  { %v737_v34 = vsel %vm2721_vm13, %v728_v30, %v735_v9  ;;  %v738_v17 = vsel %vm2725_vm10, %v727_v6, %v736_v37  ;;  %vm4060_vm1 = vmmov %vm4059_vm14 }
 0x797   :  { %v750_v18 = vmul.f32 %v747_v50, %v738_v17  ;;  %v749_v51 = vmul.f32 %v747_v50, %v737_v34 }
 0x799   :  { %v752_v20 = vadd.f32 %v750_v18, %v744_v19  ;;  %v751_v26 = vadd.f32 %v749_v51, %v743_v22 }
 0x79b   :  { %761 = vrot.lane.b32.xlu0 %v752_v20, %s2481_s17  ;;  %759 = vrot.lane.b32.xlu1 %v751_v26, %s2481_s17 }
 0x79d   :  { %v771_v14 = vpop.permute.xlu0 %770 }
 0x79e   :  { %v773_v51 = vmul.f32 %v771_v14, %v751_v26 }
 0x79f   :  { %755 = vrot.lane.b32.xlu0 %v752_v20, %s2480_s16  ;;  %753 = vrot.lane.b32.xlu1 %v751_v26, %s2480_s16 }
 0x7a3   :  { %800 = vperm.xlu1 %2242, %v3104_v38   ;;  %806 = vperm.xlu0 %2243, %v3104_v38  }
 0x7a5   :  { %v777_v27 = vpop.permute.xlu1 %776 }
 0x80d   :  { %v762_v23 = vpop.permute.xlu0 %761  ;;  %v760_v15 = vpop.permute.xlu1 %759 }
 0x80e   :  { %v763_v24 = vsel %vm4057_vm3, %v760_v15, %v762_v23  ;;  %v764_v50 = vsel %vm4058_vm4, %v762_v23, %v760_v15  ;;  %v774_v15 = vmul.f32 %v771_v14, %v752_v20  ;;  %vm4063_vm3 = vcmp.lt.s32.totalorder %v2587_v8, 127 }
 0x80f   :  { %v765_v9 = vsub.f32 0.0, %v763_v24  ;;  %v766_v37 = vsub.f32 0.0, %v764_v50  ;;  %v2500_v50 = vmov 32   ;;  %vm4064_vm4 = vmmov %vm4063_vm3 }
 0x810   :  { %2244 = vset.pattern.permute.xlu0 %v2500_v50 }
 0x811   :  { %v756_v4 = vpop.permute.xlu0 %755  ;;  %v754_v6 = vpop.permute.xlu1 %753 }
 0x812   :  { %v757_v30 = vsel %vm4059_vm14, %v754_v6, %v756_v4  ;;  %v758_v34 = vsel %vm4060_vm1, %v756_v4, %v754_v6  ;;  %vm4065_vm14 = vcmp.lt.s32.totalorder %v2587_v8, 1 }
 0x813   :  { %v767_v22 = vsel %vm2946_vm9, %v758_v34, %v765_v9  ;;  %v768_v18 = vsel %vm2950_vm6, %v757_v30, %v766_v37  ;;  %v2501_v9 = vmov 96   ;;  %vm4066_vm1 = vmmov %vm4065_vm14 }
 0x814   :  { %v779_v0 = vmul.f32 %v777_v27, %v767_v22  ;;  %v780_v23 = vmul.f32 %v777_v27, %v768_v18  ;;  %2245 = vset.pattern.permute.xlu1 %v2501_v9 }
 0x816   :  { %v781_v11 = vadd.f32 %v779_v0, %v773_v51  ;;  %v782_v24 = vadd.f32 %v780_v23, %v774_v15  ;;  %v2502_v0 = vmov 33  }
 0x818   :  { %783 = vrot.lane.b32.xlu0 %v781_v11, %s2483_s28  ;;  %789 = vrot.lane.b32.xlu1 %v781_v11, %s3995_s27 }
 0x81c   :  { %791 = vrot.lane.b32.xlu1 %v782_v24, %s3995_s27  ;;  %908 = vperm.xlu0 %2244, %v3104_v38  }
 0x820   :  { %785 = vrot.lane.b32.xlu1 %v782_v24, %s2483_s28 }
 0x822   :  { %v801_v20 = vpop.permute.xlu1 %800  ;;  %v807_v27 = vpop.permute.xlu0 %806 }
 0x823   :  { %v803_v50 = vmul.f32 %v801_v20, %v781_v11  ;;  %v804_v9 = vmul.f32 %v801_v20, %v782_v24  ;;  %v2509_v11 = vmov 100  }
 0x824   :  { %914 = vperm.xlu1 %2245, %v3104_v38  }
 0x828   :  { %2246 = vset.pattern.permute.xlu1 %v2502_v0 }
 0x829   :  { %932 = vperm.xlu1 %2246, %v3104_v38  }
 0x88a   :  { %v790_v26 = vpop.permute.xlu1 %789  ;;  %v784_v6 = vpop.permute.xlu0 %783 }
 0x88e   :  { %v792_v14 = vpop.permute.xlu1 %791 }
 0x88f   :  { %v793_v37 = vsel %vm4063_vm3, %v790_v26, %v792_v14  ;;  %v794_v4 = vsel %vm4064_vm4, %v792_v14, %v790_v26  ;;  %vm4067_vm3 = vcmp.lt.s32.totalorder %v2587_v8, 64 }
 0x890   :  { %v795_v30 = vsub.f32 0.0, %v793_v37  ;;  %v796_v34 = vsub.f32 0.0, %v794_v4  ;;  %vm4068_vm4 = vmmov %vm4067_vm3 }
 0x892   :  { %v786_v22 = vpop.permute.xlu1 %785 }
 0x893   :  { %v787_v18 = vsel %vm4065_vm14, %v784_v6, %v786_v22  ;;  %v788_v51 = vsel %vm4066_vm1, %v786_v22, %v784_v6  ;;  %vm4069_vm14 = vnez %v3998_v32  ;;  %vm4070_vm1 = vnez %v4000_v33 }
 0x894   :  { %v797_v23 = vsel %vm3019_vm5, %v788_v51, %v795_v30  ;;  %v798_v15 = vsel %vm3023_vm2, %v787_v18, %v796_v34 }
 0x895   :  { %v809_v0 = vmul.f32 %v807_v27, %v797_v23  ;;  %v810_v26 = vmul.f32 %v807_v27, %v798_v15 }
 0x897   :  { %v812_v14 = vadd.f32 %v810_v26, %v804_v9  ;;  %v811_v37 = vadd.f32 %v809_v0, %v803_v50 }
 0x899   :  { %v814_v4 = vpack.c.bf16 %v812_v14, %v812_v14  ;;  %v813_v19 = vpack.c.bf16 %v811_v37, %v811_v37 }
 0x89b   :  { %v816_v17 = vunpack.c.l.bf16 %v814_v4  ;;  %v815_v10 = vunpack.c.l.bf16 %v813_v19 }
 0x89d   :  { %v818_v29 = vsub.f32 %v812_v14, %v816_v17  ;;  %v817_v36 = vsub.f32 %v811_v37, %v815_v10  ;;  %v2508_v10 = vmov 36  }
 0x89f   :  { %v820_v35 = vpack.c.bf16 %v818_v29, %v818_v29  ;;  %v819_v6 = vpack.c.bf16 %v817_v36, %v817_v36 }
 0x8a1   :  { %853 = vmatprep.mubr.bf16.mxu1 %v820_v35 }
 0x8a2   :  { %854 = vmatmul.mubr.bf16.vlgmr.msra.gmra.mrb[0].mxu1 %v819_v6 }
 0x8a3   :  { %863 = vmatpush1.bf16.msra.mxu1 %v2756_v39  ;;  %894 = vmatprep.mubr.bf16.mxu1 %v814_v4  ;;  %v2503_v39 = vmov 97  }
 0x8a4   :  { %864 = vmatprep.subr.bf16.mxu1 %v2764_v40  ;;  %2247 = vset.pattern.permute.xlu0 %v2503_v39  ;;  %v2504_v40 = vmov 34   ;;  %v2510_v39 = vmov 101  }
 0x8a5   :  { %938 = vperm.xlu0 %2247, %v3104_v38  }
 0x8a7   :  { %865 = vmatpush1.bf16.msra.mxu1 %v2770_v41  ;;  %v2505_v41 = vmov 98  }
 0x8a8   :  { %866 = vmatprep.subr.bf16.mxu1 %v2777_v42  ;;  %2249 = vset.pattern.permute.xlu1 %v2505_v41  ;;  %v915_v42 = vpop.permute.xlu1 %914 }
 0x8a9   :  { %2248 = vset.pattern.permute.xlu0 %v2504_v40  ;;  %v2511_v40 = vmov 37  }
 0x8aa   :  { %962 = vperm.xlu0 %2248, %v3104_v38  }
 0x8ab   :  { %867 = vmatpush1.bf16.msra.mxu1 %v2786_v43  ;;  %v909_v43 = vpop.permute.xlu0 %908 }
 0x8ac   :  { %868 = vmatprep.subr.bf16.mxu1 %v2792_v44 }
 0x8af   :  { %869 = vmatpush1.bf16.msra.mxu1 %v2800_v45 }
 0x8b0   :  { %870 = vmatprep.subr.bf16.mxu1 %v2806_v46 }
 0x8b3   :  { %871 = vmatpush1.bf16.msra.mxu1 %v2814_v47 }
 0x8b4   :  { %872 = vmatprep.subr.bf16.mxu1 %v2819_v48 }
 0x8b7   :  { %873 = vmatpush1.bf16.msra.mxu1 %v2828_v49 }
 0x8b8   :  { %874 = vmatprep.subr.bf16.mxu1 %v2834_v52 }
 0x8bb   :  { %875 = vmatpush1.bf16.msra.mxu1 %v2842_v53 }
 0x8bc   :  { %876 = vmatprep.subr.bf16.mxu1 %v2848_v54 }
 0x8bf   :  { %877 = vmatpush1.bf16.msra.mxu1 %v2856_v55 }
 0x8c0   :  { %878 = vmatprep.subr.bf16.mxu1 %v2862_v58 }
 0x8c3   :  { %879 = vmatpush1.bf16.msra.mxu1 %v2870_v59  ;;  %v2506_v59 = vmov 99  }
 0x8c4   :  { %880 = vmatprep.subr.bf16.mxu1 %v2876_v60  ;;  %2251 = vset.pattern.permute.xlu0 %v2506_v59  ;;  %v2507_v60 = vmov 35   ;;  %v2529_v59 = vmov 118  }
 0x8c7   :  { %881 = vmatpush1.bf16.msra.mxu1 %v2884_v61  ;;  %v933_v61 = vpop.permute.xlu1 %932 }
 0x8c8   :  { %882 = vmatprep.subr.bf16.mxu1 %v2890_v62 }
 0x8cb   :  { %883 = vmatpush1.bf16.msra.mxu1 %v2898_v63 }
 0x8cc   :  { %884 = vmatprep.subr.bf16.mxu1 %v2904_v2 }
 0x8cf   :  { %885 = vmatpush1.bf16.msra.mxu1 %v2912_v3 }
 0x8d0   :  { %886 = vmatprep.subr.bf16.mxu1 %v2923_v7 }
 0x8d3   :  { %887 = vmatpush1.bf16.msra.mxu1 %v2930_v12 }
 0x8d4   :  { %888 = vmatprep.subr.bf16.mxu1 %v2944_v16 }
 0x8d7   :  { %889 = vmatpush1.bf16.msra.mxu1 %v2957_v21 }
 0x8d8   :  { %890 = vmatprep.subr.bf16.mxu1 %v2963_v28 }
 0x8db   :  { %891 = vmatpush1.bf16.msra.mxu1 %v2974_v31 }
 0x8dc   :  { %892 = vmatprep.subr.bf16.mxu1 %v2985_v5 }
 0x8df   :  { %893 = vmatpush1.bf16.msra.mxu1 %v2994_v25 }
 0x8e2   :  { %895 = vmatmul.mubr.bf16.vlgmr.msra.gmra.mrb[0].mxu1 %v813_v19 }
 0x924   :  { %v939_v16 = vpop.permute.xlu0 %938 }
 0x929   :  { %v963_v19 = vpop.permute.xlu0 %962 }
 0x9b5   :  { %v896_v44 = vpop.f32.mrb[0].mxu1 }
 0x9b6   :  { %v918_v45 = vmul.f32 %v915_v42, %v896_v44  ;;  %v898_v46 = vpop.f32.mrb[1].mxu1  ;;  %v911_v53 = vmul.f32 %v909_v43, %v896_v44 }
 0x9b7   :  { %v903_v47 = vsub.f32 0.0, %v898_v46  ;;  %v912_v48 = vmul.f32 %v909_v43, %v898_v46  ;;  %v900_v49 = vpop.f32.mrb[2].mxu1 }
 0x9b8   :  { %v901_v52 = vpop.f32.mrb[3].mxu1 }
 0x9b9   :  { %v917_v54 = vmul.f32 %v915_v42, %v903_v47  ;;  %v920_v55 = vadd.f32 %v918_v45, %v912_v48 }
 0x9bb   :  { %v919_v58 = vadd.f32 %v917_v54, %v911_v53  ;;  %v936_v5 = vmul.f32 %v933_v61, %v920_v55 }
 0x9bd   :  { %921 = vrot.lane.b32.xlu1 %v919_v58, %s2461_s29  ;;  %v935_v31 = vmul.f32 %v933_v61, %v919_v58 }
 0x9c1   :  { %923 = vrot.lane.b32.xlu1 %v920_v55, %s2461_s29  ;;  %v2528_v55 = vmov 54  }
 0x9c5   :  { %968 = vperm.xlu1 %2249, %v3104_v38  }
 0x9c9   :  { %2250 = vset.pattern.permute.xlu1 %v2507_v60 }
 0xa2f   :  { %v922_v62 = vpop.permute.xlu1 %921 }
 0xa33   :  { %v924_v63 = vpop.permute.xlu1 %923 }
 0xa34   :  { %v925_v2 = vsel %vm4067_vm3, %v922_v62, %v924_v63  ;;  %v926_v3 = vsel %vm4068_vm4, %v924_v63, %v922_v62  ;;  %vm4071_vm3 = vcmp.lt.s32.totalorder %v2587_v8, 96 }
 0xa35   :  { %v927_v7 = vsub.f32 0.0, %v925_v2  ;;  %v928_v12 = vsub.f32 0.0, %v926_v3  ;;  %vm4072_vm4 = vmmov %vm4071_vm3 }
 0xa37   :  { %v929_v21 = vsel %vm4069_vm14, %v926_v3, %v927_v7  ;;  %v930_v28 = vsel %vm4070_vm1, %v925_v2, %v928_v12  ;;  %vm4073_vm1 = vcmp.lt.s32.totalorder %v2587_v8, 32  ;;  %v2512_v12 = vmov 38  }
 0xa38   :  { %v941_v25 = vmul.f32 %v939_v16, %v929_v21  ;;  %v942_v35 = vmul.f32 %v939_v16, %v930_v28  ;;  %vm4074_vm14 = vmmov %vm4073_vm1  ;;  %v2513_v16 = vmov 102  }
 0xa3a   :  { %v943_v36 = vadd.f32 %v941_v25, %v935_v31  ;;  %v944_v29 = vadd.f32 %v942_v35, %v936_v5 }
 0xa3c   :  { %953 = vrot.lane.b32.xlu0 %v944_v29, %s2465_s9  ;;  %951 = vrot.lane.b32.xlu1 %v943_v36, %s2465_s9  ;;  %v965_v0 = vmul.f32 %v963_v19, %v943_v36  ;;  %v966_v4 = vmul.f32 %v963_v19, %v944_v29 }
 0xa40   :  { %947 = vrot.lane.b32.xlu0 %v944_v29, %s2464_s30  ;;  %945 = vrot.lane.b32.xlu1 %v943_v36, %s2464_s30 }
 0xa44   :  { %992 = vperm.xlu1 %2250, %v3104_v38   ;;  %998 = vperm.xlu0 %2251, %v3104_v38   ;;  %v969_v17 = vpop.permute.xlu1 %968 }
 0xa48   :  { %2252 = vset.pattern.permute.xlu0 %v2508_v10  ;;  %2253 = vset.pattern.permute.xlu1 %v2509_v11 }
 0xaae   :  { %v954_v24 = vpop.permute.xlu0 %953  ;;  %v952_v20 = vpop.permute.xlu1 %951 }
 0xaaf   :  { %v955_v27 = vsel %vm4071_vm3, %v952_v20, %v954_v24  ;;  %v956_v30 = vsel %vm4072_vm4, %v954_v24, %v952_v20  ;;  %vm4077_vm3 = vcmp.lt.s32.totalorder %v2587_v8, 16  ;;  %v2530_v24 = vmov 119  }
 0xab0   :  { %v957_v34 = vsub.f32 0.0, %v955_v27  ;;  %v958_v22 = vsub.f32 0.0, %v956_v30  ;;  %vm4078_vm4 = vmmov %vm4077_vm3  ;;  %v2531_v27 = vmov 55  }
 0xab2   :  { %v948_v18 = vpop.permute.xlu0 %947  ;;  %v946_v51 = vpop.permute.xlu1 %945 }
 0xab3   :  { %v949_v23 = vsel %vm4073_vm1, %v946_v51, %v948_v18  ;;  %v950_v15 = vsel %vm4074_vm14, %v948_v18, %v946_v51  ;;  %vm4075_vm14 = vcmp.lt.s32.totalorder %v2587_v8, 112 }
 0xab4   :  { %v959_v50 = vsel %vm2631_vm7, %v950_v15, %v957_v34  ;;  %v960_v9 = vsel %vm2635_vm8, %v949_v23, %v958_v22  ;;  %vm4076_vm1 = vmmov %vm4075_vm14 }
 0xab5   :  { %v971_v26 = vmul.f32 %v969_v17, %v959_v50  ;;  %v972_v14 = vmul.f32 %v969_v17, %v960_v9  ;;  %v2514_v50 = vmov 103   ;;  %v2515_v9 = vmov 39  }
 0xab7   :  { %v973_v37 = vadd.f32 %v971_v26, %v965_v0  ;;  %v974_v6 = vadd.f32 %v972_v14, %v966_v4 }
 0xab9   :  { %975 = vrot.lane.b32.xlu0 %v973_v37, %s2469_s11  ;;  %981 = vrot.lane.b32.xlu1 %v973_v37, %s2468_s10 }
 0xabd   :  { %1022 = vperm.xlu0 %2252, %v3104_v38   ;;  %983 = vrot.lane.b32.xlu1 %v974_v6, %s2468_s10 }
 0xac1   :  { %977 = vrot.lane.b32.xlu1 %v974_v6, %s2469_s11  ;;  %2255 = vset.pattern.permute.xlu0 %v2510_v39 }
 0xac3   :  { %v993_v41 = vpop.permute.xlu1 %992  ;;  %v999_v43 = vpop.permute.xlu0 %998 }
 0xac4   :  { %v995_v61 = vmul.f32 %v993_v41, %v973_v37  ;;  %v996_v62 = vmul.f32 %v993_v41, %v974_v6 }
 0xac5   :  { %1028 = vperm.xlu1 %2253, %v3104_v38  }
 0xac9   :  { %2254 = vset.pattern.permute.xlu1 %v2511_v40 }
 0xb2b   :  { %v982_v42 = vpop.permute.xlu1 %981  ;;  %v976_v47 = vpop.permute.xlu0 %975 }
 0xb2f   :  { %v984_v44 = vpop.permute.xlu1 %983 }
 0xb30   :  { %v985_v45 = vsel %vm4075_vm14, %v982_v42, %v984_v44  ;;  %v986_v46 = vsel %vm4076_vm1, %v984_v44, %v982_v42  ;;  %vm4081_vm14 = vcmp.lt.s32.totalorder %v2587_v8, 120 }
 0xb31   :  { %v987_v48 = vsub.f32 0.0, %v985_v45  ;;  %v988_v49 = vsub.f32 0.0, %v986_v46  ;;  %vm4082_vm1 = vmmov %vm4081_vm14  ;;  %v3582_v45 = vld [vmem:[%s3954_s2] ss:$8 sps:$4 sm:$0xff]  }
 0xb33   :  { %v978_v52 = vpop.permute.xlu1 %977 }
 0xb34   :  { %v979_v53 = vsel %vm4077_vm3, %v976_v47, %v978_v52  ;;  %v980_v54 = vsel %vm4078_vm4, %v978_v52, %v976_v47  ;;  %vm4083_vm3 = vcmp.lt.s32.totalorder %v2587_v8, 8  ;;  %v3587_v47 = vld [vmem:[%s3954_s2 + $0x4] ss:$8 sps:$4 sm:$0xff]  }
 0xb35   :  { %v989_v58 = vsel %vm2661_vm11, %v980_v54, %v987_v48  ;;  %v990_v60 = vsel %vm2665_vm12, %v979_v53, %v988_v49  ;;  %vm4084_vm4 = vmmov %vm4083_vm3  ;;  %1669 = vmatprep.subr.bf16.mxu1 %v3587_v47 }
 0xb36   :  { %v1001_v63 = vmul.f32 %v999_v43, %v989_v58  ;;  %v1002_v2 = vmul.f32 %v999_v43, %v990_v60  ;;  %1670 = vmatpush1.bf16.msra.mxu1 %v3582_v45 }
 0xb38   :  { %v1003_v3 = vadd.f32 %v1001_v63, %v995_v61  ;;  %v1004_v7 = vadd.f32 %v1002_v2, %v996_v62 }
 0xb3a   :  { %1013 = vrot.lane.b32.xlu0 %v1004_v7, %s2473_s13  ;;  %1011 = vrot.lane.b32.xlu1 %v1003_v3, %s2473_s13 }
 0xb3c   :  { %v1023_v28 = vpop.permute.xlu0 %1022 }
 0xb3d   :  { %v1025_v34 = vmul.f32 %v1023_v28, %v1003_v3  ;;  %v1026_v23 = vmul.f32 %v1023_v28, %v1004_v7 }
 0xb3e   :  { %1007 = vrot.lane.b32.xlu0 %v1004_v7, %s2472_s12  ;;  %1005 = vrot.lane.b32.xlu1 %v1003_v3, %s2472_s12 }
 0xb42   :  { %1052 = vperm.xlu1 %2254, %v3104_v38   ;;  %1058 = vperm.xlu0 %2255, %v3104_v38  }
 0xb44   :  { %v1029_v21 = vpop.permute.xlu1 %1028 }
 0xb46   :  { %2256 = vset.pattern.permute.xlu0 %v2512_v12  ;;  %2257 = vset.pattern.permute.xlu1 %v2513_v16 }
 0xbac   :  { %v1014_v31 = vpop.permute.xlu0 %1013  ;;  %v1012_v5 = vpop.permute.xlu1 %1011 }
 0xbad   :  { %v1015_v25 = vsel %vm4081_vm14, %v1012_v5, %v1014_v31  ;;  %v1016_v35 = vsel %vm4082_vm1, %v1014_v31, %v1012_v5  ;;  %vm4087_vm14 = vcmp.lt.s32.totalorder %v2587_v8, 124 }
 0xbae   :  { %v1017_v36 = vsub.f32 0.0, %v1015_v25  ;;  %v1018_v29 = vsub.f32 0.0, %v1016_v35  ;;  %vm4088_vm1 = vmmov %vm4087_vm14 }
 0xbb0   :  { %v1008_v10 = vpop.permute.xlu0 %1007  ;;  %v1006_v11 = vpop.permute.xlu1 %1005 }
 0xbb1   :  { %v1009_v17 = vsel %vm4083_vm3, %v1006_v11, %v1008_v10  ;;  %v1010_v19 = vsel %vm4084_vm4, %v1008_v10, %v1006_v11  ;;  %vm4089_vm3 = vcmp.lt.s32.totalorder %v2587_v8, 4 }
 0xbb2   :  { %v1019_v20 = vsel %vm2691_vm15, %v1010_v19, %v1017_v36  ;;  %v1020_v30 = vsel %vm2695_vm0, %v1009_v17, %v1018_v29  ;;  %vm4090_vm4 = vmmov %vm4089_vm3  ;;  %v3764_v36 = vld [vmem:[%s3954_s2 + $0xe4] ss:$8 sps:$4 sm:$0xff]  }
 0xbb3   :  { %v1031_v22 = vmul.f32 %v1029_v21, %v1019_v20  ;;  %v1032_v18 = vmul.f32 %v1029_v21, %v1020_v30 }
 0xbb5   :  { %v1033_v51 = vadd.f32 %v1031_v22, %v1025_v34  ;;  %v1034_v15 = vadd.f32 %v1032_v18, %v1026_v23  ;;  %v2516_v34 = vmov 48   ;;  %v2517_v22 = vmov 112  }
 0xbb6   :  { %v2518_v18 = vmov 49  }
 0xbb7   :  { %1035 = vrot.lane.b32.xlu0 %v1033_v51, %s2477_s15  ;;  %1041 = vrot.lane.b32.xlu1 %v1033_v51, %s2476_s14 }
 0xbbb   :  { %1082 = vperm.xlu0 %2256, %v3104_v38   ;;  %1043 = vrot.lane.b32.xlu1 %v1034_v15, %s2476_s14 }
 0xbbf   :  { %1037 = vrot.lane.b32.xlu1 %v1034_v15, %s2477_s15  ;;  %2259 = vset.pattern.permute.xlu0 %v2514_v50 }
 0xbc1   :  { %v1053_v0 = vpop.permute.xlu1 %1052  ;;  %v1059_v14 = vpop.permute.xlu0 %1058 }
 0xbc2   :  { %v1055_v49 = vmul.f32 %v1053_v0, %v1033_v51  ;;  %v1056_v52 = vmul.f32 %v1053_v0, %v1034_v15 }
 0xbc3   :  { %1088 = vperm.xlu1 %2257, %v3104_v38  }
 0xbc7   :  { %2258 = vset.pattern.permute.xlu1 %v2515_v9 }
 0xc29   :  { %v1042_v26 = vpop.permute.xlu1 %1041  ;;  %v1036_v39 = vpop.permute.xlu0 %1035 }
 0xc2d   :  { %v1044_v37 = vpop.permute.xlu1 %1043 }
 0xc2e   :  { %v1045_v4 = vsel %vm4087_vm14, %v1042_v26, %v1044_v37  ;;  %v1046_v6 = vsel %vm4088_vm1, %v1044_v37, %v1042_v26  ;;  %vm4093_vm14 = vcmp.lt.s32.totalorder %v2587_v8, 126 }
 0xc2f   :  { %v1047_v40 = vsub.f32 0.0, %v1045_v4  ;;  %v1048_v41 = vsub.f32 0.0, %v1046_v6  ;;  %vm4094_vm1 = vmmov %vm4093_vm14 }
 0xc31   :  { %v1038_v42 = vpop.permute.xlu1 %1037 }
 0xc32   :  { %v1039_v43 = vsel %vm4089_vm3, %v1036_v39, %v1038_v42  ;;  %v1040_v44 = vsel %vm4090_vm4, %v1038_v42, %v1036_v39  ;;  %vm4095_vm3 = vcmp.lt.s32.totalorder %v2587_v8, 2 }
 0xc33   :  { %v1049_v46 = vsel %vm2721_vm13, %v1040_v44, %v1047_v40  ;;  %v1050_v48 = vsel %vm2725_vm10, %v1039_v43, %v1048_v41  ;;  %vm4096_vm4 = vmmov %vm4095_vm3 }
 0xc34   :  { %v1061_v53 = vmul.f32 %v1059_v14, %v1049_v46  ;;  %v1062_v54 = vmul.f32 %v1059_v14, %v1050_v48 }
 0xc36   :  { %v1063_v58 = vadd.f32 %v1061_v53, %v1055_v49  ;;  %v1064_v60 = vadd.f32 %v1062_v54, %v1056_v52 }
 0xc38   :  { %1073 = vrot.lane.b32.xlu0 %v1064_v60, %s2481_s17  ;;  %1071 = vrot.lane.b32.xlu1 %v1063_v58, %s2481_s17 }
 0xc3a   :  { %v1083_v62 = vpop.permute.xlu0 %1082 }
 0xc3b   :  { %v1085_v10 = vmul.f32 %v1083_v62, %v1063_v58  ;;  %v1086_v20 = vmul.f32 %v1083_v62, %v1064_v60 }
 0xc3c   :  { %1067 = vrot.lane.b32.xlu0 %v1064_v60, %s2480_s16  ;;  %1065 = vrot.lane.b32.xlu1 %v1063_v58, %s2480_s16 }
 0xc40   :  { %1112 = vperm.xlu1 %2258, %v3104_v38   ;;  %1118 = vperm.xlu0 %2259, %v3104_v38  }
 0xc42   :  { %v1089_v61 = vpop.permute.xlu1 %1088 }
 0xc44   :  { %2260 = vset.pattern.permute.xlu0 %v2516_v34  ;;  %2261 = vset.pattern.permute.xlu1 %v2517_v22  ;;  %v2440_v34 = vld [vmem:[%s3953_s1 + $0x90] ss:$8 sps:$4 sm:$0xff]   ;;  %v2441_v22 = vld [vmem:[%s3953_s1 + $0xa4] ss:$8 sps:$4 sm:$0xff]  }
 0xcaa   :  { %v1074_v63 = vpop.permute.xlu0 %1073  ;;  %v1072_v2 = vpop.permute.xlu1 %1071 }
 0xcab   :  { %v1075_v3 = vsel %vm4093_vm14, %v1072_v2, %v1074_v63  ;;  %v1076_v7 = vsel %vm4094_vm1, %v1074_v63, %v1072_v2  ;;  %vm4099_vm14 = vcmp.lt.s32.totalorder %v2587_v8, 127  ;;  %v2422_v63 = vld [vmem:[%s3953_s1] ss:$8 sps:$4 sm:$0xff]   ;;  %v2423_v2 = vld [vmem:[%s3953_s1 + $0x14] ss:$8 sps:$4 sm:$0xff]  }
 0xcac   :  { %v1077_v12 = vsub.f32 0.0, %v1075_v3  ;;  %v1078_v16 = vsub.f32 0.0, %v1076_v7  ;;  %vm4100_vm1 = vmmov %vm4099_vm14  ;;  %v2424_v3 = vld [vmem:[%s3953_s1 + $0x10] ss:$8 sps:$4 sm:$0xff]   ;;  %v2425_v7 = vld [vmem:[%s3953_s1 + $0x24] ss:$8 sps:$4 sm:$0xff]  }
 0xcae   :  { %v1068_v21 = vpop.permute.xlu0 %1067  ;;  %v1066_v28 = vpop.permute.xlu1 %1065 }
 0xcaf   :  { %v1069_v31 = vsel %vm4095_vm3, %v1066_v28, %v1068_v21  ;;  %v1070_v5 = vsel %vm4096_vm4, %v1068_v21, %v1066_v28  ;;  %vm4101_vm3 = vcmp.lt.s32.totalorder %v2587_v8, 1  ;;  %v2428_v21 = vld [vmem:[%s3953_s1 + $0x30] ss:$8 sps:$4 sm:$0xff]   ;;  %v2429_v28 = vld [vmem:[%s3953_s1 + $0x44] ss:$8 sps:$4 sm:$0xff]  }
 0xcb0   :  { %v1079_v35 = vsel %vm2946_vm9, %v1070_v5, %v1077_v12  ;;  %v1080_v29 = vsel %vm2950_vm6, %v1069_v31, %v1078_v16  ;;  %vm4102_vm4 = vmmov %vm4101_vm3  ;;  %v2426_v12 = vld [vmem:[%s3953_s1 + $0x20] ss:$8 sps:$4 sm:$0xff]   ;;  %v2427_v16 = vld [vmem:[%s3953_s1 + $0x34] ss:$8 sps:$4 sm:$0xff]  }
 0xcb1   :  { %v1091_v11 = vmul.f32 %v1089_v61, %v1079_v35  ;;  %v1092_v17 = vmul.f32 %v1089_v61, %v1080_v29  ;;  %v2430_v31 = vld [vmem:[%s3953_s1 + $0x40] ss:$8 sps:$4 sm:$0xff]   ;;  %v2431_v5 = vld [vmem:[%s3953_s1 + $0x54] ss:$8 sps:$4 sm:$0xff]   ;;  %v2432_v35 = vld [vmem:[%s3953_s1 + $0x50] ss:$8 sps:$4 sm:$0xff]  }
 0xcb2   :  { %v2433_v29 = vld [vmem:[%s3953_s1 + $0x64] ss:$8 sps:$4 sm:$0xff]  }
 0xcb3   :  { %v1093_v19 = vadd.f32 %v1091_v11, %v1085_v10  ;;  %v1094_v30 = vadd.f32 %v1092_v17, %v1086_v20  ;;  %v2434_v10 = vld [vmem:[%s3953_s1 + $0x60] ss:$8 sps:$4 sm:$0xff]   ;;  %v2435_v11 = vld [vmem:[%s3953_s1 + $0x74] ss:$8 sps:$4 sm:$0xff]   ;;  %v2436_v17 = vld [vmem:[%s3953_s1 + $0x70] ss:$8 sps:$4 sm:$0xff]  }
 0xcb4   :  { %v2438_v20 = vld [vmem:[%s3953_s1 + $0x80] ss:$8 sps:$4 sm:$0xff]  }
 0xcb5   :  { %1095 = vrot.lane.b32.xlu0 %v1093_v19, %s2483_s28  ;;  %1101 = vrot.lane.b32.xlu1 %v1093_v19, %s3995_s27 }
 0xcb9   :  { %1103 = vrot.lane.b32.xlu1 %v1094_v30, %s3995_s27  ;;  %1220 = vperm.xlu0 %2260, %v3104_v38  }
 0xcbd   :  { %1097 = vrot.lane.b32.xlu1 %v1094_v30, %s2483_s28 }
 0xcbf   :  { %v1113_v51 = vpop.permute.xlu1 %1112  ;;  %v1119_v15 = vpop.permute.xlu0 %1118 }
 0xcc0   :  { %v1115_v41 = vmul.f32 %v1113_v51, %v1093_v19  ;;  %v1116_v42 = vmul.f32 %v1113_v51, %v1094_v30  ;;  %v2437_v19 = vld [vmem:[%s3953_s1 + $0x84] ss:$8 sps:$4 sm:$0xff]   ;;  %v2439_v30 = vld [vmem:[%s3953_s1 + $0x94] ss:$8 sps:$4 sm:$0xff]  }
 0xcc1   :  { %1226 = vperm.xlu1 %2261, %v3104_v38   ;;  %v2443_v51 = vld [vmem:[%s3953_s1 + $0xb4] ss:$8 sps:$4 sm:$0xff]  }
 0xcc5   :  { %2262 = vset.pattern.permute.xlu1 %v2518_v18  ;;  %v2442_v18 = vld [vmem:[%s3953_s1 + $0xa0] ss:$8 sps:$4 sm:$0xff]  }
 0xcc6   :  { %1244 = vperm.xlu1 %2262, %v3104_v38  }
 0xd27   :  { %v1102_v23 = vpop.permute.xlu1 %1101  ;;  %v1096_v26 = vpop.permute.xlu0 %1095 }
 0xd2b   :  { %v1104_v50 = vpop.permute.xlu1 %1103 }
 0xd2c   :  { %v1105_v9 = vsel %vm4099_vm14, %v1102_v23, %v1104_v50  ;;  %v1106_v0 = vsel %vm4100_vm1, %v1104_v50, %v1102_v23  ;;  %v2444_v23 = vld [vmem:[%s3953_s1 + $0xb0] ss:$8 sps:$4 sm:$0xff]   ;;  %v2446_v50 = vld [vmem:[%s3953_s1 + $0xc0] ss:$8 sps:$4 sm:$0xff]   ;;  %vm4103_vm14 = vcmp.lt.s32.totalorder %v2587_v8, 64 }
 0xd2d   :  { %v1107_v14 = vsub.f32 0.0, %v1105_v9  ;;  %v1108_v37 = vsub.f32 0.0, %v1106_v0  ;;  %v2447_v9 = vld [vmem:[%s3953_s1 + $0xd4] ss:$8 sps:$4 sm:$0xff]   ;;  %v2448_v0 = vld [vmem:[%s3953_s1 + $0xd0] ss:$8 sps:$4 sm:$0xff]   ;;  %vm4104_vm1 = vmmov %vm4103_vm14 }
 0xd2f   :  { %v1098_v4 = vpop.permute.xlu1 %1097 }
 0xd30   :  { %v1099_v6 = vsel %vm4101_vm3, %v1096_v26, %v1098_v4  ;;  %v1100_v38 = vsel %vm4102_vm4, %v1098_v4, %v1096_v26  ;;  %v2449_v26 = vld [vmem:[%s3953_s1 + $0xe4] ss:$8 sps:$4 sm:$0xff]   ;;  %v2452_v4 = vld [vmem:[%s3953_s1 + $0xf0] ss:$8 sps:$4 sm:$0xff]   ;;  %vm4105_vm3 = vnez %v3998_v32  ;;  %vm4106_vm4 = vnez %v4000_v33 }
 0xd31   :  { %v1109_v39 = vsel %vm3019_vm5, %v1100_v38, %v1107_v14  ;;  %v1110_v40 = vsel %vm3023_vm2, %v1099_v6, %v1108_v37  ;;  %v2450_v14 = vld [vmem:[%s3953_s1 + $0xe0] ss:$8 sps:$4 sm:$0xff]   ;;  %v2451_v37 = vld [vmem:[%s3953_s1 + $0xf4] ss:$8 sps:$4 sm:$0xff]   ;;  %v2519_v6 = vmov 113   ;;  %v2524_v32 = vmov 52  }
 0xd32   :  { %v1121_v43 = vmul.f32 %v1119_v15, %v1109_v39  ;;  %v1122_v44 = vmul.f32 %v1119_v15, %v1110_v40  ;;  %v2445_v15 = vld [vmem:[%s3953_s1 + $0xc4] ss:$8 sps:$4 sm:$0xff]   ;;  %2263 = vset.pattern.permute.xlu0 %v2519_v6  ;;  %v2520_v39 = vmov 50   ;;  %v2521_v40 = vmov 114  }
 0xd33   :  { %v3478_v38 = vld [vmem:[%s3952_s0] sm:$0xff]  ;;  %2265 = vset.pattern.permute.xlu1 %v2521_v40  ;;  %v2525_v33 = vmov 116  }
 0xd34   :  { %v1123_v46 = vadd.f32 %v1121_v43, %v1115_v41  ;;  %v1124_v48 = vadd.f32 %v1122_v44, %v1116_v42  ;;  %1250 = vperm.xlu0 %2263, %v3478_v38  }
 0xd36   :  { %v3378_v49 = vpack.c.bf16 %v1123_v46, %v1123_v46  ;;  %v1126_v52 = vpack.c.bf16 %v1124_v48, %v1124_v48 }
 0xd38   :  { %v1128_v53 = vunpack.c.l.bf16 %v1126_v52  ;;  %v1127_v54 = vunpack.c.l.bf16 %v3378_v49  ;;  %2264 = vset.pattern.permute.xlu0 %v2520_v39  ;;  %v1221_v42 = vpop.permute.xlu0 %1220 }
 0xd39   :  { %1274 = vperm.xlu0 %2264, %v3478_v38  }
 0xd3a   :  { %v1130_v58 = vsub.f32 %v1124_v48, %v1128_v53  ;;  %v1129_v60 = vsub.f32 %v1123_v46, %v1127_v54 }
 0xd3c   :  { %v1132_v61 = vpack.c.bf16 %v1130_v58, %v1130_v58  ;;  %v1131_v62 = vpack.c.bf16 %v1129_v60, %v1129_v60 }
 0xd3e   :  { %1165 = vmatprep.mubr.bf16.mxu0 %v1132_v61 }
 0xd3f   :  { %1166 = vmatmul.mubr.bf16.vlgmr.msra.gmra.mrb[4].mxu0 %v1131_v62  ;;  %v2522_v62 = vmov 115  }
 0xd40   :  { %1175 = vmatpush1.bf16.msra.mxu0 %v2422_v63  ;;  %1206 = vmatprep.mubr.bf16.mxu0 %v1126_v52  ;;  %v1227_v41 = vpop.permute.xlu1 %1226  ;;  %v2523_v63 = vmov 51  }
 0xd41   :  { %1176 = vmatprep.subr.bf16.mxu0 %v2423_v2  ;;  %2267 = vset.pattern.permute.xlu0 %v2522_v62 }
 0xd44   :  { %1177 = vmatpush1.bf16.msra.mxu0 %v2424_v3 }
 0xd45   :  { %1178 = vmatprep.subr.bf16.mxu0 %v2425_v7  ;;  %v1245_v2 = vpop.permute.xlu1 %1244 }
 0xd48   :  { %1179 = vmatpush1.bf16.msra.mxu0 %v2426_v12 }
 0xd49   :  { %1180 = vmatprep.subr.bf16.mxu0 %v2427_v16 }
 0xd4c   :  { %1181 = vmatpush1.bf16.msra.mxu0 %v2428_v21 }
 0xd4d   :  { %1182 = vmatprep.subr.bf16.mxu0 %v2429_v28 }
 0xd50   :  { %1183 = vmatpush1.bf16.msra.mxu0 %v2430_v31 }
 0xd51   :  { %1184 = vmatprep.subr.bf16.mxu0 %v2431_v5 }
 0xd54   :  { %1185 = vmatpush1.bf16.msra.mxu0 %v2432_v35 }
 0xd55   :  { %1186 = vmatprep.subr.bf16.mxu0 %v2433_v29 }
 0xd58   :  { %1187 = vmatpush1.bf16.msra.mxu0 %v2434_v10 }
 0xd59   :  { %1188 = vmatprep.subr.bf16.mxu0 %v2435_v11 }
 0xd5c   :  { %1189 = vmatpush1.bf16.msra.mxu0 %v2436_v17 }
 0xd5d   :  { %1190 = vmatprep.subr.bf16.mxu0 %v2437_v19 }
 0xd60   :  { %1191 = vmatpush1.bf16.msra.mxu0 %v2438_v20 }
 0xd61   :  { %1192 = vmatprep.subr.bf16.mxu0 %v2439_v30 }
 0xd64   :  { %1193 = vmatpush1.bf16.msra.mxu0 %v2440_v34 }
 0xd65   :  { %1194 = vmatprep.subr.bf16.mxu0 %v2441_v22 }
 0xd68   :  { %1195 = vmatpush1.bf16.msra.mxu0 %v2442_v18 }
 0xd69   :  { %1196 = vmatprep.subr.bf16.mxu0 %v2443_v51 }
 0xd6c   :  { %1197 = vmatpush1.bf16.msra.mxu0 %v2444_v23 }
 0xd6d   :  { %1198 = vmatprep.subr.bf16.mxu0 %v2445_v15 }
 0xd70   :  { %1199 = vmatpush1.bf16.msra.mxu0 %v2446_v50 }
 0xd71   :  { %1200 = vmatprep.subr.bf16.mxu0 %v2447_v9 }
 0xd74   :  { %1201 = vmatpush1.bf16.msra.mxu0 %v2448_v0 }
 0xd75   :  { %1202 = vmatprep.subr.bf16.mxu0 %v2449_v26 }
 0xd78   :  { %1203 = vmatpush1.bf16.msra.mxu0 %v2450_v14 }
 0xd79   :  { %1204 = vmatprep.subr.bf16.mxu0 %v2451_v37 }
 0xd7c   :  { %1205 = vmatpush1.bf16.msra.mxu0 %v2452_v4 }
 0xd7f   :  { %1207 = vmatmul.mubr.bf16.vlgmr.msra.gmra.mrb[4].mxu0 %v3378_v49 }
 0xdb3   :  { %v1251_v31 = vpop.permute.xlu0 %1250 }
 0xdb8   :  { %v1275_v34 = vpop.permute.xlu0 %1274 }
 0xe52   :  { %v1208_v43 = vpop.f32.mrb[4].mxu0 }
 0xe53   :  { %v1230_v44 = vmul.f32 %v1227_v41, %v1208_v43  ;;  %v1210_v46 = vpop.f32.mrb[5].mxu0  ;;  %v1223_v54 = vmul.f32 %v1221_v42, %v1208_v43 }
 0xe54   :  { %v1215_v48 = vsub.f32 0.0, %v1210_v46  ;;  %v1224_v49 = vmul.f32 %v1221_v42, %v1210_v46  ;;  %v1212_v52 = vpop.f32.mrb[6].mxu0 }
 0xe55   :  { %v1213_v53 = vpop.f32.mrb[7].mxu0 }
 0xe56   :  { %v1229_v58 = vmul.f32 %v1227_v41, %v1215_v48  ;;  %v1232_v60 = vadd.f32 %v1230_v44, %v1224_v49 }
 0xe58   :  { %v1231_v61 = vadd.f32 %v1229_v58, %v1223_v54  ;;  %v1248_v10 = vmul.f32 %v1245_v2, %v1232_v60 }
 0xe5a   :  { %1233 = vrot.lane.b32.xlu1 %v1231_v61, %s2461_s29  ;;  %v1247_v29 = vmul.f32 %v1245_v2, %v1231_v61 }
 0xe5e   :  { %1235 = vrot.lane.b32.xlu1 %v1232_v60, %s2461_s29 }
 0xe62   :  { %1280 = vperm.xlu1 %2265, %v3478_v38  }
 0xe66   :  { %2266 = vset.pattern.permute.xlu1 %v2523_v63 }
 0xecc   :  { %v1234_v3 = vpop.permute.xlu1 %1233 }
 0xed0   :  { %v1236_v7 = vpop.permute.xlu1 %1235 }
 0xed1   :  { %v1237_v12 = vsel %vm4103_vm14, %v1234_v3, %v1236_v7  ;;  %v1238_v16 = vsel %vm4104_vm1, %v1236_v7, %v1234_v3  ;;  %vm4107_vm14 = vcmp.lt.s32.totalorder %v2587_v8, 96 }
 0xed2   :  { %v1239_v21 = vsub.f32 0.0, %v1237_v12  ;;  %v1240_v28 = vsub.f32 0.0, %v1238_v16  ;;  %vm4108_vm1 = vmmov %vm4107_vm14 }
 0xed4   :  { %v1241_v5 = vsel %vm4105_vm3, %v1238_v16, %v1239_v21  ;;  %v1242_v35 = vsel %vm4106_vm4, %v1237_v12, %v1240_v28  ;;  %vm4109_vm3 = vcmp.lt.s32.totalorder %v2587_v8, 32 }
 0xed5   :  { %v1253_v11 = vmul.f32 %v1251_v31, %v1241_v5  ;;  %v1254_v17 = vmul.f32 %v1251_v31, %v1242_v35  ;;  %vm4110_vm4 = vmmov %vm4109_vm3 }
 0xed7   :  { %v1255_v19 = vadd.f32 %v1253_v11, %v1247_v29  ;;  %v1256_v20 = vadd.f32 %v1254_v17, %v1248_v10 }
 0xed9   :  { %1265 = vrot.lane.b32.xlu0 %v1256_v20, %s2465_s9  ;;  %1263 = vrot.lane.b32.xlu1 %v1255_v19, %s2465_s9  ;;  %v1277_v6 = vmul.f32 %v1275_v34, %v1255_v19  ;;  %v1278_v42 = vmul.f32 %v1275_v34, %v1256_v20 }
 0xedd   :  { %1259 = vrot.lane.b32.xlu0 %v1256_v20, %s2464_s30  ;;  %1257 = vrot.lane.b32.xlu1 %v1255_v19, %s2464_s30 }
 0xee1   :  { %1304 = vperm.xlu1 %2266, %v3478_v38   ;;  %1310 = vperm.xlu0 %2267, %v3478_v38   ;;  %v1281_v30 = vpop.permute.xlu1 %1280 }
 0xee5   :  { %2268 = vset.pattern.permute.xlu0 %v2524_v32  ;;  %2269 = vset.pattern.permute.xlu1 %v2525_v33 }
 0xf4b   :  { %v1266_v22 = vpop.permute.xlu0 %1265  ;;  %v1264_v18 = vpop.permute.xlu1 %1263 }
 0xf4c   :  { %v1267_v51 = vsel %vm4107_vm14, %v1264_v18, %v1266_v22  ;;  %v1268_v23 = vsel %vm4108_vm1, %v1266_v22, %v1264_v18  ;;  %vm4113_vm14 = vcmp.lt.s32.totalorder %v2587_v8, 16 }
 0xf4d   :  { %v1269_v15 = vsub.f32 0.0, %v1267_v51  ;;  %v1270_v50 = vsub.f32 0.0, %v1268_v23  ;;  %vm4114_vm1 = vmmov %vm4113_vm14 }
 0xf4f   :  { %v1260_v9 = vpop.permute.xlu0 %1259  ;;  %v1258_v0 = vpop.permute.xlu1 %1257 }
 0xf50   :  { %v1261_v26 = vsel %vm4109_vm3, %v1258_v0, %v1260_v9  ;;  %v1262_v14 = vsel %vm4110_vm4, %v1260_v9, %v1258_v0  ;;  %vm4117_vm3 = vcmp.lt.s32.totalorder %v2587_v8, 8 }
 0xf51   :  { %v1271_v37 = vsel %vm2631_vm7, %v1262_v14, %v1269_v15  ;;  %v1272_v4 = vsel %vm2635_vm8, %v1261_v26, %v1270_v50  ;;  %vm4111_vm7 = vcmp.lt.s32.totalorder %v2587_v8, 112  ;;  %vm4118_vm4 = vmmov %vm4117_vm3 }
 0xf52   :  { %v1283_v39 = vmul.f32 %v1281_v30, %v1271_v37  ;;  %v1284_v40 = vmul.f32 %v1281_v30, %v1272_v4  ;;  %vm4112_vm8 = vmmov %vm4111_vm7 }
 0xf54   :  { %v1285_v41 = vadd.f32 %v1283_v39, %v1277_v6  ;;  %v1286_v43 = vadd.f32 %v1284_v40, %v1278_v42 }
 0xf56   :  { %1287 = vrot.lane.b32.xlu0 %v1285_v41, %s2469_s11  ;;  %1293 = vrot.lane.b32.xlu1 %v1285_v41, %s2468_s10 }
 0xf5a   :  { %1334 = vperm.xlu0 %2268, %v3478_v38   ;;  %1295 = vrot.lane.b32.xlu1 %v1286_v43, %s2468_s10 }
 0xf5e   :  { %1289 = vrot.lane.b32.xlu1 %v1286_v43, %s2469_s11  ;;  %2271 = vset.pattern.permute.xlu0 %v2526_v56 }
 0xf60   :  { %v1305_v44 = vpop.permute.xlu1 %1304  ;;  %v1311_v48 = vpop.permute.xlu0 %1310 }
 0xf61   :  { %v1307_v7 = vmul.f32 %v1305_v44, %v1285_v41  ;;  %v1308_v12 = vmul.f32 %v1305_v44, %v1286_v43 }
 0xf62   :  { %1340 = vperm.xlu1 %2269, %v3478_v38  }
 0xf66   :  { %2270 = vset.pattern.permute.xlu1 %v2527_v57 }
 0xfc8   :  { %v1294_v46 = vpop.permute.xlu1 %1293  ;;  %v1288_v54 = vpop.permute.xlu0 %1287 }
 0xfcc   :  { %v1296_v49 = vpop.permute.xlu1 %1295 }
 0xfcd   :  { %v1297_v52 = vsel %vm4111_vm7, %v1294_v46, %v1296_v49  ;;  %v1298_v53 = vsel %vm4112_vm8, %v1296_v49, %v1294_v46  ;;  %vm4121_vm7 = vcmp.lt.s32.totalorder %v2587_v8, 4 }
 0xfce   :  { %v1299_v58 = vsub.f32 0.0, %v1297_v52  ;;  %v1300_v60 = vsub.f32 0.0, %v1298_v53  ;;  %vm4122_vm8 = vmmov %vm4121_vm7 }
 0xfd0   :  { %v1290_v61 = vpop.permute.xlu1 %1289 }
 0xfd1   :  { %v1291_v62 = vsel %vm4113_vm14, %v1288_v54, %v1290_v61  ;;  %v1292_v63 = vsel %vm4114_vm1, %v1290_v61, %v1288_v54  ;;  %v4123_v61 = vmov 0   ;;  %vm4126_vm14 = vcmp.lt.s32.totalorder %v2587_v8, 2 }
 0xfd2   :  { %v1301_v2 = vsel %vm2661_vm11, %v1292_v63, %v1299_v58  ;;  %v1302_v3 = vsel %vm2665_vm12, %v1291_v62, %v1300_v60  ;;  %vm4115_vm11 = vcmp.lt.s32.totalorder %v2587_v8, 120  ;;  %v3592_v60 = vld [vmem:[%s3954_s2 + $0x14] ss:$8 sps:$4 sm:$0xff]   ;;  %v3606_v62 = vld [vmem:[%s3954_s2 + $0x24] ss:$8 sps:$4 sm:$0xff]   ;;  %vm4127_vm1 = vmmov %vm4126_vm14 }
 0xfd3   :  { %v1313_v16 = vmul.f32 %v1311_v48, %v1301_v2  ;;  %v1314_v21 = vmul.f32 %v1311_v48, %v1302_v3  ;;  %vm4116_vm12 = vmmov %vm4115_vm11  ;;  %1671 = vmatprep.subr.bf16.mxu1 %v3592_v60  ;;  %v3612_v63 = vld [vmem:[%s3954_s2 + $0x20] ss:$8 sps:$4 sm:$0xff]   ;;  %v3618_v2 = vld [vmem:[%s3954_s2 + $0x34] ss:$8 sps:$4 sm:$0xff]  }
 0xfd4   :  { %v3624_v3 = vld [vmem:[%s3954_s2 + $0x30] ss:$8 sps:$4 sm:$0xff]  }
 0xfd5   :  { %v1315_v28 = vadd.f32 %v1313_v16, %v1307_v7  ;;  %v1316_v31 = vadd.f32 %v1314_v21, %v1308_v12  ;;  %v3630_v7 = vld [vmem:[%s3954_s2 + $0x44] ss:$8 sps:$4 sm:$0xff]   ;;  %v3635_v12 = vld [vmem:[%s3954_s2 + $0x40] ss:$8 sps:$4 sm:$0xff]   ;;  %v3640_v16 = vld [vmem:[%s3954_s2 + $0x54] ss:$8 sps:$4 sm:$0xff]  }
 0xfd6   :  { %v3648_v21 = vld [vmem:[%s3954_s2 + $0x50] ss:$8 sps:$4 sm:$0xff]  }
 0xfd7   :  { %1325 = vrot.lane.b32.xlu0 %v1316_v31, %s2473_s13  ;;  %1323 = vrot.lane.b32.xlu1 %v1315_v28, %s2473_s13 }
 0xfd9   :  { %v1335_v35 = vpop.permute.xlu0 %1334 }
 0xfda   :  { %v1337_v51 = vmul.f32 %v1335_v35, %v1315_v28  ;;  %v1338_v9 = vmul.f32 %v1335_v35, %v1316_v31  ;;  %v3684_v35 = vld [vmem:[%s3954_s2 + $0x80] ss:$8 sps:$4 sm:$0xff]  }
 0xfdb   :  { %1319 = vrot.lane.b32.xlu0 %v1316_v31, %s2472_s12  ;;  %1317 = vrot.lane.b32.xlu1 %v1315_v28, %s2472_s12  ;;  %v3654_v28 = vld [vmem:[%s3954_s2 + $0x64] ss:$8 sps:$4 sm:$0xff]   ;;  %v3660_v31 = vld [vmem:[%s3954_s2 + $0x60] ss:$8 sps:$4 sm:$0xff]  }
 0xfdf   :  { %1364 = vperm.xlu1 %2270, %v3478_v38   ;;  %1370 = vperm.xlu0 %2271, %v3478_v38  }
 0xfe1   :  { %v1341_v5 = vpop.permute.xlu1 %1340 }
 0xfe3   :  { %2272 = vset.pattern.permute.xlu0 %v2528_v55  ;;  %2273 = vset.pattern.permute.xlu1 %v2529_v59  ;;  %v3666_v55 = vld [vmem:[%s3954_s2 + $0x74] ss:$8 sps:$4 sm:$0xff]   ;;  %v3672_v59 = vld [vmem:[%s3954_s2 + $0x70] ss:$8 sps:$4 sm:$0xff]  }
0x1049   :  { %v1326_v29 = vpop.permute.xlu0 %1325  ;;  %v1324_v10 = vpop.permute.xlu1 %1323 }
0x104a   :  { %v1327_v11 = vsel %vm4115_vm11, %v1324_v10, %v1326_v29  ;;  %v1328_v17 = vsel %vm4116_vm12, %v1326_v29, %v1324_v10  ;;  %v3690_v29 = vld [vmem:[%s3954_s2 + $0x94] ss:$8 sps:$4 sm:$0xff]   ;;  %v3696_v10 = vld [vmem:[%s3954_s2 + $0x90] ss:$8 sps:$4 sm:$0xff]   ;;  %vm4131_vm11 = vcmp.lt.s32.totalorder %v2587_v8, 1 }
0x104b   :  { %v1329_v19 = vsub.f32 0.0, %v1327_v11  ;;  %v1330_v20 = vsub.f32 0.0, %v1328_v17  ;;  %v3702_v11 = vld [vmem:[%s3954_s2 + $0xa4] ss:$8 sps:$4 sm:$0xff]   ;;  %v3708_v17 = vld [vmem:[%s3954_s2 + $0xa0] ss:$8 sps:$4 sm:$0xff]   ;;  %vm4132_vm12 = vmmov %vm4131_vm11 }
0x104d   :  { %v1320_v32 = vpop.permute.xlu0 %1319  ;;  %v1318_v33 = vpop.permute.xlu1 %1317 }
0x104e   :  { %v1321_v30 = vsel %vm4117_vm3, %v1318_v33, %v1320_v32  ;;  %v1322_v34 = vsel %vm4118_vm4, %v1320_v32, %v1318_v33  ;;  %v3715_v32 = vld [vmem:[%s3954_s2 + $0xb0] ss:$8 sps:$4 sm:$0xff]   ;;  %v3720_v33 = vld [vmem:[%s3954_s2 + $0xb4] ss:$8 sps:$4 sm:$0xff]   ;;  %vm2000_vm3 = vcmp.eq.s32.totalorder %v2587_v8, 0 }
0x104f   :  { %v1331_v22 = vsel %vm2691_vm15, %v1322_v34, %v1329_v19  ;;  %v1332_v18 = vsel %vm2695_vm0, %v1321_v30, %v1330_v20  ;;  %vm4119_vm15 = vcmp.lt.s32.totalorder %v2587_v8, 124 }
0x1050   :  { %v1343_v23 = vmul.f32 %v1341_v5, %v1331_v22  ;;  %v1344_v15 = vmul.f32 %v1341_v5, %v1332_v18  ;;  %vm4120_vm0 = vmmov %vm4119_vm15  ;;  %v3678_v5 = vld [vmem:[%s3954_s2 + $0x84] ss:$8 sps:$4 sm:$0xff]  }
0x1052   :  { %v1345_v50 = vadd.f32 %v1343_v23, %v1337_v51  ;;  %v1346_v0 = vadd.f32 %v1344_v15, %v1338_v9  ;;  %v3731_v51 = vld [vmem:[%s3954_s2 + $0xc4] ss:$8 sps:$4 sm:$0xff]   ;;  %v3736_v23 = vld [vmem:[%s3954_s2 + $0xc0] ss:$8 sps:$4 sm:$0xff]  }
0x1054   :  { %1347 = vrot.lane.b32.xlu0 %v1345_v50, %s2477_s15  ;;  %1353 = vrot.lane.b32.xlu1 %v1345_v50, %s2476_s14 }
0x1058   :  { %1394 = vperm.xlu0 %2272, %v3478_v38   ;;  %1355 = vrot.lane.b32.xlu1 %v1346_v0, %s2476_s14 }
0x105c   :  { %1349 = vrot.lane.b32.xlu1 %v1346_v0, %s2477_s15  ;;  %2275 = vset.pattern.permute.xlu0 %v2530_v24 }
0x105e   :  { %v1365_v26 = vpop.permute.xlu1 %1364  ;;  %v1371_v37 = vpop.permute.xlu0 %1370 }
0x105f   :  { %v1367_v48 = vmul.f32 %v1365_v26, %v1345_v50  ;;  %v1368_v49 = vmul.f32 %v1365_v26, %v1346_v0 }
0x1060   :  { %1400 = vperm.xlu1 %2273, %v3478_v38  }
0x1064   :  { %2274 = vset.pattern.permute.xlu1 %v2531_v27 }
0x10c6   :  { %v1354_v14 = vpop.permute.xlu1 %1353  ;;  %v1348_v40 = vpop.permute.xlu0 %1347 }
0x10ca   :  { %v1356_v4 = vpop.permute.xlu1 %1355 }
0x10cb   :  { %v1357_v6 = vsel %vm4119_vm15, %v1354_v14, %v1356_v4  ;;  %v1358_v39 = vsel %vm4120_vm0, %v1356_v4, %v1354_v14 }
0x10cc   :  { %v1359_v41 = vsub.f32 0.0, %v1357_v6  ;;  %v1360_v42 = vsub.f32 0.0, %v1358_v39  ;;  %v3757_v39 = vld [vmem:[%s3954_s2 + $0xd0] ss:$8 sps:$4 sm:$0xff]  }
0x10ce   :  { %v1350_v43 = vpop.permute.xlu1 %1349 }
0x10cf   :  { %v1351_v56 = vsel %vm4121_vm7, %v1348_v40, %v1350_v43  ;;  %v1352_v57 = vsel %vm4122_vm8, %v1350_v43, %v1348_v40  ;;  %v3778_v43 = vld [vmem:[%s3954_s2 + $0xf4] ss:$8 sps:$4 sm:$0xff]  }
0x10d0   :  { %v1361_v44 = vsel %vm2721_vm13, %v1352_v57, %v1359_v41  ;;  %v1362_v46 = vsel %vm2725_vm10, %v1351_v56, %v1360_v42  ;;  %vm4124_vm10 = vcmp.lt.s32.totalorder %v2587_v8, 126  ;;  %v3772_v42 = vld [vmem:[%s3954_s2 + $0xe0] ss:$8 sps:$4 sm:$0xff]   ;;  %v3784_v57 = vld [vmem:[%s3954_s2 + $0xf0] ss:$8 sps:$4 sm:$0xff]  }
0x10d1   :  { %v1373_v52 = vmul.f32 %v1371_v37, %v1361_v44  ;;  %v1374_v53 = vmul.f32 %v1371_v37, %v1362_v46  ;;  %vm4125_vm13 = vmmov %vm4124_vm10  ;;  %v3751_v37 = vld [vmem:[%s3954_s2 + $0xd4] ss:$8 sps:$4 sm:$0xff]  }
0x10d3   :  { %v3565_v54 = vadd.f32 %v1373_v52, %v1367_v48  ;;  %v3567_v58 = vadd.f32 %v1374_v53, %v1368_v49 }
0x10d5   :  { %1385 = vrot.lane.b32.xlu0 %v3567_v58, %s2481_s17  ;;  %1383 = vrot.lane.b32.xlu1 %v3565_v54, %s2481_s17  ;;  %s4128_s17 = smov 127  }
0x10d7   :  { %v1395_v20 = vpop.permute.xlu0 %1394 }
0x10d8   :  { %v1397_v4 = vmul.f32 %v1395_v20, %v3565_v54  ;;  %v1398_v41 = vmul.f32 %v1395_v20, %v3567_v58 }
0x10d9   :  { %1379 = vrot.lane.b32.xlu0 %v3567_v58, %s2480_s16  ;;  %1377 = vrot.lane.b32.xlu1 %v3565_v54, %s2480_s16 }
0x10dd   :  { %1424 = vperm.xlu1 %2274, %v3478_v38   ;;  %1430 = vperm.xlu0 %2275, %v3478_v38   ;;  %v3600_v38 = vld [vmem:[%s3954_s2 + $0x10] ss:$8 sps:$4 sm:$0xff]  }
0x10de   :  { %1672 = vmatpush1.bf16.msra.mxu1 %v3600_v38 }
0x10df   :  { %1673 = vmatprep.subr.bf16.mxu1 %v3606_v62  ;;  %v1401_v19 = vpop.permute.xlu1 %1400 }
0x10e1   :  { %2276 = vset.pattern.permute.xlu0 %v4123_v61 }
0x10e2   :  { %1674 = vmatpush1.bf16.msra.mxu1 %v3612_v63 }
0x10e3   :  { %1675 = vmatprep.subr.bf16.mxu1 %v3618_v2 }
0x10e6   :  { %1676 = vmatpush1.bf16.msra.mxu1 %v3624_v3 }
0x10e7   :  { %1677 = vmatprep.subr.bf16.mxu1 %v3630_v7 }
0x10ea   :  { %1678 = vmatpush1.bf16.msra.mxu1 %v3635_v12 }
0x10eb   :  { %1679 = vmatprep.subr.bf16.mxu1 %v3640_v16 }
0x10ee   :  { %1680 = vmatpush1.bf16.msra.mxu1 %v3648_v21 }
0x10ef   :  { %1681 = vmatprep.subr.bf16.mxu1 %v3654_v28 }
0x10f2   :  { %1682 = vmatpush1.bf16.msra.mxu1 %v3660_v31 }
0x10f3   :  { %1683 = vmatprep.subr.bf16.mxu1 %v3666_v55 }
0x10f6   :  { %1684 = vmatpush1.bf16.msra.mxu1 %v3672_v59 }
0x10f7   :  { %1685 = vmatprep.subr.bf16.mxu1 %v3678_v5 }
0x10fa   :  { %1686 = vmatpush1.bf16.msra.mxu1 %v3684_v35 }
0x10fb   :  { %1687 = vmatprep.subr.bf16.mxu1 %v3690_v29 }
0x10fe   :  { %1688 = vmatpush1.bf16.msra.mxu1 %v3696_v10 }
0x10ff   :  { %1689 = vmatprep.subr.bf16.mxu1 %v3702_v11 }
0x1102   :  { %1690 = vmatpush1.bf16.msra.mxu1 %v3708_v17 }
0x1103   :  { %1691 = vmatprep.subr.bf16.mxu1 %v3720_v33 }
0x1106   :  { %1692 = vmatpush1.bf16.msra.mxu1 %v3715_v32 }
0x1107   :  { %1693 = vmatprep.subr.bf16.mxu1 %v3731_v51 }
0x110a   :  { %1694 = vmatpush1.bf16.msra.mxu1 %v3736_v23 }
0x110b   :  { %1695 = vmatprep.subr.bf16.mxu1 %v3751_v37 }
0x110e   :  { %1696 = vmatpush1.bf16.msra.mxu1 %v3757_v39 }
0x110f   :  { %1697 = vmatprep.subr.bf16.mxu1 %v3764_v36 }
0x1112   :  { %1698 = vmatpush1.bf16.msra.mxu1 %v3772_v42 }
0x1113   :  { %1699 = vmatprep.subr.bf16.mxu1 %v3778_v43 }
0x1116   :  { %1700 = vmatpush1.bf16.msra.mxu1 %v3784_v57 }
0x1117   :  { %1710 = vmatprep.subr.bf16.mxu1 %v3587_v47 }
0x1147   :  { %v1386_v30 = vpop.permute.xlu0 %1385  ;;  %v1384_v34 = vpop.permute.xlu1 %1383 }
0x1148   :  { %v1387_v22 = vsel %vm4124_vm10, %v1384_v34, %v1386_v30  ;;  %v1388_v18 = vsel %vm4125_vm13, %v1386_v30, %v1384_v34 }
0x1149   :  { %v1389_v15 = vsub.f32 0.0, %v1387_v22  ;;  %v1390_v50 = vsub.f32 0.0, %v1388_v18 }
0x114b   :  { %v1380_v9 = vpop.permute.xlu0 %1379  ;;  %v1378_v0 = vpop.permute.xlu1 %1377 }
0x114c   :  { %v1381_v24 = vsel %vm4126_vm14, %v1378_v0, %v1380_v9  ;;  %v1382_v27 = vsel %vm4127_vm1, %v1380_v9, %v1378_v0 }
0x114d   :  { %v1391_v26 = vsel %vm2946_vm9, %v1382_v27, %v1389_v15  ;;  %v1392_v14 = vsel %vm2950_vm6, %v1381_v24, %v1390_v50  ;;  %vm4129_vm6 = vcmp.lt.s32.totalorder %v2587_v8, 127 }
0x114e   :  { %v1403_v6 = vmul.f32 %v1401_v19, %v1391_v26  ;;  %v1404_v25 = vmul.f32 %v1401_v19, %v1392_v14  ;;  %vm4130_vm9 = vmmov %vm4129_vm6 }
0x1150   :  { %v1405_v40 = vadd.f32 %v1403_v6, %v1397_v4  ;;  %v1406_v56 = vadd.f32 %v1404_v25, %v1398_v41  ;;  %v2420_v41 = vld [vmem:[%s3955_s3 + $0xf4] ss:$8 sps:$4 sm:$0xff]  }
0x1152   :  { %1407 = vrot.lane.b32.xlu0 %v1405_v40, %s2483_s28  ;;  %1413 = vrot.lane.b32.xlu1 %v1405_v40, %s4128_s17 }
0x1156   :  { %1415 = vrot.lane.b32.xlu1 %v1406_v56, %s4128_s17 }
0x115a   :  { %1409 = vrot.lane.b32.xlu1 %v1406_v56, %s2483_s28 }
0x115c   :  { %v1425_v44 = vpop.permute.xlu1 %1424  ;;  %v1431_v48 = vpop.permute.xlu0 %1430 }
0x115d   :  { %v1427_v22 = vmul.f32 %v1425_v44, %v1405_v40  ;;  %v1428_v18 = vmul.f32 %v1425_v44, %v1406_v56  ;;  %v2417_v40 = vld [vmem:[%s3955_s3 + $0xe4] ss:$8 sps:$4 sm:$0xff]  }
0x11c4   :  { %v1414_v46 = vpop.permute.xlu1 %1413  ;;  %v1408_v54 = vpop.permute.xlu0 %1407 }
0x11c8   :  { %v1416_v49 = vpop.permute.xlu1 %1415 }
0x11c9   :  { %v1417_v52 = vsel %vm4129_vm6, %v1414_v46, %v1416_v49  ;;  %v1418_v53 = vsel %vm4130_vm9, %v1416_v49, %v1414_v46 }
0x11ca   :  { %v1419_v58 = vsub.f32 0.0, %v1417_v52  ;;  %v1420_v61 = vsub.f32 0.0, %v1418_v53  ;;  %v13_v53 = vstv %s3956_s7 }
0x11cb   :  { %14 = vst [vmem:[#allocation2] sm:$0x1] %v13_v53 }
0x11cc   :  { %v1410_v19 = vpop.permute.xlu1 %1409 }
0x11cd   :  { %v1411_v20 = vsel %vm4131_vm11, %v1408_v54, %v1410_v19  ;;  %v1412_v47 = vsel %vm4132_vm12, %v1410_v19, %v1408_v54  ;;  %v2110_v54 = vld [vmem:[%s3957_s4] ss:$0 sm:$0xff] }
0x11ce   :  { %v1421_v30 = vsel %vm3019_vm5, %v1412_v47, %v1419_v58  ;;  %v1422_v34 = vsel %vm3023_vm2, %v1411_v20, %v1420_v61  ;;  %v2111_v58 = vld [vmem:[%s3958_s5] ss:$0 sm:$0xff]  ;;  %vm1988_vm2 = vcmask 130048   ;;  %vm2001_vm5 = vcmp.eq.s32.totalorder %v2587_v8, 1 }
0x11cf   :  { %v1433_v15 = vmul.f32 %v1431_v48, %v1421_v30  ;;  %v1434_v50 = vmul.f32 %v1431_v48, %v1422_v34  ;;  %v2112_v47 = vld [vmem:[%s3959_s6] ss:$0 sm:$0xff] }
0x11d1   :  { %v1435_v9 = vadd.f32 %v1433_v15, %v1427_v22  ;;  %v1436_v0 = vadd.f32 %v1434_v50, %v1428_v18 }
0x11d2   :  { %v2113_v18 = vld [vmem:[#allocation2] ss:$0 sm:$0xff] }
0x11d3   :  { %v3803_v24 = vpack.c.bf16 %v1435_v9, %v1435_v9  ;;  %v1438_v27 = vpack.c.bf16 %v1436_v0, %v1436_v0 }
0x11d5   :  { %v1440_v26 = vunpack.c.l.bf16 %v1438_v27  ;;  %v1439_v14 = vunpack.c.l.bf16 %v3803_v24 }
0x11d7   :  { %v1442_v4 = vsub.f32 %v1436_v0, %v1440_v26  ;;  %v1441_v6 = vsub.f32 %v1435_v9, %v1439_v14 }
0x11d9   :  { %v1444_v25 = vpack.c.bf16 %v1442_v4, %v1442_v4  ;;  %v1443_v1 = vpack.c.bf16 %v1441_v6, %v1441_v6 }
0x11db   :  { %1701 = vmatprep.mubr.bf16.mxu1 %v1444_v25 }
0x11dc   :  { %1702 = vmatmul.mubr.bf16.vlgmr.msra.gmra.mrb[4].mxu1 %v1443_v1 }
0x11dd   :  { %1711 = vmatpush1.bf16.msra.mxu1 %v3582_v45  ;;  %1742 = vmatprep.mubr.bf16.mxu1 %v1438_v27  ;;  %v2373_v45 = vld [vmem:[%s3955_s3] ss:$8 sps:$4 sm:$0xff]  }
0x11de   :  { %1712 = vmatprep.subr.bf16.mxu1 %v3592_v60  ;;  %v2378_v60 = vld [vmem:[%s3955_s3 + $0x14] ss:$8 sps:$4 sm:$0xff]  }
0x11e1   :  { %1713 = vmatpush1.bf16.msra.mxu1 %v3600_v38  ;;  %v2376_v38 = vld [vmem:[%s3955_s3 + $0x10] ss:$8 sps:$4 sm:$0xff]  }
0x11e2   :  { %1714 = vmatprep.subr.bf16.mxu1 %v3606_v62  ;;  %v2381_v62 = vld [vmem:[%s3955_s3 + $0x24] ss:$8 sps:$4 sm:$0xff]  }
0x11e5   :  { %1715 = vmatpush1.bf16.msra.mxu1 %v3612_v63  ;;  %v2379_v63 = vld [vmem:[%s3955_s3 + $0x20] ss:$8 sps:$4 sm:$0xff]  }
0x11e6   :  { %1716 = vmatprep.subr.bf16.mxu1 %v3618_v2  ;;  %v2384_v2 = vld [vmem:[%s3955_s3 + $0x34] ss:$8 sps:$4 sm:$0xff]  }
0x11e9   :  { %1717 = vmatpush1.bf16.msra.mxu1 %v3624_v3  ;;  %v2382_v3 = vld [vmem:[%s3955_s3 + $0x30] ss:$8 sps:$4 sm:$0xff]  }
0x11ea   :  { %1718 = vmatprep.subr.bf16.mxu1 %v3630_v7  ;;  %v2387_v7 = vld [vmem:[%s3955_s3 + $0x44] ss:$8 sps:$4 sm:$0xff]  }
0x11ed   :  { %1719 = vmatpush1.bf16.msra.mxu1 %v3635_v12  ;;  %v2385_v12 = vld [vmem:[%s3955_s3 + $0x40] ss:$8 sps:$4 sm:$0xff]  }
0x11ee   :  { %1720 = vmatprep.subr.bf16.mxu1 %v3640_v16  ;;  %v2390_v16 = vld [vmem:[%s3955_s3 + $0x54] ss:$8 sps:$4 sm:$0xff]  }
0x11f1   :  { %1721 = vmatpush1.bf16.msra.mxu1 %v3648_v21  ;;  %v2388_v21 = vld [vmem:[%s3955_s3 + $0x50] ss:$8 sps:$4 sm:$0xff]  }
0x11f2   :  { %1722 = vmatprep.subr.bf16.mxu1 %v3654_v28  ;;  %v2393_v28 = vld [vmem:[%s3955_s3 + $0x64] ss:$8 sps:$4 sm:$0xff]  }
0x11f5   :  { %1723 = vmatpush1.bf16.msra.mxu1 %v3660_v31  ;;  %v2391_v31 = vld [vmem:[%s3955_s3 + $0x60] ss:$8 sps:$4 sm:$0xff]  }
0x11f6   :  { %1724 = vmatprep.subr.bf16.mxu1 %v3666_v55  ;;  %v2396_v55 = vld [vmem:[%s3955_s3 + $0x74] ss:$8 sps:$4 sm:$0xff]  }
0x11f9   :  { %1725 = vmatpush1.bf16.msra.mxu1 %v3672_v59  ;;  %v2394_v59 = vld [vmem:[%s3955_s3 + $0x70] ss:$8 sps:$4 sm:$0xff]  }
0x11fa   :  { %1726 = vmatprep.subr.bf16.mxu1 %v3678_v5  ;;  %v2399_v5 = vld [vmem:[%s3955_s3 + $0x84] ss:$8 sps:$4 sm:$0xff]  }
0x11fd   :  { %1727 = vmatpush1.bf16.msra.mxu1 %v3684_v35  ;;  %v2397_v35 = vld [vmem:[%s3955_s3 + $0x80] ss:$8 sps:$4 sm:$0xff]  }
0x11fe   :  { %1728 = vmatprep.subr.bf16.mxu1 %v3690_v29  ;;  %v2402_v29 = vld [vmem:[%s3955_s3 + $0x94] ss:$8 sps:$4 sm:$0xff]  }
0x1201   :  { %1729 = vmatpush1.bf16.msra.mxu1 %v3696_v10  ;;  %v2400_v10 = vld [vmem:[%s3955_s3 + $0x90] ss:$8 sps:$4 sm:$0xff]  }
0x1202   :  { %1730 = vmatprep.subr.bf16.mxu1 %v3702_v11  ;;  %v2405_v11 = vld [vmem:[%s3955_s3 + $0xa4] ss:$8 sps:$4 sm:$0xff]  }
0x1205   :  { %1731 = vmatpush1.bf16.msra.mxu1 %v3708_v17  ;;  %v2403_v17 = vld [vmem:[%s3955_s3 + $0xa0] ss:$8 sps:$4 sm:$0xff]  }
0x1206   :  { %1732 = vmatprep.subr.bf16.mxu1 %v3720_v33  ;;  %v2406_v33 = vld [vmem:[%s3955_s3 + $0xb0] ss:$8 sps:$4 sm:$0xff]  }
0x1209   :  { %1733 = vmatpush1.bf16.msra.mxu1 %v3715_v32  ;;  %v2408_v32 = vld [vmem:[%s3955_s3 + $0xb4] ss:$8 sps:$4 sm:$0xff]  }
0x120a   :  { %1734 = vmatprep.subr.bf16.mxu1 %v3731_v51  ;;  %v2411_v51 = vld [vmem:[%s3955_s3 + $0xc4] ss:$8 sps:$4 sm:$0xff]  }
0x120d   :  { %1735 = vmatpush1.bf16.msra.mxu1 %v3736_v23  ;;  %v2409_v23 = vld [vmem:[%s3955_s3 + $0xc0] ss:$8 sps:$4 sm:$0xff]  }
0x120e   :  { %1736 = vmatprep.subr.bf16.mxu1 %v3751_v37  ;;  %v2414_v37 = vld [vmem:[%s3955_s3 + $0xd4] ss:$8 sps:$4 sm:$0xff]  }
0x1211   :  { %1737 = vmatpush1.bf16.msra.mxu1 %v3757_v39  ;;  %v2412_v39 = vld [vmem:[%s3955_s3 + $0xd0] ss:$8 sps:$4 sm:$0xff]  }
0x1212   :  { %1738 = vmatprep.subr.bf16.mxu1 %v3764_v36  ;;  %v2415_v36 = vld [vmem:[%s3955_s3 + $0xe0] ss:$8 sps:$4 sm:$0xff]  }
0x1215   :  { %1739 = vmatpush1.bf16.msra.mxu1 %v3772_v42  ;;  %v2418_v42 = vld [vmem:[%s3955_s3 + $0xf0] ss:$8 sps:$4 sm:$0xff]  }
0x1216   :  { %1740 = vmatprep.subr.bf16.mxu1 %v3778_v43 }
0x1219   :  { %1741 = vmatpush1.bf16.msra.mxu1 %v3784_v57 }
0x121a   :  { %1911 = vmatprep.subr.bf16.mxu1 %v2375_v13 }
0x121c   :  { %1743 = vmatmul.mubr.bf16.vlgmr.msra.gmra.mrb[4].mxu1 %v3803_v24 }
0x121d   :  { %1912 = vmatpush1.bf16.msra.mxu1 %v2373_v45  ;;  %1943 = vmatprep.mubr.bf16.mxu1 %v1438_v27 }
0x121e   :  { %1913 = vmatprep.subr.bf16.mxu1 %v2378_v60 }
0x1221   :  { %1914 = vmatpush1.bf16.msra.mxu1 %v2376_v38 }
0x1222   :  { %1915 = vmatprep.subr.bf16.mxu1 %v2381_v62 }
0x1225   :  { %1916 = vmatpush1.bf16.msra.mxu1 %v2379_v63 }
0x1226   :  { %1917 = vmatprep.subr.bf16.mxu1 %v2384_v2 }
0x1229   :  { %1918 = vmatpush1.bf16.msra.mxu1 %v2382_v3 }
0x122a   :  { %1919 = vmatprep.subr.bf16.mxu1 %v2387_v7 }
0x122d   :  { %1920 = vmatpush1.bf16.msra.mxu1 %v2385_v12 }
0x122e   :  { %1921 = vmatprep.subr.bf16.mxu1 %v2390_v16 }
0x1231   :  { %1922 = vmatpush1.bf16.msra.mxu1 %v2388_v21 }
0x1232   :  { %1923 = vmatprep.subr.bf16.mxu1 %v2393_v28 }
0x1235   :  { %1924 = vmatpush1.bf16.msra.mxu1 %v2391_v31 }
0x1236   :  { %1925 = vmatprep.subr.bf16.mxu1 %v2396_v55 }
0x1239   :  { %1926 = vmatpush1.bf16.msra.mxu1 %v2394_v59 }
0x123a   :  { %1927 = vmatprep.subr.bf16.mxu1 %v2399_v5 }
0x123d   :  { %1928 = vmatpush1.bf16.msra.mxu1 %v2397_v35 }
0x123e   :  { %1929 = vmatprep.subr.bf16.mxu1 %v2402_v29 }
0x1241   :  { %1930 = vmatpush1.bf16.msra.mxu1 %v2400_v10 }
0x1242   :  { %1931 = vmatprep.subr.bf16.mxu1 %v2405_v11 }
0x1245   :  { %1932 = vmatpush1.bf16.msra.mxu1 %v2403_v17 }
0x1246   :  { %1933 = vmatprep.subr.bf16.mxu1 %v2408_v32 }
0x1249   :  { %1934 = vmatpush1.bf16.msra.mxu1 %v2406_v33 }
0x124a   :  { %1935 = vmatprep.subr.bf16.mxu1 %v2411_v51 }
0x124d   :  { %1936 = vmatpush1.bf16.msra.mxu1 %v2409_v23 }
0x124e   :  { %1937 = vmatprep.subr.bf16.mxu1 %v2414_v37 }
0x1251   :  { %1938 = vmatpush1.bf16.msra.mxu1 %v2412_v39 }
0x1252   :  { %1939 = vmatprep.subr.bf16.mxu1 %v2417_v40 }
0x1255   :  { %1940 = vmatpush1.bf16.msra.mxu1 %v2415_v36 }
0x1256   :  { %1941 = vmatprep.subr.bf16.mxu1 %v2420_v41 }
0x1259   :  { %1942 = vmatpush1.bf16.msra.mxu1 %v2418_v42 }
0x125c   :  { %1944 = vmatmul.mubr.bf16.vlgmr.msra.gmra.mrb[4].mxu1 %v3803_v24 }
0x132f   :  { %v1945_v43 = vpop.f32.mrb[4].mxu1 }
0x1330   :  { %v1947_v56 = vpop.f32.mrb[5].mxu1  ;;  %v1956_v48 = vmul.f32 %v1945_v43, %v1945_v43 }
0x1331   :  { %v1957_v57 = vmul.f32 %v1947_v56, %v1947_v56  ;;  %v1949_v44 = vpop.f32.mrb[6].mxu1 }
0x1332   :  { %v1950_v46 = vpop.f32.mrb[7].mxu1 }
0x1333   :  { %v1959_v49 = vmul.f32 -1.0, %v1957_v57 }
0x1335   :  { %v1960_v52 = vadd.f32 %v1959_v49, %v1956_v48 }
0x1337   :  { %1961 = vadd.xlane.f32.xlu0 %v1960_v52 }
0x13c4   :  { %v1962_v61 = vpop.xlane.xlu0 %1961 }
0x13c5   :  { %v1970_v19 = vmul.f32 %v2110_v54, %v1962_v61 }
0x13c7   :  { %v1978_v20 = vadd.f32 %v2111_v58, %v1970_v19 }
0x13c9   :  { %v1979_v30 = vmax.f32 %v1978_v20, 0.0 }
0x13cb   :  { %v1987_v34 = vmul.f32 %v2112_v47, %v1979_v30 }
0x13cd   :  { %v1989_v22 = vsel %vm1988_vm2, %v1987_v34, 0.0 }
0x13ce   :  { %1990 = vadd.xlane.f32.xlu1 %v1989_v22 }
0x145b   :  { %v1991_v15 = vpop.xlane.xlu1 %1990 }
0x145c   :  { %v1999_v50 = vadd.f32 %v2113_v18, %v1991_v15 }
0x145e   :  { %2004 = vperm.xlu0 %2276, %v1999_v50  }
0x14dd   :  { %v2005_v9 = vpop.permute.xlu0 %2004 }
0x14de   :  { %v2007_v0 = vsel %vm2001_vm5, %v2005_v9, 0.0 }
0x14df   :  { %v2008_v24 = vsel %vm2000_vm3, %v1962_v61, %v2007_v0 }
0x14e0   :  { %2009 = vst [vmem:[%s3960_s8] sm:$0xff] %v2008_v24 }

</bundles_post_ra>
